<compile_context>
chip_gen: v7x
topology: tpu7x:2x2x1
jax: 0.10.0
libtpu: 0.0.40
codegen_flags: <defaults>
</compile_context>

<pallas_src>
import functools

import jax
import jax.numpy as jnp
from jax.experimental import pallas as pl
from jax.experimental.pallas import tpu as pltpu

_TILE_M = 512          # row-tile cap; below this a single full-extent block


def _round_up(x, m):
    return ((x + m - 1) // m) * m


# ------------------------------ Pallas kernel -------------------------------

def _conv_matmul_kernel(a_ref, b_ref, o_ref, *, relu, softplus_ch0):
    """Fused conv kernel: [tm, K] @ [K, N] on the MXU (bf16 in, f32 acc) with
    an optional ReLU prologue on the patches and an optional channel-0
    softplus epilogue on the result."""
    a = a_ref[...]
    if relu:
        a = jnp.maximum(a, 0)                      # relu1/relu2 (VPU, hidden under MXU)
    acc = jnp.dot(a, b_ref[...], preferred_element_type=jnp.float32)
    if softplus_ch0:
        # PyTorch softplus(beta=1, threshold=20), column 0 (= output channel 0)
        col = jax.lax.broadcasted_iota(jnp.int32, acc.shape, 1)
        sp = jnp.where(acc > 20.0, acc,
                       jnp.log1p(jnp.exp(jnp.minimum(acc, 20.0))))
        acc = jnp.where(col == 0, sp, acc)
    o_ref[...] = acc


def fused_conv_matmul(patches, wmat, *, relu=False, softplus_ch0=False):
    """[M, K](bf16) @ [K, N](bf16) -> [M, N](f32)."""
    M, K = patches.shape
    _, N = wmat.shape
    if M <= _TILE_M:
        tm, Mp = M, M                              # full-extent block, no pad/slice
    else:
        tm = _TILE_M                               # multiple of 16 (bf16 sublane pack)
        Mp = _round_up(M, tm)
        if Mp != M:
            patches = jnp.pad(patches, ((0, Mp - M), (0, 0)))
    kernel = functools.partial(_conv_matmul_kernel, relu=relu,
                               softplus_ch0=softplus_ch0)
    out = pl.pallas_call(
        kernel,
        out_shape=jax.ShapeDtypeStruct((Mp, N), jnp.float32),
        grid=(Mp // tm,),
        in_specs=[pl.BlockSpec((tm, K), lambda i: (i, 0)),
                  pl.BlockSpec((K, N), lambda i: (0, 0))],
        out_specs=pl.BlockSpec((tm, N), lambda i: (i, 0)),
        compiler_params=pltpu.CompilerParams(
            dimension_semantics=("parallel",)),     # lets v7x shard M over 2 TCs
    )(patches, wmat)
    return out[:M] if Mp != M else out


# --------------------------- conv building blocks ---------------------------

def _im2col(x_nhwc, kh, kw, stride, pad):
    """Zero-pad + gather kh*kw taps.  Column order is (kh, kw, Cin)."""
    N, H, W, C = x_nhwc.shape
    if kh == 1 and kw == 1 and stride == 1 and pad == 0:
        return x_nhwc.reshape(N * H * W, C), H, W
    xp = jnp.pad(x_nhwc, ((0, 0), (pad, pad), (pad, pad), (0, 0)))
    Ho = (H + 2 * pad - kh) // stride + 1
    Wo = (W + 2 * pad - kw) // stride + 1
    cols = []
    for i in range(kh):
        for j in range(kw):
            cols.append(xp[:, i:i + stride * (Ho - 1) + 1:stride,
                           j:j + stride * (Wo - 1) + 1:stride, :])
    patches = jnp.concatenate(cols, axis=-1)       # [N, Ho, Wo, kh*kw*C]
    return patches.reshape(N * Ho * Wo, kh * kw * C), Ho, Wo


def conv2d(x_nhwc, wmat, kh, kw, stride, pad, *, bn=None, relu=False,
           softplus_ch0=False):
    """nn.Conv2d (bias=False).  If `bn=(scale, shift)` is given, the preceding
    inference BatchNorm affine is applied before the conv's zero padding
    (XLA-fused into the im2col gather) and the ReLU runs as the Pallas matmul
    prologue — exactly pad(relu(bn(x))) up to bf16 rounding."""
    N = x_nhwc.shape[0]
    if bn is not None:
        scale, shift = bn
        x_nhwc = x_nhwc * scale + shift            # fp32 affine, fused by XLA
    x_bf16 = x_nhwc.astype(jnp.bfloat16)
    patches, Ho, Wo = _im2col(x_bf16, kh, kw, stride, pad)
    out = fused_conv_matmul(patches, wmat, relu=relu,
                            softplus_ch0=softplus_ch0)
    return out.reshape(N, Ho, Wo, wmat.shape[1])


def conv_transpose2d(x_nhwc, wmat, kh, kw, stride, pad, out_pad, *, bn,
                     softplus_ch0=False):
    """nn.ConvTranspose2d (bias=False) via zero-dilation + pre-flipped kernel.
    Dilation/padding zeros are inserted after the BN affine and before the
    ReLU prologue (relu(0)=0, zeros contribute nothing), matching PyTorch."""
    scale, shift = bn
    x = (x_nhwc * scale + shift).astype(jnp.bfloat16)
    N, H, W, C = x.shape
    Hd, Wd = (H - 1) * stride + 1, (W - 1) * stride + 1
    xd = jnp.zeros((N, Hd, Wd, C), x.dtype)
    xd = xd.at[:, ::stride, ::stride, :].set(x)
    pad_t, pad_b = kh - 1 - pad, kh - 1 - pad + out_pad
    pad_l, pad_r = kw - 1 - pad, kw - 1 - pad + out_pad
    xp = jnp.pad(xd, ((0, 0), (pad_t, pad_b), (pad_l, pad_r), (0, 0)))
    patches, Ho, Wo = _im2col(xp, kh, kw, 1, 0)
    out = fused_conv_matmul(patches, wmat, relu=True,
                            softplus_ch0=softplus_ch0)
    return out.reshape(N, Ho, Wo, wmat.shape[1])


# --------------------------- parameter preparation --------------------------

def _fold_bn(gamma, beta, mean, var, eps=1e-5):
    scale = gamma / jnp.sqrt(var + eps)
    shift = beta - mean * scale
    return scale, shift


def _conv_wmat(w_oihw):
    """OIHW conv weight -> [kh*kw*I, O] bf16 matmul weight (im2col order)."""
    O, I, kh, kw = w_oihw.shape
    return jnp.transpose(w_oihw, (2, 3, 1, 0)).reshape(kh * kw * I, O) \
              .astype(jnp.bfloat16)


def _convT_wmat(w_iohw):
    """IOHW ConvTranspose weight -> equivalent stride-1 conv matmul weight."""
    w_oihw = jnp.transpose(w_iohw[:, :, ::-1, ::-1], (1, 0, 2, 3))
    return _conv_wmat(w_oihw)


def _ksize(wmat, cin):
    """Recover the (square) kernel size from static shapes."""
    return int(round((wmat.shape[0] // cin) ** 0.5))


def init_dense_ed_params(key, in_channels, out_channels, blocks,
                         growth_rate=16, num_init_features=64,
                         outsize_even=False):
    keys = iter(jax.random.split(key, 512))

    def conv_w(o, i, kh, kw):
        return jax.random.normal(next(keys), (o, i, kh, kw), jnp.float32) * 0.05

    def bn_fold(c):
        g = 1.0 + 0.1 * jax.random.normal(next(keys), (c,), jnp.float32)
        b = 0.1 * jax.random.normal(next(keys), (c,), jnp.float32)
        m = 0.1 * jax.random.normal(next(keys), (c,), jnp.float32)
        v = jax.random.uniform(next(keys), (c,), jnp.float32, 0.5, 1.5)
        return _fold_bn(g, b, m, v)

    enc_block_layers = blocks[:len(blocks) // 2]
    dec_block_layers = blocks[len(blocks) // 2:]

    params = {'in_conv': _conv_wmat(conv_w(num_init_features, in_channels, 7, 7))}
    nf = num_init_features

    enc = []
    for nl in enc_block_layers:
        dls = []
        for j in range(nl):
            cin = nf + j * growth_rate
            dls.append({'bn': bn_fold(cin),
                        'wmat': _conv_wmat(conv_w(growth_rate, cin, 3, 3))})
        nf += nl * growth_rate
        trans = {'bn1': bn_fold(nf),
                 'wmat1': _conv_wmat(conv_w(nf // 2, nf, 1, 1)),
                 'bn2': bn_fold(nf // 2),
                 'wmat2': _conv_wmat(conv_w(nf // 2, nf // 2, 3, 3))}
        nf //= 2
        enc.append({'layers': dls, 'trans': trans})
    params['enc'] = enc

    dec = []
    for i, nl in enumerate(dec_block_layers):
        dls = []
        for j in range(nl):
            cin = nf + j * growth_rate
            dls.append({'bn': bn_fold(cin),
                        'wmat': _conv_wmat(conv_w(growth_rate, cin, 3, 3))})
        nf += nl * growth_rate
        last = (i == len(dec_block_layers) - 1)
        of = nf // 2
        ks = (6 if outsize_even else 3) if last else 3
        oc = out_channels if last else of
        wT = jax.random.normal(next(keys), (of, oc, ks, ks), jnp.float32) * 0.05
        trans = {'bn1': bn_fold(nf),
                 'wmat1': _conv_wmat(conv_w(of, nf, 1, 1)),
                 'bn2': bn_fold(of),
                 'wmatT': _convT_wmat(wT)}
        nf = of
        dec.append({'layers': dls, 'trans': trans})
    params['dec'] = dec
    return params


# ------------------------------ DenseED forward ------------------------------

def _dense_block(x, layers):
    for lyr in layers:
        k = _ksize(lyr['wmat'], x.shape[-1])
        # norm1 + relu1 + conv1 (3x3 s1 p1) fused into one pallas_call
        y = conv2d(x, lyr['wmat'], k, k, 1, 1, bn=lyr['bn'], relu=True)
        x = jnp.concatenate([x, y], axis=-1)          # torch.cat([x, y], dim=1)
    return x


def dense_ed_forward(x_nchw, params):
    x = jnp.transpose(x_nchw, (0, 2, 3, 1)).astype(jnp.float32)   # -> NHWC
    k_in = _ksize(params['in_conv'], x.shape[-1])
    x = conv2d(x, params['in_conv'], k_in, k_in, 2, 3)            # in_conv 7x7 s2 p3

    for blk in params['enc']:                                     # encoder
        x = _dense_block(x, blk['layers'])
        t = blk['trans']
        x = conv2d(x, t['wmat1'], 1, 1, 1, 0, bn=t['bn1'], relu=True)
        x = conv2d(x, t['wmat2'], 3, 3, 2, 1, bn=t['bn2'], relu=True)

    n_dec = len(params['dec'])
    for i, blk in enumerate(params['dec']):                       # decoder
        x = _dense_block(x, blk['layers'])
        t = blk['trans']
        x = conv2d(x, t['wmat1'], 1, 1, 1, 0, bn=t['bn1'], relu=True)
        kT = _ksize(t['wmatT'], t['bn2'][0].shape[0])
        last = (i == n_dec - 1)
        # y[:, 0] = softplus(y[:, 0]) fused into the last matmul's epilogue
        x = conv_transpose2d(x, t['wmatT'], kT, kT, 2, 1, 0, bn=t['bn2'],
                             softplus_ch0=last)

    return jnp.transpose(x, (0, 3, 1, 2))                         # -> NCHW


# ----------------------------------- main -----------------------------------

if __name__ == "__main__":
    key = jax.random.PRNGKey(0)
    kp, kx = jax.random.split(key)

    in_channels, out_channels = 3, 3
    blocks = [1, 1, 1]                 # 1 encoder block, 2 decoder blocks
    growth_rate = 4
    num_init_features = 8
    outsize_even = True                # 16x16 input -> 16x16 output

    params = init_dense_ed_params(kp, in_channels, out_channels, blocks,
                                  growth_rate=growth_rate,
                                  num_init_features=num_init_features,
                                  outsize_even=outsize_even)

    x = jax.random.normal(kx, (2, in_channels, 16, 16), jnp.float32)  # NCHW

    fwd = jax.jit(dense_ed_forward)
    y = fwd(x, params)
    jax.block_until_ready(y)

    assert y.shape == (2, out_channels, 16, 16), y.shape
    assert bool(jnp.all(jnp.isfinite(y)))
    # softplus output on channel 0 must be strictly positive
    assert bool(jnp.all(y[:, 0] > 0.0))
    print("KERNEL_OK")
</pallas_src>

<mosaic_0001>
module attributes {stable_mosaic.version = 11 : i64} {
  func.func @_conv_matmul_kernel(%arg0: i32, %arg1: memref<128x147xbf16, #tpu.memory_space<vmem>>, %arg2: memref<147x8xbf16, #tpu.memory_space<vmem>>, %arg3: memref<128x8xf32, #tpu.memory_space<vmem>>) attributes {dimension_semantics = [#tpu.dimension_semantics<parallel>], iteration_bounds = array<i64: 1>, scalar_prefetch = 0 : i64, scratch_operands = 0 : i64, tpu.core_type = #tpu.core_type<tc>, window_params = [{transform_indices = @transform_0, window_bounds = array<i64: 128, 147>}, {pipeline_mode = #tpu.pipeline_mode<synchronous>, transform_indices = @transform_1, window_bounds = array<i64: 147, 8>}, {transform_indices = @transform_2, window_bounds = array<i64: 128, 8>}]} {
    %c0 = arith.constant 0 : index
    %c0_0 = arith.constant 0 : index
    %0 = vector.load %arg1[%c0, %c0_0] : memref<128x147xbf16, #tpu.memory_space<vmem>>, vector<128x147xbf16>
    %c0_1 = arith.constant 0 : index
    %c0_2 = arith.constant 0 : index
    %1 = vector.load %arg2[%c0_1, %c0_2] : memref<147x8xbf16, #tpu.memory_space<vmem>>, vector<147x8xbf16>
    %cst = arith.constant dense<0.000000e+00> : vector<128x8xf32>
    %2 = tpu.matmul %0, %1, %cst {dimension_numbers = #tpu.dot_dimension_numbers<[1], [0], [0], [1], [0, 0, 1, 1], [], []>} : vector<128x147xbf16>, vector<147x8xbf16>, vector<128x8xf32> -> vector<128x8xf32>
    %c0_3 = arith.constant 0 : index
    %c0_4 = arith.constant 0 : index
    %3 = vector.load %arg3[%c0_3, %c0_4] : memref<128x8xf32, #tpu.memory_space<vmem>>, vector<128x8xf32>
    tpu.vector_store %arg3[%c0_3, %c0_4], %2 {strides = array<i32>} : memref<128x8xf32, #tpu.memory_space<vmem>>, vector<128x8xf32>,
    return
  }
  func.func @transform_0(%arg0: i32) -> (i32, i32) {
    %c0_i32 = arith.constant 0 : i32
    %c0_i32_0 = arith.constant 0 : i32
    return %arg0, %c0_i32 : i32, i32
  }
  func.func @transform_1(%arg0: i32) -> (i32, i32) {
    %c0_i32 = arith.constant 0 : i32
    %c0_i32_0 = arith.constant 0 : i32
    %c0_i32_1 = arith.constant 0 : i32
    return %c0_i32, %c0_i32_0 : i32, i32
  }
  func.func @transform_2(%arg0: i32) -> (i32, i32) {
    %c0_i32 = arith.constant 0 : i32
    %c0_i32_0 = arith.constant 0 : i32
    return %arg0, %c0_i32 : i32, i32
  }
}

module attributes {stable_mosaic.version = 11 : i64} {
  func.func @_conv_matmul_kernel(%arg0: i32, %arg1: memref<128x72xbf16, #tpu.memory_space<vmem>>, %arg2: memref<72x4xbf16, #tpu.memory_space<vmem>>, %arg3: memref<128x4xf32, #tpu.memory_space<vmem>>) attributes {dimension_semantics = [#tpu.dimension_semantics<parallel>], iteration_bounds = array<i64: 1>, scalar_prefetch = 0 : i64, scratch_operands = 0 : i64, tpu.core_type = #tpu.core_type<tc>, window_params = [{transform_indices = @transform_0, window_bounds = array<i64: 128, 72>}, {pipeline_mode = #tpu.pipeline_mode<synchronous>, transform_indices = @transform_1, window_bounds = array<i64: 72, 4>}, {transform_indices = @transform_2, window_bounds = array<i64: 128, 4>}]} {
    %c0 = arith.constant 0 : index
    %c0_0 = arith.constant 0 : index
    %0 = vector.load %arg1[%c0, %c0_0] : memref<128x72xbf16, #tpu.memory_space<vmem>>, vector<128x72xbf16>
    %cst = arith.constant 0.000000e+00 : bf16
    %1 = vector.broadcast %cst : bf16 to vector<128x72xbf16>
    %2 = arith.maximumf %0, %1 : vector<128x72xbf16>
    %c0_1 = arith.constant 0 : index
    %c0_2 = arith.constant 0 : index
    %3 = vector.load %arg2[%c0_1, %c0_2] : memref<72x4xbf16, #tpu.memory_space<vmem>>, vector<72x4xbf16>
    %cst_3 = arith.constant dense<0.000000e+00> : vector<128x4xf32>
    %4 = tpu.matmul %2, %3, %cst_3 {dimension_numbers = #tpu.dot_dimension_numbers<[1], [0], [0], [1], [0, 0, 1, 1], [], []>} : vector<128x72xbf16>, vector<72x4xbf16>, vector<128x4xf32> -> vector<128x4xf32>
    %c0_4 = arith.constant 0 : index
    %c0_5 = arith.constant 0 : index
    %5 = vector.load %arg3[%c0_4, %c0_5] : memref<128x4xf32, #tpu.memory_space<vmem>>, vector<128x4xf32>
    tpu.vector_store %arg3[%c0_4, %c0_5], %4 {strides = array<i32>} : memref<128x4xf32, #tpu.memory_space<vmem>>, vector<128x4xf32>,
    return
  }
  func.func @transform_0(%arg0: i32) -> (i32, i32) {
    %c0_i32 = arith.constant 0 : i32
    %c0_i32_0 = arith.constant 0 : i32
    return %arg0, %c0_i32 : i32, i32
  }
  func.func @transform_1(%arg0: i32) -> (i32, i32) {
    %c0_i32 = arith.constant 0 : i32
    %c0_i32_0 = arith.constant 0 : i32
    %c0_i32_1 = arith.constant 0 : i32
    return %c0_i32, %c0_i32_0 : i32, i32
  }
  func.func @transform_2(%arg0: i32) -> (i32, i32) {
    %c0_i32 = arith.constant 0 : i32
    %c0_i32_0 = arith.constant 0 : i32
    return %arg0, %c0_i32 : i32, i32
  }
}

module attributes {stable_mosaic.version = 11 : i64} {
  func.func @_conv_matmul_kernel(%arg0: i32, %arg1: memref<128x12xbf16, #tpu.memory_space<vmem>>, %arg2: memref<12x6xbf16, #tpu.memory_space<vmem>>, %arg3: memref<128x6xf32, #tpu.memory_space<vmem>>) attributes {dimension_semantics = [#tpu.dimension_semantics<parallel>], iteration_bounds = array<i64: 1>, scalar_prefetch = 0 : i64, scratch_operands = 0 : i64, tpu.core_type = #tpu.core_type<tc>, window_params = [{transform_indices = @transform_0, window_bounds = array<i64: 128, 12>}, {pipeline_mode = #tpu.pipeline_mode<synchronous>, transform_indices = @transform_1, window_bounds = array<i64: 12, 6>}, {transform_indices = @transform_2, window_bounds = array<i64: 128, 6>}]} {
    %c0 = arith.constant 0 : index
    %c0_0 = arith.constant 0 : index
    %0 = vector.load %arg1[%c0, %c0_0] : memref<128x12xbf16, #tpu.memory_space<vmem>>, vector<128x12xbf16>
    %cst = arith.constant 0.000000e+00 : bf16
    %1 = vector.broadcast %cst : bf16 to vector<128x12xbf16>
    %2 = arith.maximumf %0, %1 : vector<128x12xbf16>
    %c0_1 = arith.constant 0 : index
    %c0_2 = arith.constant 0 : index
    %3 = vector.load %arg2[%c0_1, %c0_2] : memref<12x6xbf16, #tpu.memory_space<vmem>>, vector<12x6xbf16>
    %cst_3 = arith.constant dense<0.000000e+00> : vector<128x6xf32>
    %4 = tpu.matmul %2, %3, %cst_3 {dimension_numbers = #tpu.dot_dimension_numbers<[1], [0], [0], [1], [0, 0, 1, 1], [], []>} : vector<128x12xbf16>, vector<12x6xbf16>, vector<128x6xf32> -> vector<128x6xf32>
    %c0_4 = arith.constant 0 : index
    %c0_5 = arith.constant 0 : index
    %5 = vector.load %arg3[%c0_4, %c0_5] : memref<128x6xf32, #tpu.memory_space<vmem>>, vector<128x6xf32>
    tpu.vector_store %arg3[%c0_4, %c0_5], %4 {strides = array<i32>} : memref<128x6xf32, #tpu.memory_space<vmem>>, vector<128x6xf32>,
    return
  }
  func.func @transform_0(%arg0: i32) -> (i32, i32) {
    %c0_i32 = arith.constant 0 : i32
    %c0_i32_0 = arith.constant 0 : i32
    return %arg0, %c0_i32 : i32, i32
  }
  func.func @transform_1(%arg0: i32) -> (i32, i32) {
    %c0_i32 = arith.constant 0 : i32
    %c0_i32_0 = arith.constant 0 : i32
    %c0_i32_1 = arith.constant 0 : i32
    return %c0_i32, %c0_i32_0 : i32, i32
  }
  func.func @transform_2(%arg0: i32) -> (i32, i32) {
    %c0_i32 = arith.constant 0 : i32
    %c0_i32_0 = arith.constant 0 : i32
    return %arg0, %c0_i32 : i32, i32
  }
}

module attributes {stable_mosaic.version = 11 : i64} {
  func.func @_conv_matmul_kernel(%arg0: i32, %arg1: memref<32x54xbf16, #tpu.memory_space<vmem>>, %arg2: memref<54x6xbf16, #tpu.memory_space<vmem>>, %arg3: memref<32x6xf32, #tpu.memory_space<vmem>>) attributes {dimension_semantics = [#tpu.dimension_semantics<parallel>], iteration_bounds = array<i64: 1>, scalar_prefetch = 0 : i64, scratch_operands = 0 : i64, tpu.core_type = #tpu.core_type<tc>, window_params = [{transform_indices = @transform_0, window_bounds = array<i64: 32, 54>}, {pipeline_mode = #tpu.pipeline_mode<synchronous>, transform_indices = @transform_1, window_bounds = array<i64: 54, 6>}, {transform_indices = @transform_2, window_bounds = array<i64: 32, 6>}]} {
    %c0 = arith.constant 0 : index
    %c0_0 = arith.constant 0 : index
    %0 = vector.load %arg1[%c0, %c0_0] : memref<32x54xbf16, #tpu.memory_space<vmem>>, vector<32x54xbf16>
    %cst = arith.constant 0.000000e+00 : bf16
    %1 = vector.broadcast %cst : bf16 to vector<32x54xbf16>
    %2 = arith.maximumf %0, %1 : vector<32x54xbf16>
    %c0_1 = arith.constant 0 : index
    %c0_2 = arith.constant 0 : index
    %3 = vector.load %arg2[%c0_1, %c0_2] : memref<54x6xbf16, #tpu.memory_space<vmem>>, vector<54x6xbf16>
    %cst_3 = arith.constant dense<0.000000e+00> : vector<32x6xf32>
    %4 = tpu.matmul %2, %3, %cst_3 {dimension_numbers = #tpu.dot_dimension_numbers<[1], [0], [0], [1], [0, 0, 1, 1], [], []>} : vector<32x54xbf16>, vector<54x6xbf16>, vector<32x6xf32> -> vector<32x6xf32>
    %c0_4 = arith.constant 0 : index
    %c0_5 = arith.constant 0 : index
    %5 = vector.load %arg3[%c0_4, %c0_5] : memref<32x6xf32, #tpu.memory_space<vmem>>, vector<32x6xf32>
    tpu.vector_store %arg3[%c0_4, %c0_5], %4 {strides = array<i32>} : memref<32x6xf32, #tpu.memory_space<vmem>>, vector<32x6xf32>,
    return
  }
  func.func @transform_0(%arg0: i32) -> (i32, i32) {
    %c0_i32 = arith.constant 0 : i32
    %c0_i32_0 = arith.constant 0 : i32
    return %arg0, %c0_i32 : i32, i32
  }
  func.func @transform_1(%arg0: i32) -> (i32, i32) {
    %c0_i32 = arith.constant 0 : i32
    %c0_i32_0 = arith.constant 0 : i32
    %c0_i32_1 = arith.constant 0 : i32
    return %c0_i32, %c0_i32_0 : i32, i32
  }
  func.func @transform_2(%arg0: i32) -> (i32, i32) {
    %c0_i32 = arith.constant 0 : i32
    %c0_i32_0 = arith.constant 0 : i32
    return %arg0, %c0_i32 : i32, i32
  }
}

module attributes {stable_mosaic.version = 11 : i64} {
  func.func @_conv_matmul_kernel(%arg0: i32, %arg1: memref<32x54xbf16, #tpu.memory_space<vmem>>, %arg2: memref<54x4xbf16, #tpu.memory_space<vmem>>, %arg3: memref<32x4xf32, #tpu.memory_space<vmem>>) attributes {dimension_semantics = [#tpu.dimension_semantics<parallel>], iteration_bounds = array<i64: 1>, scalar_prefetch = 0 : i64, scratch_operands = 0 : i64, tpu.core_type = #tpu.core_type<tc>, window_params = [{transform_indices = @transform_0, window_bounds = array<i64: 32, 54>}, {pipeline_mode = #tpu.pipeline_mode<synchronous>, transform_indices = @transform_1, window_bounds = array<i64: 54, 4>}, {transform_indices = @transform_2, window_bounds = array<i64: 32, 4>}]} {
    %c0 = arith.constant 0 : index
    %c0_0 = arith.constant 0 : index
    %0 = vector.load %arg1[%c0, %c0_0] : memref<32x54xbf16, #tpu.memory_space<vmem>>, vector<32x54xbf16>
    %cst = arith.constant 0.000000e+00 : bf16
    %1 = vector.broadcast %cst : bf16 to vector<32x54xbf16>
    %2 = arith.maximumf %0, %1 : vector<32x54xbf16>
    %c0_1 = arith.constant 0 : index
    %c0_2 = arith.constant 0 : index
    %3 = vector.load %arg2[%c0_1, %c0_2] : memref<54x4xbf16, #tpu.memory_space<vmem>>, vector<54x4xbf16>
    %cst_3 = arith.constant dense<0.000000e+00> : vector<32x4xf32>
    %4 = tpu.matmul %2, %3, %cst_3 {dimension_numbers = #tpu.dot_dimension_numbers<[1], [0], [0], [1], [0, 0, 1, 1], [], []>} : vector<32x54xbf16>, vector<54x4xbf16>, vector<32x4xf32> -> vector<32x4xf32>
    %c0_4 = arith.constant 0 : index
    %c0_5 = arith.constant 0 : index
    %5 = vector.load %arg3[%c0_4, %c0_5] : memref<32x4xf32, #tpu.memory_space<vmem>>, vector<32x4xf32>
    tpu.vector_store %arg3[%c0_4, %c0_5], %4 {strides = array<i32>} : memref<32x4xf32, #tpu.memory_space<vmem>>, vector<32x4xf32>,
    return
  }
  func.func @transform_0(%arg0: i32) -> (i32, i32) {
    %c0_i32 = arith.constant 0 : i32
    %c0_i32_0 = arith.constant 0 : i32
    return %arg0, %c0_i32 : i32, i32
  }
  func.func @transform_1(%arg0: i32) -> (i32, i32) {
    %c0_i32 = arith.constant 0 : i32
    %c0_i32_0 = arith.constant 0 : i32
    %c0_i32_1 = arith.constant 0 : i32
    return %c0_i32, %c0_i32_0 : i32, i32
  }
  func.func @transform_2(%arg0: i32) -> (i32, i32) {
    %c0_i32 = arith.constant 0 : i32
    %c0_i32_0 = arith.constant 0 : i32
    return %arg0, %c0_i32 : i32, i32
  }
}

module attributes {stable_mosaic.version = 11 : i64} {
  func.func @_conv_matmul_kernel(%arg0: i32, %arg1: memref<32x10xbf16, #tpu.memory_space<vmem>>, %arg2: memref<10x5xbf16, #tpu.memory_space<vmem>>, %arg3: memref<32x5xf32, #tpu.memory_space<vmem>>) attributes {dimension_semantics = [#tpu.dimension_semantics<parallel>], iteration_bounds = array<i64: 1>, scalar_prefetch = 0 : i64, scratch_operands = 0 : i64, tpu.core_type = #tpu.core_type<tc>, window_params = [{transform_indices = @transform_0, window_bounds = array<i64: 32, 10>}, {pipeline_mode = #tpu.pipeline_mode<synchronous>, transform_indices = @transform_1, window_bounds = array<i64: 10, 5>}, {transform_indices = @transform_2, window_bounds = array<i64: 32, 5>}]} {
    %c0 = arith.constant 0 : index
    %c0_0 = arith.constant 0 : index
    %0 = vector.load %arg1[%c0, %c0_0] : memref<32x10xbf16, #tpu.memory_space<vmem>>, vector<32x10xbf16>
    %cst = arith.constant 0.000000e+00 : bf16
    %1 = vector.broadcast %cst : bf16 to vector<32x10xbf16>
    %2 = arith.maximumf %0, %1 : vector<32x10xbf16>
    %c0_1 = arith.constant 0 : index
    %c0_2 = arith.constant 0 : index
    %3 = vector.load %arg2[%c0_1, %c0_2] : memref<10x5xbf16, #tpu.memory_space<vmem>>, vector<10x5xbf16>
    %cst_3 = arith.constant dense<0.000000e+00> : vector<32x5xf32>
    %4 = tpu.matmul %2, %3, %cst_3 {dimension_numbers = #tpu.dot_dimension_numbers<[1], [0], [0], [1], [0, 0, 1, 1], [], []>} : vector<32x10xbf16>, vector<10x5xbf16>, vector<32x5xf32> -> vector<32x5xf32>
    %c0_4 = arith.constant 0 : index
    %c0_5 = arith.constant 0 : index
    %5 = vector.load %arg3[%c0_4, %c0_5] : memref<32x5xf32, #tpu.memory_space<vmem>>, vector<32x5xf32>
    tpu.vector_store %arg3[%c0_4, %c0_5], %4 {strides = array<i32>} : memref<32x5xf32, #tpu.memory_space<vmem>>, vector<32x5xf32>,
    return
  }
  func.func @transform_0(%arg0: i32) -> (i32, i32) {
    %c0_i32 = arith.constant 0 : i32
    %c0_i32_0 = arith.constant 0 : i32
    return %arg0, %c0_i32 : i32, i32
  }
  func.func @transform_1(%arg0: i32) -> (i32, i32) {
    %c0_i32 = arith.constant 0 : i32
    %c0_i32_0 = arith.constant 0 : i32
    %c0_i32_1 = arith.constant 0 : i32
    return %c0_i32, %c0_i32_0 : i32, i32
  }
  func.func @transform_2(%arg0: i32) -> (i32, i32) {
    %c0_i32 = arith.constant 0 : i32
    %c0_i32_0 = arith.constant 0 : i32
    return %arg0, %c0_i32 : i32, i32
  }
}

module attributes {stable_mosaic.version = 11 : i64} {
  func.func @_conv_matmul_kernel(%arg0: i32, %arg1: memref<98x45xbf16, #tpu.memory_space<vmem>>, %arg2: memref<45x5xbf16, #tpu.memory_space<vmem>>, %arg3: memref<98x5xf32, #tpu.memory_space<vmem>>) attributes {dimension_semantics = [#tpu.dimension_semantics<parallel>], iteration_bounds = array<i64: 1>, scalar_prefetch = 0 : i64, scratch_operands = 0 : i64, tpu.core_type = #tpu.core_type<tc>, window_params = [{transform_indices = @transform_0, window_bounds = array<i64: 98, 45>}, {pipeline_mode = #tpu.pipeline_mode<synchronous>, transform_indices = @transform_1, window_bounds = array<i64: 45, 5>}, {transform_indices = @transform_2, window_bounds = array<i64: 98, 5>}]} {
    %c0 = arith.constant 0 : index
    %c0_0 = arith.constant 0 : index
    %0 = vector.load %arg1[%c0, %c0_0] : memref<98x45xbf16, #tpu.memory_space<vmem>>, vector<98x45xbf16>
    %cst = arith.constant 0.000000e+00 : bf16
    %1 = vector.broadcast %cst : bf16 to vector<98x45xbf16>
    %2 = arith.maximumf %0, %1 : vector<98x45xbf16>
    %c0_1 = arith.constant 0 : index
    %c0_2 = arith.constant 0 : index
    %3 = vector.load %arg2[%c0_1, %c0_2] : memref<45x5xbf16, #tpu.memory_space<vmem>>, vector<45x5xbf16>
    %cst_3 = arith.constant dense<0.000000e+00> : vector<98x5xf32>
    %4 = tpu.matmul %2, %3, %cst_3 {dimension_numbers = #tpu.dot_dimension_numbers<[1], [0], [0], [1], [0, 0, 1, 1], [], []>} : vector<98x45xbf16>, vector<45x5xbf16>, vector<98x5xf32> -> vector<98x5xf32>
    %c0_4 = arith.constant 0 : index
    %c0_5 = arith.constant 0 : index
    %5 = vector.load %arg3[%c0_4, %c0_5] : memref<98x5xf32, #tpu.memory_space<vmem>>, vector<98x5xf32>
    tpu.vector_store %arg3[%c0_4, %c0_5], %4 {strides = array<i32>} : memref<98x5xf32, #tpu.memory_space<vmem>>, vector<98x5xf32>,
    return
  }
  func.func @transform_0(%arg0: i32) -> (i32, i32) {
    %c0_i32 = arith.constant 0 : i32
    %c0_i32_0 = arith.constant 0 : i32
    return %arg0, %c0_i32 : i32, i32
  }
  func.func @transform_1(%arg0: i32) -> (i32, i32) {
    %c0_i32 = arith.constant 0 : i32
    %c0_i32_0 = arith.constant 0 : i32
    %c0_i32_1 = arith.constant 0 : i32
    return %c0_i32, %c0_i32_0 : i32, i32
  }
  func.func @transform_2(%arg0: i32) -> (i32, i32) {
    %c0_i32 = arith.constant 0 : i32
    %c0_i32_0 = arith.constant 0 : i32
    return %arg0, %c0_i32 : i32, i32
  }
}

module attributes {stable_mosaic.version = 11 : i64} {
  func.func @_conv_matmul_kernel(%arg0: i32, %arg1: memref<98x45xbf16, #tpu.memory_space<vmem>>, %arg2: memref<45x4xbf16, #tpu.memory_space<vmem>>, %arg3: memref<98x4xf32, #tpu.memory_space<vmem>>) attributes {dimension_semantics = [#tpu.dimension_semantics<parallel>], iteration_bounds = array<i64: 1>, scalar_prefetch = 0 : i64, scratch_operands = 0 : i64, tpu.core_type = #tpu.core_type<tc>, window_params = [{transform_indices = @transform_0, window_bounds = array<i64: 98, 45>}, {pipeline_mode = #tpu.pipeline_mode<synchronous>, transform_indices = @transform_1, window_bounds = array<i64: 45, 4>}, {transform_indices = @transform_2, window_bounds = array<i64: 98, 4>}]} {
    %c0 = arith.constant 0 : index
    %c0_0 = arith.constant 0 : index
    %0 = vector.load %arg1[%c0, %c0_0] : memref<98x45xbf16, #tpu.memory_space<vmem>>, vector<98x45xbf16>
    %cst = arith.constant 0.000000e+00 : bf16
    %1 = vector.broadcast %cst : bf16 to vector<98x45xbf16>
    %2 = arith.maximumf %0, %1 : vector<98x45xbf16>
    %c0_1 = arith.constant 0 : index
    %c0_2 = arith.constant 0 : index
    %3 = vector.load %arg2[%c0_1, %c0_2] : memref<45x4xbf16, #tpu.memory_space<vmem>>, vector<45x4xbf16>
    %cst_3 = arith.constant dense<0.000000e+00> : vector<98x4xf32>
    %4 = tpu.matmul %2, %3, %cst_3 {dimension_numbers = #tpu.dot_dimension_numbers<[1], [0], [0], [1], [0, 0, 1, 1], [], []>} : vector<98x45xbf16>, vector<45x4xbf16>, vector<98x4xf32> -> vector<98x4xf32>
    %c0_4 = arith.constant 0 : index
    %c0_5 = arith.constant 0 : index
    %5 = vector.load %arg3[%c0_4, %c0_5] : memref<98x4xf32, #tpu.memory_space<vmem>>, vector<98x4xf32>
    tpu.vector_store %arg3[%c0_4, %c0_5], %4 {strides = array<i32>} : memref<98x4xf32, #tpu.memory_space<vmem>>, vector<98x4xf32>,
    return
  }
  func.func @transform_0(%arg0: i32) -> (i32, i32) {
    %c0_i32 = arith.constant 0 : i32
    %c0_i32_0 = arith.constant 0 : i32
    return %arg0, %c0_i32 : i32, i32
  }
  func.func @transform_1(%arg0: i32) -> (i32, i32) {
    %c0_i32 = arith.constant 0 : i32
    %c0_i32_0 = arith.constant 0 : i32
    %c0_i32_1 = arith.constant 0 : i32
    return %c0_i32, %c0_i32_0 : i32, i32
  }
  func.func @transform_2(%arg0: i32) -> (i32, i32) {
    %c0_i32 = arith.constant 0 : i32
    %c0_i32_0 = arith.constant 0 : i32
    return %arg0, %c0_i32 : i32, i32
  }
}

module attributes {stable_mosaic.version = 11 : i64} {
  func.func @_conv_matmul_kernel(%arg0: i32, %arg1: memref<98x9xbf16, #tpu.memory_space<vmem>>, %arg2: memref<9x4xbf16, #tpu.memory_space<vmem>>, %arg3: memref<98x4xf32, #tpu.memory_space<vmem>>) attributes {dimension_semantics = [#tpu.dimension_semantics<parallel>], iteration_bounds = array<i64: 1>, scalar_prefetch = 0 : i64, scratch_operands = 0 : i64, tpu.core_type = #tpu.core_type<tc>, window_params = [{transform_indices = @transform_0, window_bounds = array<i64: 98, 9>}, {pipeline_mode = #tpu.pipeline_mode<synchronous>, transform_indices = @transform_1, window_bounds = array<i64: 9, 4>}, {transform_indices = @transform_2, window_bounds = array<i64: 98, 4>}]} {
    %c0 = arith.constant 0 : index
    %c0_0 = arith.constant 0 : index
    %0 = vector.load %arg1[%c0, %c0_0] : memref<98x9xbf16, #tpu.memory_space<vmem>>, vector<98x9xbf16>
    %cst = arith.constant 0.000000e+00 : bf16
    %1 = vector.broadcast %cst : bf16 to vector<98x9xbf16>
    %2 = arith.maximumf %0, %1 : vector<98x9xbf16>
    %c0_1 = arith.constant 0 : index
    %c0_2 = arith.constant 0 : index
    %3 = vector.load %arg2[%c0_1, %c0_2] : memref<9x4xbf16, #tpu.memory_space<vmem>>, vector<9x4xbf16>
    %cst_3 = arith.constant dense<0.000000e+00> : vector<98x4xf32>
    %4 = tpu.matmul %2, %3, %cst_3 {dimension_numbers = #tpu.dot_dimension_numbers<[1], [0], [0], [1], [0, 0, 1, 1], [], []>} : vector<98x9xbf16>, vector<9x4xbf16>, vector<98x4xf32> -> vector<98x4xf32>
    %c0_4 = arith.constant 0 : index
    %c0_5 = arith.constant 0 : index
    %5 = vector.load %arg3[%c0_4, %c0_5] : memref<98x4xf32, #tpu.memory_space<vmem>>, vector<98x4xf32>
    tpu.vector_store %arg3[%c0_4, %c0_5], %4 {strides = array<i32>} : memref<98x4xf32, #tpu.memory_space<vmem>>, vector<98x4xf32>,
    return
  }
  func.func @transform_0(%arg0: i32) -> (i32, i32) {
    %c0_i32 = arith.constant 0 : i32
    %c0_i32_0 = arith.constant 0 : i32
    return %arg0, %c0_i32 : i32, i32
  }
  func.func @transform_1(%arg0: i32) -> (i32, i32) {
    %c0_i32 = arith.constant 0 : i32
    %c0_i32_0 = arith.constant 0 : i32
    %c0_i32_1 = arith.constant 0 : i32
    return %c0_i32, %c0_i32_0 : i32, i32
  }
  func.func @transform_2(%arg0: i32) -> (i32, i32) {
    %c0_i32 = arith.constant 0 : i32
    %c0_i32_0 = arith.constant 0 : i32
    return %arg0, %c0_i32 : i32, i32
  }
}

module attributes {stable_mosaic.version = 11 : i64} {
  func.func @_conv_matmul_kernel(%arg0: i32, %arg1: memref<512x144xbf16, #tpu.memory_space<vmem>>, %arg2: memref<144x3xbf16, #tpu.memory_space<vmem>>, %arg3: memref<512x3xf32, #tpu.memory_space<vmem>>) attributes {dimension_semantics = [#tpu.dimension_semantics<parallel>], iteration_bounds = array<i64: 1>, scalar_prefetch = 0 : i64, scratch_operands = 0 : i64, tpu.core_type = #tpu.core_type<tc>, window_params = [{transform_indices = @transform_0, window_bounds = array<i64: 512, 144>}, {pipeline_mode = #tpu.pipeline_mode<synchronous>, transform_indices = @transform_1, window_bounds = array<i64: 144, 3>}, {transform_indices = @transform_2, window_bounds = array<i64: 512, 3>}]} {
    %c0 = arith.constant 0 : index
    %c0_0 = arith.constant 0 : index
    %0 = vector.load %arg1[%c0, %c0_0] : memref<512x144xbf16, #tpu.memory_space<vmem>>, vector<512x144xbf16>
    %cst = arith.constant 0.000000e+00 : bf16
    %1 = vector.broadcast %cst : bf16 to vector<512x144xbf16>
    %2 = arith.maximumf %0, %1 : vector<512x144xbf16>
    %c0_1 = arith.constant 0 : index
    %c0_2 = arith.constant 0 : index
    %3 = vector.load %arg2[%c0_1, %c0_2] : memref<144x3xbf16, #tpu.memory_space<vmem>>, vector<144x3xbf16>
    %cst_3 = arith.constant dense<0.000000e+00> : vector<512x3xf32>
    %4 = tpu.matmul %2, %3, %cst_3 {dimension_numbers = #tpu.dot_dimension_numbers<[1], [0], [0], [1], [0, 0, 1, 1], [], []>} : vector<512x144xbf16>, vector<144x3xbf16>, vector<512x3xf32> -> vector<512x3xf32>
    %5 = tpu.iota {dimensions = array<i32: 1>} : vector<512x3xi32>
    %cst_4 = arith.constant 2.000000e+01 : f32
    %6 = vector.broadcast %cst_4 : f32 to vector<512x3xf32>
    %7 = arith.cmpf ogt, %4, %6 : vector<512x3xf32>
    %cst_5 = arith.constant 2.000000e+01 : f32
    %8 = vector.broadcast %cst_5 : f32 to vector<512x3xf32>
    %9 = arith.minimumf %4, %8 : vector<512x3xf32>
    %10 = math.exp %9 : vector<512x3xf32>
    %11 = math.log1p %10 : vector<512x3xf32>
    %12 = arith.select %7, %4, %11 : vector<512x3xi1>, vector<512x3xf32>
    %c0_i32 = arith.constant 0 : i32
    %13 = vector.broadcast %c0_i32 : i32 to vector<512x3xi32>
    %14 = arith.cmpi eq, %5, %13 : vector<512x3xi32>
    %15 = arith.select %14, %12, %4 : vector<512x3xi1>, vector<512x3xf32>
    %c0_6 = arith.constant 0 : index
    %c0_7 = arith.constant 0 : index
    %16 = vector.load %arg3[%c0_6, %c0_7] : memref<512x3xf32, #tpu.memory_space<vmem>>, vector<512x3xf32>
    tpu.vector_store %arg3[%c0_6, %c0_7], %15 {strides = array<i32>} : memref<512x3xf32, #tpu.memory_space<vmem>>, vector<512x3xf32>,
    return
  }
  func.func @transform_0(%arg0: i32) -> (i32, i32) {
    %c0_i32 = arith.constant 0 : i32
    %c0_i32_0 = arith.constant 0 : i32
    return %arg0, %c0_i32 : i32, i32
  }
  func.func @transform_1(%arg0: i32) -> (i32, i32) {
    %c0_i32 = arith.constant 0 : i32
    %c0_i32_0 = arith.constant 0 : i32
    %c0_i32_1 = arith.constant 0 : i32
    return %c0_i32, %c0_i32_0 : i32, i32
  }
  func.func @transform_2(%arg0: i32) -> (i32, i32) {
    %c0_i32 = arith.constant 0 : i32
    %c0_i32_0 = arith.constant 0 : i32
    return %arg0, %c0_i32 : i32, i32
  }
}

</mosaic_0001>

<bundles_post_ra>
// kernel: dense_ed_forward.11
= control target key start
LH: loop header
LB: loop body
LE: loop exit
PB: predicated region body
PF: predicated region fallthrough
CT: control target
= control target key end

     0   :  { %v345_v5 = vmov 0   ;;  %vm120_vm0 = vcmask 588800   ;;  %vm145_vm1 = vcmask 1043456   ;;  %vm246_vm2 = vcmask 31744   ;;  %s496_s1 = inlined_call_operand.vmem [shape: bf16[72,4], index: 1, kind: input, shape index: {}]   ;;  %s497_s0 = inlined_call_operand.vmem [shape: bf16[128,72], index: 0, kind: input, shape index: {}]   ;;  %s498_s2 = inlined_call_operand.vmem [shape: f32[128,4], index: 2, kind: output, shape index: {}]  }
   0x1   :  { %v340_v0 = vld [vmem:[%s496_s1] sm:$0xff]   ;;  %v341_v1 = vld [vmem:[%s496_s1 + $0x8] sm:$0xff]   ;;  %v342_v2 = vld [vmem:[%s496_s1 + $0x10] sm:$0xff]  }
   0x2   :  { %301 = vmatprep.subr.bf16.mxu0 %v340_v0  ;;  %327 = vmatprep.subr.bf16.mxu1 %v340_v0  ;;  %v12_v3 = vld [vmem:[%s497_s0] sm:$0xf]  ;;  %v13_v4 = vld [vmem:[%s497_s0 + $0x4] sm:$0xf]  ;;  %v343_v12 = vld [vmem:[%s496_s1 + $0x18] sm:$0xff]  }
   0x3   :  { %302 = vmatpush3.bf16.msra.mxu0 %v340_v0  ;;  %332 = vmatpush3.bf16.msra.mxu1 %v340_v0  ;;  %v28_v6 = vmax.bf16 %v345_v5, %v12_v3  ;;  %v20_v7 = vld [vmem:[%s497_s0 + $0x20] sm:$0xf]  ;;  %v21_v8 = vld [vmem:[%s497_s0 + $0x24] sm:$0xf]  ;;  %v29_v9 = vmax.bf16 %v345_v5, %v13_v4  ;;  %v14_v16 = vld [vmem:[%s497_s0 + $0x8] sm:$0xf] }
   0x4   :  { %303 = vmatprep.subr.bf16.mxu0 %v341_v1  ;;  %328 = vmatprep.subr.bf16.mxu1 %v341_v1  ;;  %v36_v10 = vmax.bf16 %v345_v5, %v20_v7  ;;  %v37_v11 = vmax.bf16 %v345_v5, %v21_v8  ;;  %v344_v15 = vld [vmem:[%s496_s1 + $0x20] ss:$0 sps:$4 sm:$0xff]   ;;  %v15_v17 = vld [vmem:[%s497_s0 + $0xc] sm:$0xf]  ;;  %v22_v18 = vld [vmem:[%s497_s0 + $0x28] sm:$0xf]  ;;  %v30_v24 = vmax.bf16 %v345_v5, %v14_v16 }
   0x5   :  { %v267_v13 = vcombine.low %v28_v6, %v29_v9  ;;  %v23_v19 = vld [vmem:[%s497_s0 + $0x2c] sm:$0xf]  ;;  %v16_v20 = vld [vmem:[%s497_s0 + $0x10] sm:$0xf]  ;;  %v17_v21 = vld [vmem:[%s497_s0 + $0x14] sm:$0xf]  ;;  %v31_v25 = vmax.bf16 %v345_v5, %v15_v17  ;;  %v38_v26 = vmax.bf16 %v345_v5, %v22_v18 }
   0x6   :  { %v271_v14 = vcombine.low %v36_v10, %v37_v11  ;;  %v24_v22 = vld [vmem:[%s497_s0 + $0x30] sm:$0xf]  ;;  %v25_v23 = vld [vmem:[%s497_s0 + $0x34] sm:$0xf]  ;;  %v39_v27 = vmax.bf16 %v345_v5, %v23_v19  ;;  %v32_v28 = vmax.bf16 %v345_v5, %v16_v20  ;;  %v33_v29 = vmax.bf16 %v345_v5, %v17_v21  ;;  %v18_v35 = vld [vmem:[%s497_s0 + $0x18] sm:$0xf] }
   0x7   :  { %304 = vmatpush3.bf16.msra.mxu0 %v341_v1  ;;  %333 = vmatpush3.bf16.msra.mxu1 %v341_v1  ;;  %v40_v30 = vmax.bf16 %v345_v5, %v24_v22  ;;  %v41_v31 = vmax.bf16 %v345_v5, %v25_v23  ;;  %v147_v32 = vsel %vm145_vm1, %v344_v15, 0  ;;  %v268_v33 = vcombine.low %v30_v24, %v31_v25  ;;  %v19_v38 = vld [vmem:[%s497_s0 + $0x1c] sm:$0xf]  ;;  %v26_v39 = vld [vmem:[%s497_s0 + $0x38] sm:$0xf] }
   0x8   :  { %305 = vmatprep.subr.bf16.mxu0 %v342_v2  ;;  %329 = vmatprep.subr.bf16.mxu1 %v342_v2  ;;  %v272_v34 = vcombine.low %v38_v26, %v39_v27  ;;  %v269_v36 = vcombine.low %v32_v28, %v33_v29  ;;  %v27_v40 = vld [vmem:[%s497_s0 + $0x3c] sm:$0xf]  ;;  %v34_v41 = vmax.bf16 %v345_v5, %v18_v35 }
   0x9   :  { %311 = vmatprep.mubr.msk.bf16.mxu0 %vm120_vm0, %v267_v13  ;;  %319 = vmatprep.mubr.msk.bf16.mxu1 %vm120_vm0, %v271_v14  ;;  %v273_v37 = vcombine.low %v40_v30, %v41_v31  ;;  %v35_v42 = vmax.bf16 %v345_v5, %v19_v38  ;;  %v42_v43 = vmax.bf16 %v345_v5, %v26_v39 }
   0xa   :  { %v43_v44 = vmax.bf16 %v345_v5, %v27_v40 }
   0xb   :  { %306 = vmatpush3.bf16.msra.mxu0 %v342_v2  ;;  %334 = vmatpush3.bf16.msra.mxu1 %v342_v2  ;;  %v270_v45 = vcombine.low %v34_v41, %v35_v42 }
   0xc   :  { %307 = vmatprep.subr.bf16.mxu0 %v343_v12  ;;  %330 = vmatprep.subr.bf16.mxu1 %v343_v12  ;;  %v274_v46 = vcombine.low %v42_v43, %v43_v44 }
   0xf   :  { %308 = vmatpush3.bf16.msra.mxu0 %v343_v12  ;;  %335 = vmatpush3.bf16.msra.mxu1 %v343_v12 }
  0x10   :  { %337 = vmatprep.subr.msk.bf16.mxu0 %vm145_vm1, %v344_v15  ;;  %338 = vmatprep.subr.msk.bf16.mxu1 %vm145_vm1, %v344_v15 }
  0x13   :  { %310 = vmatpush3.bf16.msra.mxu0 %v147_v32  ;;  %336 = vmatpush3.bf16.msra.mxu1 %v147_v32 }
  0x16   :  { %312 = vmatmul.mubr.msk.bf16.vlgmr.msra.gmra.mrb[0].mxu0 %vm120_vm0, %v268_v33  ;;  %320 = vmatmul.mubr.msk.bf16.vlgmr.msra.gmra.mrb[0].mxu1 %vm120_vm0, %v272_v34 }
  0x17   :  { %315 = vmatprep.mubr.msk.bf16.mxu0 %vm120_vm0, %v269_v36  ;;  %323 = vmatprep.mubr.msk.bf16.mxu1 %vm120_vm0, %v273_v37 }
  0x1e   :  { %316 = vmatmul.mubr.msk.bf16.gmra.mrb[4].mxu0 %vm120_vm0, %v270_v45  ;;  %324 = vmatmul.mubr.msk.bf16.gmra.mrb[4].mxu1 %vm120_vm0, %v274_v46 }
  0xe9   :  { %v313_v47 = vpop.f32.mrb[0].mxu0  ;;  %v321_v48 = vpop.f32.mrb[0].mxu1 }
  0xea   :  { %249 = vst.msk [vmem:[%s498_s2 + $0x10] sm:$0xff] %vm246_vm2, %v313_v47  ;;  %257 = vst.msk [vmem:[%s498_s2 + $0x50] sm:$0xff] %vm246_vm2, %v321_v48  ;;  %v183_v49 = vpop.f32.mrb[1].mxu0  ;;  %v215_v50 = vpop.f32.mrb[1].mxu1 }
  0xeb   :  { %247 = vst.msk [vmem:[%s498_s2] sm:$0xff] %vm246_vm2, %v183_v49  ;;  %255 = vst.msk [vmem:[%s498_s2 + $0x40] sm:$0xff] %vm246_vm2, %v215_v50  ;;  %v314_v51 = vpop.f32.mrb[2].mxu0  ;;  %v322_v52 = vpop.f32.mrb[2].mxu1 }
  0xec   :  { %250 = vst.msk [vmem:[%s498_s2 + $0x18] sm:$0xff] %vm246_vm2, %v314_v51  ;;  %258 = vst.msk [vmem:[%s498_s2 + $0x58] sm:$0xff] %vm246_vm2, %v322_v52  ;;  %v186_v53 = vpop.f32.mrb[3].mxu0  ;;  %v218_v54 = vpop.f32.mrb[3].mxu1 }
  0xed   :  { %248 = vst.msk [vmem:[%s498_s2 + $0x8] sm:$0xff] %vm246_vm2, %v186_v53  ;;  %256 = vst.msk [vmem:[%s498_s2 + $0x48] sm:$0xff] %vm246_vm2, %v218_v54 }
  0xf1   :  { %v317_v55 = vpop.f32.mrb[4].mxu0  ;;  %v325_v56 = vpop.f32.mrb[4].mxu1 }
  0xf2   :  { %253 = vst.msk [vmem:[%s498_s2 + $0x30] sm:$0xff] %vm246_vm2, %v317_v55  ;;  %261 = vst.msk [vmem:[%s498_s2 + $0x70] sm:$0xff] %vm246_vm2, %v325_v56  ;;  %v199_v57 = vpop.f32.mrb[5].mxu0  ;;  %v231_v58 = vpop.f32.mrb[5].mxu1 }
  0xf3   :  { %251 = vst.msk [vmem:[%s498_s2 + $0x20] sm:$0xff] %vm246_vm2, %v199_v57  ;;  %259 = vst.msk [vmem:[%s498_s2 + $0x60] sm:$0xff] %vm246_vm2, %v231_v58  ;;  %v318_v59 = vpop.f32.mrb[6].mxu0  ;;  %v326_v60 = vpop.f32.mrb[6].mxu1 }
  0xf4   :  { %254 = vst.msk [vmem:[%s498_s2 + $0x38] sm:$0xff] %vm246_vm2, %v318_v59  ;;  %262 = vst.msk [vmem:[%s498_s2 + $0x78] sm:$0xff] %vm246_vm2, %v326_v60  ;;  %v202_v61 = vpop.f32.mrb[7].mxu0  ;;  %v234_v62 = vpop.f32.mrb[7].mxu1 }
  0xf5   :  { %252 = vst.msk [vmem:[%s498_s2 + $0x28] sm:$0xff] %vm246_vm2, %v202_v61  ;;  %260 = vst.msk [vmem:[%s498_s2 + $0x68] sm:$0xff] %vm246_vm2, %v234_v62 }

// kernel: dense_ed_forward.10
= control target key start
LH: loop header
LB: loop body
LE: loop exit
PB: predicated region body
PF: predicated region fallthrough
CT: control target
= control target key end

     0   :  { %v416_v0 = vmov 0   ;;  %vm176_vm0 = vcmask 154624   ;;  %vm201_vm1 = vcmask 1040384   ;;  %vm202_vm2 = vcmask 1041408   ;;  %s583_s1 = inlined_call_operand.vmem [shape: bf16[147,8], index: 1, kind: input, shape index: {}]   ;;  %s584_s0 = inlined_call_operand.vmem [shape: bf16[128,147], index: 0, kind: input, shape index: {}]   ;;  %s585_s2 = inlined_call_operand.vmem [shape: f32[128,8], index: 2, kind: output, shape index: {}]  }
   0x1   :  { %208 = vmatprep.subr.bf16.mxu0 %v416_v0  ;;  %360 = vmatprep.subr.bf16.mxu1 %v416_v0  ;;  %v382_v1 = vld [vmem:[%s583_s1] sm:$0xff]   ;;  %v383_v2 = vld [vmem:[%s583_s1 + $0x8] sm:$0xff]   ;;  %v384_v3 = vld [vmem:[%s583_s1 + $0x10] sm:$0xff]   ;;  %v417_v11 = vmov 65535   ;;  %vm305_vm3 = vcmask 64512  }
   0x2   :  { %209 = vmatpush1.bf16.msra.mxu0 %v382_v1  ;;  %370 = vmatpush1.bf16.msra.mxu1 %v382_v1  ;;  %v385_v4 = vld [vmem:[%s583_s1 + $0x18] sm:$0xff]   ;;  %v394_v5 = vld [vmem:[%s584_s0 + $0x4] ss:$8 sps:$4 sm:$0xff]   ;;  %v388_v9 = vld [vmem:[%s583_s1 + $0x30] sm:$0xff]   ;;  %v203_v12 = vsel %vm201_vm1, 4294967295, %v417_v11 }
   0x3   :  { %210 = vmatprep.subr.bf16.mxu0 %v416_v0  ;;  %361 = vmatprep.subr.bf16.mxu1 %v416_v0  ;;  %v397_v6 = vld [vmem:[%s584_s0 + $0x44] ss:$8 sps:$4 sm:$0xff]   ;;  %v389_v10 = vld [vmem:[%s583_s1 + $0x38] sm:$0xff]   ;;  %v391_v14 = vld [vmem:[%s583_s1 + $0x48] ss:$0 sps:$4 sm:$0x33]  }
   0x4   :  { %352 = vmatprep.mubr.msk.bf16.mxu0 %vm176_vm0, %v394_v5  ;;  %v386_v7 = vld [vmem:[%s583_s1 + $0x20] sm:$0xff]   ;;  %356 = vmatprep.mubr.msk.bf16.mxu1 %vm176_vm0, %v397_v6  ;;  %v387_v8 = vld [vmem:[%s583_s1 + $0x28] sm:$0xff]   ;;  %v204_v15 = vsel %vm202_vm2, %v203_v12, 0  ;;  %v398_v19 = vld [vmem:[%s584_s0 + $0x14] ss:$8 sps:$4 sm:$0xff]  }
   0x5   :  { %v390_v13 = vld [vmem:[%s583_s1 + $0x40] sm:$0xff]   ;;  %v206_v16 = vand.u32 %v391_v14, %v204_v15  ;;  %v400_v20 = vld [vmem:[%s584_s0 + $0x54] ss:$8 sps:$4 sm:$0xff]   ;;  %v402_v21 = vld [vmem:[%s584_s0 + $0x10] ss:$8 sps:$4 sm:$0xff]  }
   0x6   :  { %211 = vmatpush1.bf16.msra.mxu0 %v383_v2  ;;  %371 = vmatpush1.bf16.msra.mxu1 %v383_v2  ;;  %v392_v17 = vld [vmem:[%s584_s0] ss:$8 sps:$4 sm:$0xff]   ;;  %v403_v22 = vld [vmem:[%s584_s0 + $0x50] ss:$8 sps:$4 sm:$0xff]   ;;  %v404_v23 = vld [vmem:[%s584_s0 + $0x24] ss:$8 sps:$4 sm:$0xff]  }
   0x7   :  { %212 = vmatprep.subr.bf16.mxu0 %v416_v0  ;;  %362 = vmatprep.subr.bf16.mxu1 %v416_v0  ;;  %v395_v18 = vld [vmem:[%s584_s0 + $0x40] ss:$8 sps:$4 sm:$0xff]   ;;  %v406_v24 = vld [vmem:[%s584_s0 + $0x64] ss:$8 sps:$4 sm:$0xff]   ;;  %v410_v27 = vld [vmem:[%s584_s0 + $0x34] ss:$8 sps:$4 sm:$0xff]  }
   0x8   :  { %v408_v25 = vld [vmem:[%s584_s0 + $0x20] ss:$8 sps:$4 sm:$0xff]   ;;  %v412_v28 = vld [vmem:[%s584_s0 + $0x74] ss:$8 sps:$4 sm:$0xff]   ;;  %v414_v29 = vld [vmem:[%s584_s0 + $0x30] ss:$8 sps:$4 sm:$0xff]  }
   0x9   :  { %v409_v26 = vld [vmem:[%s584_s0 + $0x60] ss:$8 sps:$4 sm:$0xff]   ;;  %v415_v30 = vld [vmem:[%s584_s0 + $0x70] ss:$8 sps:$4 sm:$0xff]  }
   0xa   :  { %213 = vmatpush1.bf16.msra.mxu0 %v384_v3  ;;  %372 = vmatpush1.bf16.msra.mxu1 %v384_v3 }
   0xb   :  { %214 = vmatprep.subr.bf16.mxu0 %v416_v0  ;;  %363 = vmatprep.subr.bf16.mxu1 %v416_v0 }
   0xe   :  { %215 = vmatpush1.bf16.msra.mxu0 %v385_v4  ;;  %373 = vmatpush1.bf16.msra.mxu1 %v385_v4 }
   0xf   :  { %216 = vmatprep.subr.bf16.mxu0 %v416_v0  ;;  %364 = vmatprep.subr.bf16.mxu1 %v416_v0 }
  0x12   :  { %217 = vmatpush1.bf16.msra.mxu0 %v386_v7  ;;  %374 = vmatpush1.bf16.msra.mxu1 %v386_v7 }
  0x13   :  { %218 = vmatprep.subr.bf16.mxu0 %v416_v0  ;;  %365 = vmatprep.subr.bf16.mxu1 %v416_v0 }
  0x16   :  { %219 = vmatpush1.bf16.msra.mxu0 %v387_v8  ;;  %375 = vmatpush1.bf16.msra.mxu1 %v387_v8 }
  0x17   :  { %220 = vmatprep.subr.bf16.mxu0 %v416_v0  ;;  %366 = vmatprep.subr.bf16.mxu1 %v416_v0 }
  0x1a   :  { %221 = vmatpush1.bf16.msra.mxu0 %v388_v9  ;;  %376 = vmatpush1.bf16.msra.mxu1 %v388_v9 }
  0x1b   :  { %222 = vmatprep.subr.bf16.mxu0 %v416_v0  ;;  %367 = vmatprep.subr.bf16.mxu1 %v416_v0 }
  0x1e   :  { %223 = vmatpush1.bf16.msra.mxu0 %v389_v10  ;;  %377 = vmatpush1.bf16.msra.mxu1 %v389_v10 }
  0x1f   :  { %224 = vmatprep.subr.bf16.mxu0 %v416_v0  ;;  %368 = vmatprep.subr.bf16.mxu1 %v416_v0 }
  0x22   :  { %225 = vmatpush1.bf16.msra.mxu0 %v390_v13  ;;  %378 = vmatpush1.bf16.msra.mxu1 %v390_v13 }
  0x23   :  { %226 = vmatprep.subr.bf16.mxu0 %v416_v0  ;;  %369 = vmatprep.subr.bf16.mxu1 %v416_v0 }
  0x26   :  { %227 = vmatpush1.bf16.msra.mxu0 %v206_v16  ;;  %379 = vmatpush1.bf16.msra.mxu1 %v206_v16 }
  0x29   :  { %241 = vmatmul.mubr.bf16.vlgmr.msra.gmra.mrb[0].mxu0 %v392_v17  ;;  %273 = vmatmul.mubr.bf16.vlgmr.msra.gmra.mrb[0].mxu1 %v395_v18 }
  0x2a   :  { %353 = vmatprep.mubr.msk.bf16.mxu0 %vm176_vm0, %v398_v19  ;;  %357 = vmatprep.mubr.msk.bf16.mxu1 %vm176_vm0, %v400_v20 }
  0x31   :  { %249 = vmatmul.mubr.bf16.gmra.mrb[4].mxu0 %v402_v21  ;;  %281 = vmatmul.mubr.bf16.gmra.mrb[4].mxu1 %v403_v22 }
  0x32   :  { %354 = vmatprep.mubr.msk.bf16.mxu0 %vm176_vm0, %v404_v23  ;;  %358 = vmatprep.mubr.msk.bf16.mxu1 %vm176_vm0, %v406_v24 }
  0x39   :  { %257 = vmatmul.mubr.bf16.gmra.mrb[8].mxu0 %v408_v25  ;;  %289 = vmatmul.mubr.bf16.gmra.mrb[8].mxu1 %v409_v26 }
  0x3a   :  { %355 = vmatprep.mubr.msk.bf16.mxu0 %vm176_vm0, %v410_v27  ;;  %359 = vmatprep.mubr.msk.bf16.mxu1 %vm176_vm0, %v412_v28 }
  0x41   :  { %265 = vmatmul.mubr.bf16.gmra.mrb[12].mxu0 %v414_v29  ;;  %297 = vmatmul.mubr.bf16.gmra.mrb[12].mxu1 %v415_v30 }
  0xfc   :  { %v242_v31 = vpop.f32.mrb[0].mxu0  ;;  %v274_v32 = vpop.f32.mrb[0].mxu1 }
  0xfd   :  { %306 = vst.msk [vmem:[%s585_s2] sm:$0xff] %vm305_vm3, %v242_v31  ;;  %314 = vst.msk [vmem:[%s585_s2 + $0x40] sm:$0xff] %vm305_vm3, %v274_v32  ;;  %v244_v33 = vpop.f32.mrb[1].mxu0  ;;  %v276_v34 = vpop.f32.mrb[1].mxu1 }
  0xfe   :  { %v245_v35 = vpop.f32.mrb[2].mxu0  ;;  %v277_v36 = vpop.f32.mrb[2].mxu1 }
  0xff   :  { %307 = vst.msk [vmem:[%s585_s2 + $0x8] sm:$0xff] %vm305_vm3, %v245_v35  ;;  %315 = vst.msk [vmem:[%s585_s2 + $0x48] sm:$0xff] %vm305_vm3, %v277_v36  ;;  %v247_v37 = vpop.f32.mrb[3].mxu0  ;;  %v279_v38 = vpop.f32.mrb[3].mxu1 }
 0x104   :  { %v250_v39 = vpop.f32.mrb[4].mxu0  ;;  %v282_v40 = vpop.f32.mrb[4].mxu1 }
 0x105   :  { %308 = vst.msk [vmem:[%s585_s2 + $0x10] sm:$0xff] %vm305_vm3, %v250_v39  ;;  %316 = vst.msk [vmem:[%s585_s2 + $0x50] sm:$0xff] %vm305_vm3, %v282_v40  ;;  %v252_v41 = vpop.f32.mrb[5].mxu0  ;;  %v284_v42 = vpop.f32.mrb[5].mxu1 }
 0x106   :  { %v253_v43 = vpop.f32.mrb[6].mxu0  ;;  %v285_v44 = vpop.f32.mrb[6].mxu1 }
 0x107   :  { %309 = vst.msk [vmem:[%s585_s2 + $0x18] sm:$0xff] %vm305_vm3, %v253_v43  ;;  %317 = vst.msk [vmem:[%s585_s2 + $0x58] sm:$0xff] %vm305_vm3, %v285_v44  ;;  %v255_v45 = vpop.f32.mrb[7].mxu0  ;;  %v287_v46 = vpop.f32.mrb[7].mxu1 }
 0x10c   :  { %v258_v47 = vpop.f32.mrb[8].mxu0  ;;  %v290_v48 = vpop.f32.mrb[8].mxu1 }
 0x10d   :  { %310 = vst.msk [vmem:[%s585_s2 + $0x20] sm:$0xff] %vm305_vm3, %v258_v47  ;;  %318 = vst.msk [vmem:[%s585_s2 + $0x60] sm:$0xff] %vm305_vm3, %v290_v48  ;;  %v260_v49 = vpop.f32.mrb[9].mxu0  ;;  %v292_v50 = vpop.f32.mrb[9].mxu1 }
 0x10e   :  { %v261_v51 = vpop.f32.mrb[10].mxu0  ;;  %v293_v52 = vpop.f32.mrb[10].mxu1 }
 0x10f   :  { %311 = vst.msk [vmem:[%s585_s2 + $0x28] sm:$0xff] %vm305_vm3, %v261_v51  ;;  %319 = vst.msk [vmem:[%s585_s2 + $0x68] sm:$0xff] %vm305_vm3, %v293_v52  ;;  %v263_v53 = vpop.f32.mrb[11].mxu0  ;;  %v295_v54 = vpop.f32.mrb[11].mxu1 }
 0x114   :  { %v266_v55 = vpop.f32.mrb[12].mxu0  ;;  %v298_v56 = vpop.f32.mrb[12].mxu1 }
 0x115   :  { %312 = vst.msk [vmem:[%s585_s2 + $0x30] sm:$0xff] %vm305_vm3, %v266_v55  ;;  %320 = vst.msk [vmem:[%s585_s2 + $0x70] sm:$0xff] %vm305_vm3, %v298_v56  ;;  %v268_v57 = vpop.f32.mrb[13].mxu0  ;;  %v300_v58 = vpop.f32.mrb[13].mxu1 }
 0x116   :  { %v269_v59 = vpop.f32.mrb[14].mxu0  ;;  %v301_v60 = vpop.f32.mrb[14].mxu1 }
 0x117   :  { %313 = vst.msk [vmem:[%s585_s2 + $0x38] sm:$0xff] %vm305_vm3, %v269_v59  ;;  %321 = vst.msk [vmem:[%s585_s2 + $0x78] sm:$0xff] %vm305_vm3, %v301_v60  ;;  %v271_v61 = vpop.f32.mrb[15].mxu0  ;;  %v303_v62 = vpop.f32.mrb[15].mxu1 }

// kernel: dense_ed_forward.12
= control target key start
LH: loop header
LB: loop body
LE: loop exit
PB: predicated region body
PF: predicated region fallthrough
CT: control target
= control target key end

     0   :  { %vm116_vm0 = vcmask 1045504   ;;  %vm91_vm1 = vcmask 97280   ;;  %v288_v5 = vmov 0   ;;  %vm217_vm2 = vcmask 48128   ;;  %s427_s1 = inlined_call_operand.vmem [shape: bf16[12,6], index: 1, kind: input, shape index: {}]   ;;  %s428_s0 = inlined_call_operand.vmem [shape: bf16[128,12], index: 0, kind: input, shape index: {}]   ;;  %s429_s2 = inlined_call_operand.vmem [shape: f32[128,6], index: 2, kind: output, shape index: {}]  }
   0x1   :  { %v287_v0 = vld [vmem:[%s427_s1] sm:$0x3f]   ;;  %v14_v10 = vld [vmem:[%s428_s0 + $0x8] sm:$0xf]  ;;  %v15_v12 = vld [vmem:[%s428_s0 + $0xc] sm:$0xf] }
   0x2   :  { %v12_v1 = vld [vmem:[%s428_s0] sm:$0xf]  ;;  %v13_v2 = vld [vmem:[%s428_s0 + $0x4] sm:$0xf]  ;;  %284 = vmatprep.subr.msk.bf16.mxu0 %vm116_vm0, %v287_v0  ;;  %285 = vmatprep.subr.msk.bf16.mxu1 %vm116_vm0, %v287_v0  ;;  %v118_v4 = vsel %vm116_vm0, %v287_v0, 0  ;;  %v30_v13 = vmax.bf16 %v288_v5, %v14_v10  ;;  %v31_v17 = vmax.bf16 %v288_v5, %v15_v12 }
   0x3   :  { %v20_v3 = vld [vmem:[%s428_s0 + $0x20] sm:$0xf]  ;;  %v28_v6 = vmax.bf16 %v288_v5, %v12_v1  ;;  %v29_v7 = vmax.bf16 %v288_v5, %v13_v2  ;;  %v21_v8 = vld [vmem:[%s428_s0 + $0x24] sm:$0xf]  ;;  %265 = vmatpush3.bf16.msra.mxu0 %v118_v4  ;;  %283 = vmatpush3.bf16.msra.mxu1 %v118_v4  ;;  %v22_v14 = vld [vmem:[%s428_s0 + $0x28] sm:$0xf] }
   0x4   :  { %v36_v9 = vmax.bf16 %v288_v5, %v20_v3  ;;  %v37_v11 = vmax.bf16 %v288_v5, %v21_v8  ;;  %v23_v15 = vld [vmem:[%s428_s0 + $0x2c] sm:$0xf]  ;;  %v38_v18 = vmax.bf16 %v288_v5, %v22_v14  ;;  %v16_v20 = vld [vmem:[%s428_s0 + $0x10] sm:$0xf]  ;;  %v17_v21 = vld [vmem:[%s428_s0 + $0x14] sm:$0xf]  ;;  %v239_v30 = vcombine.low %v30_v13, %v31_v17 }
   0x5   :  { %v238_v16 = vcombine.low %v28_v6, %v29_v7  ;;  %v39_v19 = vmax.bf16 %v288_v5, %v23_v15  ;;  %v24_v22 = vld [vmem:[%s428_s0 + $0x30] sm:$0xf]  ;;  %v32_v24 = vmax.bf16 %v288_v5, %v16_v20  ;;  %v33_v25 = vmax.bf16 %v288_v5, %v17_v21  ;;  %v25_v26 = vld [vmem:[%s428_s0 + $0x34] sm:$0xf]  ;;  %v18_v28 = vld [vmem:[%s428_s0 + $0x18] sm:$0xf] }
   0x6   :  { %v242_v23 = vcombine.low %v36_v9, %v37_v11  ;;  %v40_v27 = vmax.bf16 %v288_v5, %v24_v22  ;;  %v19_v29 = vld [vmem:[%s428_s0 + $0x1c] sm:$0xf]  ;;  %v41_v32 = vmax.bf16 %v288_v5, %v25_v26  ;;  %v26_v33 = vld [vmem:[%s428_s0 + $0x38] sm:$0xf]  ;;  %v34_v36 = vmax.bf16 %v288_v5, %v18_v28 }
   0x7   :  { %266 = vmatprep.mubr.msk.bf16.mxu0 %vm91_vm1, %v238_v16  ;;  %v243_v31 = vcombine.low %v38_v18, %v39_v19  ;;  %v27_v34 = vld [vmem:[%s428_s0 + $0x3c] sm:$0xf]  ;;  %v240_v35 = vcombine.low %v32_v24, %v33_v25  ;;  %v35_v37 = vmax.bf16 %v288_v5, %v19_v29  ;;  %v42_v39 = vmax.bf16 %v288_v5, %v26_v33 }
   0x8   :  { %274 = vmatprep.mubr.msk.bf16.mxu1 %vm91_vm1, %v242_v23  ;;  %267 = vmatmul.mubr.msk.bf16.vlgmr.msra.gmra.mrb[0].mxu0 %vm91_vm1, %v239_v30  ;;  %v244_v38 = vcombine.low %v40_v27, %v41_v32  ;;  %v43_v40 = vmax.bf16 %v288_v5, %v27_v34 }
   0x9   :  { %275 = vmatmul.mubr.msk.bf16.vlgmr.msra.gmra.mrb[0].mxu1 %vm91_vm1, %v243_v31  ;;  %270 = vmatprep.mubr.msk.bf16.mxu0 %vm91_vm1, %v240_v35  ;;  %v241_v41 = vcombine.low %v34_v36, %v35_v37 }
   0xa   :  { %278 = vmatprep.mubr.msk.bf16.mxu1 %vm91_vm1, %v244_v38  ;;  %v245_v42 = vcombine.low %v42_v39, %v43_v40 }
  0x10   :  { %271 = vmatmul.mubr.msk.bf16.gmra.mrb[4].mxu0 %vm91_vm1, %v241_v41 }
  0x11   :  { %279 = vmatmul.mubr.msk.bf16.gmra.mrb[4].mxu1 %vm91_vm1, %v245_v42 }
  0xdb   :  { %v268_v43 = vpop.f32.mrb[0].mxu0 }
  0xdc   :  { %v276_v44 = vpop.f32.mrb[0].mxu1  ;;  %220 = vst.msk [vmem:[%s429_s2 + $0x10] sm:$0xff] %vm217_vm2, %v268_v43  ;;  %v154_v45 = vpop.f32.mrb[1].mxu0 }
  0xdd   :  { %228 = vst.msk [vmem:[%s429_s2 + $0x50] sm:$0xff] %vm217_vm2, %v276_v44  ;;  %v186_v46 = vpop.f32.mrb[1].mxu1  ;;  %218 = vst.msk [vmem:[%s429_s2] sm:$0xff] %vm217_vm2, %v154_v45  ;;  %v269_v47 = vpop.f32.mrb[2].mxu0 }
  0xde   :  { %226 = vst.msk [vmem:[%s429_s2 + $0x40] sm:$0xff] %vm217_vm2, %v186_v46  ;;  %v277_v48 = vpop.f32.mrb[2].mxu1  ;;  %221 = vst.msk [vmem:[%s429_s2 + $0x18] sm:$0xff] %vm217_vm2, %v269_v47  ;;  %v157_v49 = vpop.f32.mrb[3].mxu0 }
  0xdf   :  { %229 = vst.msk [vmem:[%s429_s2 + $0x58] sm:$0xff] %vm217_vm2, %v277_v48  ;;  %v189_v50 = vpop.f32.mrb[3].mxu1  ;;  %219 = vst.msk [vmem:[%s429_s2 + $0x8] sm:$0xff] %vm217_vm2, %v157_v49 }
  0xe0   :  { %227 = vst.msk [vmem:[%s429_s2 + $0x48] sm:$0xff] %vm217_vm2, %v189_v50 }
  0xe3   :  { %v272_v51 = vpop.f32.mrb[4].mxu0 }
  0xe4   :  { %v280_v52 = vpop.f32.mrb[4].mxu1  ;;  %224 = vst.msk [vmem:[%s429_s2 + $0x30] sm:$0xff] %vm217_vm2, %v272_v51  ;;  %v170_v53 = vpop.f32.mrb[5].mxu0 }
  0xe5   :  { %232 = vst.msk [vmem:[%s429_s2 + $0x70] sm:$0xff] %vm217_vm2, %v280_v52  ;;  %v202_v54 = vpop.f32.mrb[5].mxu1  ;;  %222 = vst.msk [vmem:[%s429_s2 + $0x20] sm:$0xff] %vm217_vm2, %v170_v53  ;;  %v273_v55 = vpop.f32.mrb[6].mxu0 }
  0xe6   :  { %230 = vst.msk [vmem:[%s429_s2 + $0x60] sm:$0xff] %vm217_vm2, %v202_v54  ;;  %v281_v56 = vpop.f32.mrb[6].mxu1  ;;  %225 = vst.msk [vmem:[%s429_s2 + $0x38] sm:$0xff] %vm217_vm2, %v273_v55  ;;  %v173_v57 = vpop.f32.mrb[7].mxu0 }
  0xe7   :  { %233 = vst.msk [vmem:[%s429_s2 + $0x78] sm:$0xff] %vm217_vm2, %v281_v56  ;;  %v205_v58 = vpop.f32.mrb[7].mxu1  ;;  %223 = vst.msk [vmem:[%s429_s2 + $0x28] sm:$0xff] %vm217_vm2, %v173_v57 }
  0xe8   :  { %231 = vst.msk [vmem:[%s429_s2 + $0x68] sm:$0xff] %vm217_vm2, %v205_v58 }

// kernel: dense_ed_forward.13
= control target key start
LH: loop header
LB: loop body
LE: loop exit
PB: predicated region body
PF: predicated region fallthrough
CT: control target
= control target key end

     0   :  { %v159_v5 = vmov 0   ;;  %vm58_vm0 = vcmask 441344   ;;  %vm65_vm1 = vcmask 1042432   ;;  %vm118_vm2 = vcmask 48128   ;;  %s213_s1 = inlined_call_operand.vmem [shape: bf16[54,6], index: 1, kind: input, shape index: {}]   ;;  %s214_s0 = inlined_call_operand.vmem [shape: bf16[32,54], index: 0, kind: input, shape index: {}]   ;;  %s215_s2 = inlined_call_operand.vmem [shape: f32[32,6], index: 2, kind: output, shape index: {}]  }
   0x1   :  { %v155_v0 = vld [vmem:[%s213_s1] sm:$0xff]   ;;  %v156_v1 = vld [vmem:[%s213_s1 + $0x8] sm:$0xff]   ;;  %v157_v2 = vld [vmem:[%s213_s1 + $0x10] sm:$0xff]  }
   0x2   :  { %141 = vmatprep.subr.bf16.mxu0 %v155_v0  ;;  %v12_v3 = vld [vmem:[%s214_s0] sm:$0xf]  ;;  %v13_v4 = vld [vmem:[%s214_s0 + $0x4] sm:$0xf]  ;;  %v14_v9 = vld [vmem:[%s214_s0 + $0x8] sm:$0xf] }
   0x3   :  { %142 = vmatpush3.bf16.msra.mxu0 %v155_v0  ;;  %v16_v6 = vmax.bf16 %v159_v5, %v12_v3  ;;  %v17_v7 = vmax.bf16 %v159_v5, %v13_v4  ;;  %v15_v10 = vld [vmem:[%s214_s0 + $0xc] sm:$0xf]  ;;  %v158_v11 = vld [vmem:[%s213_s1 + $0x18] ss:$0 sps:$4 sm:$0x77]   ;;  %v18_v12 = vmax.bf16 %v159_v5, %v14_v9 }
   0x4   :  { %143 = vmatprep.subr.bf16.mxu0 %v156_v1  ;;  %v19_v13 = vmax.bf16 %v159_v5, %v15_v10  ;;  %v67_v14 = vsel %vm65_vm1, %v158_v11, 0 }
   0x5   :  { %v127_v8 = vcombine.low %v16_v6, %v17_v7 }
   0x6   :  { %v128_v15 = vcombine.low %v18_v12, %v19_v13 }
   0x7   :  { %144 = vmatpush3.bf16.msra.mxu0 %v156_v1  ;;  %149 = vmatprep.mubr.msk.bf16.mxu0 %vm58_vm0, %v127_v8 }
   0x8   :  { %145 = vmatprep.subr.bf16.mxu0 %v157_v2 }
   0xb   :  { %146 = vmatpush3.bf16.msra.mxu0 %v157_v2 }
   0xc   :  { %153 = vmatprep.subr.msk.bf16.mxu0 %vm65_vm1, %v158_v11 }
   0xf   :  { %148 = vmatpush3.bf16.msra.mxu0 %v67_v14 }
  0x12   :  { %150 = vmatmul.mubr.msk.bf16.vlgmr.msra.gmra.mrb[0].mxu0 %vm58_vm0, %v128_v15 }
  0xe5   :  { %v151_v16 = vpop.f32.mrb[0].mxu0 }
  0xe6   :  { %121 = vst.msk [vmem:[%s215_s2 + $0x10] sm:$0xff] %vm118_vm2, %v151_v16  ;;  %v103_v17 = vpop.f32.mrb[1].mxu0 }
  0xe7   :  { %119 = vst.msk [vmem:[%s215_s2] sm:$0xff] %vm118_vm2, %v103_v17  ;;  %v152_v18 = vpop.f32.mrb[2].mxu0 }
  0xe8   :  { %122 = vst.msk [vmem:[%s215_s2 + $0x18] sm:$0xff] %vm118_vm2, %v152_v18  ;;  %v106_v19 = vpop.f32.mrb[3].mxu0 }
  0xe9   :  { %120 = vst.msk [vmem:[%s215_s2 + $0x8] sm:$0xff] %vm118_vm2, %v106_v19 }

// kernel: dense_ed_forward.14
= control target key start
LH: loop header
LB: loop body
LE: loop exit
PB: predicated region body
PF: predicated region fallthrough
CT: control target
= control target key end

     0   :  { %v159_v5 = vmov 0   ;;  %vm58_vm0 = vcmask 441344   ;;  %vm65_vm1 = vcmask 1042432   ;;  %vm118_vm2 = vcmask 31744   ;;  %s213_s1 = inlined_call_operand.vmem [shape: bf16[54,4], index: 1, kind: input, shape index: {}]   ;;  %s214_s0 = inlined_call_operand.vmem [shape: bf16[32,54], index: 0, kind: input, shape index: {}]   ;;  %s215_s2 = inlined_call_operand.vmem [shape: f32[32,4], index: 2, kind: output, shape index: {}]  }
   0x1   :  { %v155_v0 = vld [vmem:[%s213_s1] sm:$0xff]   ;;  %v156_v1 = vld [vmem:[%s213_s1 + $0x8] sm:$0xff]   ;;  %v157_v2 = vld [vmem:[%s213_s1 + $0x10] sm:$0xff]  }
   0x2   :  { %141 = vmatprep.subr.bf16.mxu0 %v155_v0  ;;  %v12_v3 = vld [vmem:[%s214_s0] sm:$0xf]  ;;  %v13_v4 = vld [vmem:[%s214_s0 + $0x4] sm:$0xf]  ;;  %v14_v9 = vld [vmem:[%s214_s0 + $0x8] sm:$0xf] }
   0x3   :  { %142 = vmatpush3.bf16.msra.mxu0 %v155_v0  ;;  %v16_v6 = vmax.bf16 %v159_v5, %v12_v3  ;;  %v17_v7 = vmax.bf16 %v159_v5, %v13_v4  ;;  %v15_v10 = vld [vmem:[%s214_s0 + $0xc] sm:$0xf]  ;;  %v158_v11 = vld [vmem:[%s213_s1 + $0x18] ss:$0 sps:$4 sm:$0x77]   ;;  %v18_v12 = vmax.bf16 %v159_v5, %v14_v9 }
   0x4   :  { %143 = vmatprep.subr.bf16.mxu0 %v156_v1  ;;  %v19_v13 = vmax.bf16 %v159_v5, %v15_v10  ;;  %v67_v14 = vsel %vm65_vm1, %v158_v11, 0 }
   0x5   :  { %v127_v8 = vcombine.low %v16_v6, %v17_v7 }
   0x6   :  { %v128_v15 = vcombine.low %v18_v12, %v19_v13 }
   0x7   :  { %144 = vmatpush3.bf16.msra.mxu0 %v156_v1  ;;  %149 = vmatprep.mubr.msk.bf16.mxu0 %vm58_vm0, %v127_v8 }
   0x8   :  { %145 = vmatprep.subr.bf16.mxu0 %v157_v2 }
   0xb   :  { %146 = vmatpush3.bf16.msra.mxu0 %v157_v2 }
   0xc   :  { %153 = vmatprep.subr.msk.bf16.mxu0 %vm65_vm1, %v158_v11 }
   0xf   :  { %148 = vmatpush3.bf16.msra.mxu0 %v67_v14 }
  0x12   :  { %150 = vmatmul.mubr.msk.bf16.vlgmr.msra.gmra.mrb[0].mxu0 %vm58_vm0, %v128_v15 }
  0xe5   :  { %v151_v16 = vpop.f32.mrb[0].mxu0 }
  0xe6   :  { %121 = vst.msk [vmem:[%s215_s2 + $0x10] sm:$0xff] %vm118_vm2, %v151_v16  ;;  %v103_v17 = vpop.f32.mrb[1].mxu0 }
  0xe7   :  { %119 = vst.msk [vmem:[%s215_s2] sm:$0xff] %vm118_vm2, %v103_v17  ;;  %v152_v18 = vpop.f32.mrb[2].mxu0 }
  0xe8   :  { %122 = vst.msk [vmem:[%s215_s2 + $0x18] sm:$0xff] %vm118_vm2, %v152_v18  ;;  %v106_v19 = vpop.f32.mrb[3].mxu0 }
  0xe9   :  { %120 = vst.msk [vmem:[%s215_s2 + $0x8] sm:$0xff] %vm118_vm2, %v106_v19 }

// kernel: dense_ed_forward.15
= control target key start
LH: loop header
LB: loop body
LE: loop exit
PB: predicated region body
PF: predicated region fallthrough
CT: control target
= control target key end

     0   :  { %vm44_vm0 = vcmask 1044480   ;;  %v123_v5 = vmov 0   ;;  %vm37_vm1 = vcmask 80896   ;;  %vm97_vm2 = vcmask 39936   ;;  %s166_s1 = inlined_call_operand.vmem [shape: bf16[10,5], index: 1, kind: input, shape index: {}]   ;;  %s167_s0 = inlined_call_operand.vmem [shape: bf16[32,10], index: 0, kind: input, shape index: {}]   ;;  %s168_s2 = inlined_call_operand.vmem [shape: f32[32,5], index: 2, kind: output, shape index: {}]  }
   0x1   :  { %v122_v0 = vld [vmem:[%s166_s1] sm:$0x1f]   ;;  %v14_v3 = vld [vmem:[%s167_s0 + $0x8] sm:$0xf]  ;;  %v15_v8 = vld [vmem:[%s167_s0 + $0xc] sm:$0xf] }
   0x2   :  { %v12_v1 = vld [vmem:[%s167_s0] sm:$0xf]  ;;  %v13_v2 = vld [vmem:[%s167_s0 + $0x4] sm:$0xf]  ;;  %120 = vmatprep.subr.msk.bf16.mxu0 %vm44_vm0, %v122_v0  ;;  %v46_v4 = vsel %vm44_vm0, %v122_v0, 0  ;;  %v18_v9 = vmax.bf16 %v123_v5, %v14_v3  ;;  %v19_v10 = vmax.bf16 %v123_v5, %v15_v8 }
   0x3   :  { %v16_v6 = vmax.bf16 %v123_v5, %v12_v1  ;;  %v17_v7 = vmax.bf16 %v123_v5, %v13_v2  ;;  %115 = vmatpush3.bf16.msra.mxu0 %v46_v4 }
   0x4   :  { %v107_v12 = vcombine.low %v18_v9, %v19_v10 }
   0x5   :  { %v106_v11 = vcombine.low %v16_v6, %v17_v7 }
   0x7   :  { %116 = vmatprep.mubr.msk.bf16.mxu0 %vm37_vm1, %v106_v11 }
   0x8   :  { %117 = vmatmul.mubr.msk.bf16.vlgmr.msra.gmra.mrb[0].mxu0 %vm37_vm1, %v107_v12 }
  0xdb   :  { %v118_v13 = vpop.f32.mrb[0].mxu0 }
  0xdc   :  { %100 = vst.msk [vmem:[%s168_s2 + $0x10] sm:$0xff] %vm97_vm2, %v118_v13  ;;  %v82_v14 = vpop.f32.mrb[1].mxu0 }
  0xdd   :  { %98 = vst.msk [vmem:[%s168_s2] sm:$0xff] %vm97_vm2, %v82_v14  ;;  %v119_v15 = vpop.f32.mrb[2].mxu0 }
  0xde   :  { %101 = vst.msk [vmem:[%s168_s2 + $0x18] sm:$0xff] %vm97_vm2, %v119_v15  ;;  %v85_v16 = vpop.f32.mrb[3].mxu0 }
  0xdf   :  { %99 = vst.msk [vmem:[%s168_s2 + $0x8] sm:$0xff] %vm97_vm2, %v85_v16 }

// kernel: dense_ed_forward.16
= control target key start
LH: loop header
LB: loop body
LE: loop exit
PB: predicated region body
PF: predicated region fallthrough
CT: control target
= control target key end

     0   :  { %vm116_vm0 = vcmask 1045504   ;;  %vm117_vm1 = vcmask 1046528   ;;  %v304_v0 = vmov 0.0   ;;  %v305_v2 = vmov 65535   ;;  %s449_s1 = inlined_call_operand.vmem [shape: bf16[45,5], index: 1, kind: input, shape index: {}]   ;;  %s450_s0 = inlined_call_operand.vmem [shape: bf16[98,45], index: 0, kind: input, shape index: {}]   ;;  %s451_s2 = inlined_call_operand.vmem [shape: f32[98,5], index: 2, kind: output, shape index: {}]  }
   0x1   :  { %257 = vmatprep.subr.bf16.mxu0 %v304_v0  ;;  %v301_v1 = vld [vmem:[%s449_s1] sm:$0xff]   ;;  %291 = vmatprep.subr.bf16.mxu1 %v304_v0  ;;  %v118_v3 = vsel %vm116_vm0, 4294967295, %v305_v2  ;;  %v302_v4 = vld [vmem:[%s449_s1 + $0x8] sm:$0xff]   ;;  %v303_v6 = vld [vmem:[%s449_s1 + $0x10] sm:$0x7f]   ;;  %vm306_vm2 = vmmov 0  }
   0x2   :  { %v119_v5 = vsel %vm117_vm1, %v118_v3, 0  ;;  %258 = vmatpush3.bf16.msra.mxu0 %v301_v1  ;;  %294 = vmatpush3.bf16.msra.mxu1 %v301_v1  ;;  %v12_v7 = vld [vmem:[%s450_s0] sm:$0xf]  ;;  %v13_v8 = vld [vmem:[%s450_s0 + $0x4] sm:$0xf]  ;;  %v307_v11 = vmov 0  }
   0x3   :  { %259 = vmatprep.subr.bf16.mxu0 %v304_v0  ;;  %292 = vmatprep.subr.bf16.mxu1 %v304_v0  ;;  %v20_v9 = vld [vmem:[%s450_s0 + $0x20] sm:$0xf]  ;;  %v21_v10 = vld [vmem:[%s450_s0 + $0x24] sm:$0xf]  ;;  %v25_v12 = vmax.bf16 %v307_v11, %v12_v7  ;;  %v26_v13 = vmax.bf16 %v307_v11, %v13_v8  ;;  %v121_v16 = vand.u32 %v303_v6, %v119_v5  ;;  %vm94_vm3 = vcmask 367616  }
   0x4   :  { %263 = vmatprep.mubr.msk.bf16.mxu0 %vm306_vm2, %v304_v0  ;;  %279 = vmatprep.mubr.msk.bf16.mxu1 %vm306_vm2, %v304_v0  ;;  %v33_v14 = vmax.bf16 %v307_v11, %v20_v9  ;;  %v34_v15 = vmax.bf16 %v307_v11, %v21_v10  ;;  %v14_v19 = vld [vmem:[%s450_s0 + $0x8] sm:$0xf]  ;;  %v15_v20 = vld [vmem:[%s450_s0 + $0xc] sm:$0xf]  ;;  %v16_v29 = vld [vmem:[%s450_s0 + $0x10] sm:$0xf] }
   0x5   :  { %v230_v17 = vcombine.low %v25_v12, %v26_v13  ;;  %v22_v21 = vld [vmem:[%s450_s0 + $0x28] sm:$0xf]  ;;  %v23_v22 = vld [vmem:[%s450_s0 + $0x2c] sm:$0xf]  ;;  %v27_v23 = vmax.bf16 %v307_v11, %v14_v19  ;;  %v28_v24 = vmax.bf16 %v307_v11, %v15_v20  ;;  %v17_v30 = vld [vmem:[%s450_s0 + $0x14] sm:$0xf]  ;;  %v29_v32 = vmax.bf16 %v307_v11, %v16_v29 }
   0x6   :  { %260 = vmatpush3.bf16.msra.mxu0 %v302_v4  ;;  %295 = vmatpush3.bf16.msra.mxu1 %v302_v4  ;;  %v234_v18 = vcombine.low %v33_v14, %v34_v15  ;;  %v35_v25 = vmax.bf16 %v307_v11, %v22_v21  ;;  %v36_v26 = vmax.bf16 %v307_v11, %v23_v22  ;;  %v24_v31 = vld [vmem:[%s450_s0 + $0x30] sm:$0x1]  ;;  %v18_v37 = vld [vmem:[%s450_s0 + $0x18] sm:$0xf]  ;;  %v19_v38 = vld [vmem:[%s450_s0 + $0x1c] sm:$0xf] }
   0x7   :  { %261 = vmatprep.subr.bf16.mxu0 %v304_v0  ;;  %293 = vmatprep.subr.bf16.mxu1 %v304_v0  ;;  %v231_v27 = vcombine.low %v27_v23, %v28_v24  ;;  %v30_v33 = vmax.bf16 %v307_v11, %v17_v30  ;;  %v37_v34 = vmax.bf16 %v307_v11, %v24_v31  ;;  %vm211_vm4 = vcmask 39936  }
   0x8   :  { %v235_v28 = vcombine.low %v35_v25, %v36_v26  ;;  %v31_v39 = vmax.bf16 %v307_v11, %v18_v37  ;;  %v32_v40 = vmax.bf16 %v307_v11, %v19_v38  ;;  %vm224_vm5 = vcmask 33792  }
   0x9   :  { %v232_v35 = vcombine.low %v29_v32, %v30_v33  ;;  %v236_v36 = vcombine.low %v37_v34, %v37_v34 }
   0xa   :  { %262 = vmatpush3.bf16.msra.mxu0 %v121_v16  ;;  %296 = vmatpush3.bf16.msra.mxu1 %v121_v16  ;;  %v233_v41 = vcombine.low %v31_v39, %v32_v40 }
   0xd   :  { %264 = vmatmul.mubr.msk.bf16.vlgmr.msra.gmra.mrb[0].mxu0 %vm94_vm3, %v230_v17  ;;  %280 = vmatmul.mubr.msk.bf16.vlgmr.msra.gmra.mrb[0].mxu1 %vm94_vm3, %v234_v18 }
   0xe   :  { %267 = vmatprep.mubr.msk.bf16.mxu0 %vm306_vm2, %v304_v0  ;;  %283 = vmatprep.mubr.msk.bf16.mxu1 %vm306_vm2, %v304_v0 }
  0x15   :  { %268 = vmatmul.mubr.msk.bf16.gmra.mrb[4].mxu0 %vm94_vm3, %v231_v27  ;;  %284 = vmatmul.mubr.msk.bf16.gmra.mrb[4].mxu1 %vm94_vm3, %v235_v28 }
  0x16   :  { %271 = vmatprep.mubr.msk.bf16.mxu0 %vm306_vm2, %v304_v0  ;;  %287 = vmatprep.mubr.msk.bf16.mxu1 %vm306_vm2, %v304_v0 }
  0x1d   :  { %272 = vmatmul.mubr.msk.bf16.gmra.mrb[8].mxu0 %vm94_vm3, %v232_v35  ;;  %288 = vmatmul.mubr.msk.bf16.gmra.mrb[8].mxu1 %vm94_vm3, %v236_v36 }
  0x1e   :  { %275 = vmatprep.mubr.msk.bf16.mxu0 %vm306_vm2, %v304_v0 }
  0x25   :  { %276 = vmatmul.mubr.msk.bf16.gmra.mrb[12].mxu0 %vm94_vm3, %v233_v41 }
  0xe0   :  { %v157_v42 = vpop.f32.mrb[0].mxu0  ;;  %v189_v43 = vpop.f32.mrb[0].mxu1 }
  0xe1   :  { %212 = vst.msk [vmem:[%s451_s2] sm:$0xff] %vm211_vm4, %v157_v42  ;;  %v265_v44 = vpop.f32.mrb[1].mxu0  ;;  %220 = vst.msk [vmem:[%s451_s2 + $0x40] sm:$0xff] %vm211_vm4, %v189_v43  ;;  %v281_v45 = vpop.f32.mrb[1].mxu1 }
  0xe2   :  { %v160_v46 = vpop.f32.mrb[2].mxu0  ;;  %v192_v47 = vpop.f32.mrb[2].mxu1 }
  0xe3   :  { %213 = vst.msk [vmem:[%s451_s2 + $0x8] sm:$0xff] %vm211_vm4, %v160_v46  ;;  %v266_v48 = vpop.f32.mrb[3].mxu0  ;;  %221 = vst.msk [vmem:[%s451_s2 + $0x48] sm:$0xff] %vm211_vm4, %v192_v47  ;;  %v282_v49 = vpop.f32.mrb[3].mxu1 }
  0xe8   :  { %v165_v50 = vpop.f32.mrb[4].mxu0  ;;  %v197_v51 = vpop.f32.mrb[4].mxu1 }
  0xe9   :  { %214 = vst.msk [vmem:[%s451_s2 + $0x10] sm:$0xff] %vm211_vm4, %v165_v50  ;;  %v269_v52 = vpop.f32.mrb[5].mxu0  ;;  %222 = vst.msk [vmem:[%s451_s2 + $0x50] sm:$0xff] %vm211_vm4, %v197_v51  ;;  %v285_v53 = vpop.f32.mrb[5].mxu1 }
  0xea   :  { %v168_v54 = vpop.f32.mrb[6].mxu0  ;;  %v200_v55 = vpop.f32.mrb[6].mxu1 }
  0xeb   :  { %215 = vst.msk [vmem:[%s451_s2 + $0x18] sm:$0xff] %vm211_vm4, %v168_v54  ;;  %v270_v56 = vpop.f32.mrb[7].mxu0  ;;  %223 = vst.msk [vmem:[%s451_s2 + $0x58] sm:$0xff] %vm211_vm4, %v200_v55  ;;  %v286_v57 = vpop.f32.mrb[7].mxu1 }
  0xf0   :  { %v173_v58 = vpop.f32.mrb[8].mxu0  ;;  %v205_v59 = vpop.f32.mrb[8].mxu1 }
  0xf1   :  { %216 = vst.msk [vmem:[%s451_s2 + $0x20] sm:$0xff] %vm211_vm4, %v173_v58  ;;  %v273_v60 = vpop.f32.mrb[9].mxu0  ;;  %v289_v61 = vpop.f32.mrb[9].mxu1 }
  0xf2   :  { %225 = vst.msk [vmem:[%s451_s2 + $0x60] sm:$0x3] %vm224_vm5, %v205_v59  ;;  %v176_v62 = vpop.f32.mrb[10].mxu0  ;;  %v208_v63 = vpop.f32.mrb[10].mxu1 }
  0xf3   :  { %217 = vst.msk [vmem:[%s451_s2 + $0x28] sm:$0xff] %vm211_vm4, %v176_v62  ;;  %v274_v0 = vpop.f32.mrb[11].mxu0  ;;  %v290_v1 = vpop.f32.mrb[11].mxu1 }
  0xf8   :  { %v181_v2 = vpop.f32.mrb[12].mxu0 }
  0xf9   :  { %218 = vst.msk [vmem:[%s451_s2 + $0x30] sm:$0xff] %vm211_vm4, %v181_v2  ;;  %v277_v3 = vpop.f32.mrb[13].mxu0 }
  0xfa   :  { %v184_v4 = vpop.f32.mrb[14].mxu0 }
  0xfb   :  { %219 = vst.msk [vmem:[%s451_s2 + $0x38] sm:$0xff] %vm211_vm4, %v184_v4  ;;  %v278_v5 = vpop.f32.mrb[15].mxu0 }

// kernel: dense_ed_forward.17
= control target key start
LH: loop header
LB: loop body
LE: loop exit
PB: predicated region body
PF: predicated region fallthrough
CT: control target
= control target key end

     0   :  { %vm116_vm0 = vcmask 1045504   ;;  %vm117_vm1 = vcmask 1046528   ;;  %v304_v0 = vmov 0.0   ;;  %v305_v2 = vmov 65535   ;;  %s449_s1 = inlined_call_operand.vmem [shape: bf16[45,4], index: 1, kind: input, shape index: {}]   ;;  %s450_s0 = inlined_call_operand.vmem [shape: bf16[98,45], index: 0, kind: input, shape index: {}]   ;;  %s451_s2 = inlined_call_operand.vmem [shape: f32[98,4], index: 2, kind: output, shape index: {}]  }
   0x1   :  { %257 = vmatprep.subr.bf16.mxu0 %v304_v0  ;;  %v301_v1 = vld [vmem:[%s449_s1] sm:$0xff]   ;;  %291 = vmatprep.subr.bf16.mxu1 %v304_v0  ;;  %v118_v3 = vsel %vm116_vm0, 4294967295, %v305_v2  ;;  %v302_v4 = vld [vmem:[%s449_s1 + $0x8] sm:$0xff]   ;;  %v303_v6 = vld [vmem:[%s449_s1 + $0x10] sm:$0x7f]   ;;  %vm306_vm2 = vmmov 0  }
   0x2   :  { %v119_v5 = vsel %vm117_vm1, %v118_v3, 0  ;;  %258 = vmatpush3.bf16.msra.mxu0 %v301_v1  ;;  %294 = vmatpush3.bf16.msra.mxu1 %v301_v1  ;;  %v12_v7 = vld [vmem:[%s450_s0] sm:$0xf]  ;;  %v13_v8 = vld [vmem:[%s450_s0 + $0x4] sm:$0xf]  ;;  %v307_v11 = vmov 0  }
   0x3   :  { %259 = vmatprep.subr.bf16.mxu0 %v304_v0  ;;  %292 = vmatprep.subr.bf16.mxu1 %v304_v0  ;;  %v20_v9 = vld [vmem:[%s450_s0 + $0x20] sm:$0xf]  ;;  %v21_v10 = vld [vmem:[%s450_s0 + $0x24] sm:$0xf]  ;;  %v25_v12 = vmax.bf16 %v307_v11, %v12_v7  ;;  %v26_v13 = vmax.bf16 %v307_v11, %v13_v8  ;;  %v121_v16 = vand.u32 %v303_v6, %v119_v5  ;;  %vm94_vm3 = vcmask 367616  }
   0x4   :  { %263 = vmatprep.mubr.msk.bf16.mxu0 %vm306_vm2, %v304_v0  ;;  %279 = vmatprep.mubr.msk.bf16.mxu1 %vm306_vm2, %v304_v0  ;;  %v33_v14 = vmax.bf16 %v307_v11, %v20_v9  ;;  %v34_v15 = vmax.bf16 %v307_v11, %v21_v10  ;;  %v14_v19 = vld [vmem:[%s450_s0 + $0x8] sm:$0xf]  ;;  %v15_v20 = vld [vmem:[%s450_s0 + $0xc] sm:$0xf]  ;;  %v16_v29 = vld [vmem:[%s450_s0 + $0x10] sm:$0xf] }
   0x5   :  { %v230_v17 = vcombine.low %v25_v12, %v26_v13  ;;  %v22_v21 = vld [vmem:[%s450_s0 + $0x28] sm:$0xf]  ;;  %v23_v22 = vld [vmem:[%s450_s0 + $0x2c] sm:$0xf]  ;;  %v27_v23 = vmax.bf16 %v307_v11, %v14_v19  ;;  %v28_v24 = vmax.bf16 %v307_v11, %v15_v20  ;;  %v17_v30 = vld [vmem:[%s450_s0 + $0x14] sm:$0xf]  ;;  %v29_v32 = vmax.bf16 %v307_v11, %v16_v29 }
   0x6   :  { %260 = vmatpush3.bf16.msra.mxu0 %v302_v4  ;;  %295 = vmatpush3.bf16.msra.mxu1 %v302_v4  ;;  %v234_v18 = vcombine.low %v33_v14, %v34_v15  ;;  %v35_v25 = vmax.bf16 %v307_v11, %v22_v21  ;;  %v36_v26 = vmax.bf16 %v307_v11, %v23_v22  ;;  %v24_v31 = vld [vmem:[%s450_s0 + $0x30] sm:$0x1]  ;;  %v18_v37 = vld [vmem:[%s450_s0 + $0x18] sm:$0xf]  ;;  %v19_v38 = vld [vmem:[%s450_s0 + $0x1c] sm:$0xf] }
   0x7   :  { %261 = vmatprep.subr.bf16.mxu0 %v304_v0  ;;  %293 = vmatprep.subr.bf16.mxu1 %v304_v0  ;;  %v231_v27 = vcombine.low %v27_v23, %v28_v24  ;;  %v30_v33 = vmax.bf16 %v307_v11, %v17_v30  ;;  %v37_v34 = vmax.bf16 %v307_v11, %v24_v31  ;;  %vm211_vm4 = vcmask 31744  }
   0x8   :  { %v235_v28 = vcombine.low %v35_v25, %v36_v26  ;;  %v31_v39 = vmax.bf16 %v307_v11, %v18_v37  ;;  %v32_v40 = vmax.bf16 %v307_v11, %v19_v38  ;;  %vm224_vm5 = vcmask 25600  }
   0x9   :  { %v232_v35 = vcombine.low %v29_v32, %v30_v33  ;;  %v236_v36 = vcombine.low %v37_v34, %v37_v34 }
   0xa   :  { %262 = vmatpush3.bf16.msra.mxu0 %v121_v16  ;;  %296 = vmatpush3.bf16.msra.mxu1 %v121_v16  ;;  %v233_v41 = vcombine.low %v31_v39, %v32_v40 }
   0xd   :  { %264 = vmatmul.mubr.msk.bf16.vlgmr.msra.gmra.mrb[0].mxu0 %vm94_vm3, %v230_v17  ;;  %280 = vmatmul.mubr.msk.bf16.vlgmr.msra.gmra.mrb[0].mxu1 %vm94_vm3, %v234_v18 }
   0xe   :  { %267 = vmatprep.mubr.msk.bf16.mxu0 %vm306_vm2, %v304_v0  ;;  %283 = vmatprep.mubr.msk.bf16.mxu1 %vm306_vm2, %v304_v0 }
  0x15   :  { %268 = vmatmul.mubr.msk.bf16.gmra.mrb[4].mxu0 %vm94_vm3, %v231_v27  ;;  %284 = vmatmul.mubr.msk.bf16.gmra.mrb[4].mxu1 %vm94_vm3, %v235_v28 }
  0x16   :  { %271 = vmatprep.mubr.msk.bf16.mxu0 %vm306_vm2, %v304_v0  ;;  %287 = vmatprep.mubr.msk.bf16.mxu1 %vm306_vm2, %v304_v0 }
  0x1d   :  { %272 = vmatmul.mubr.msk.bf16.gmra.mrb[8].mxu0 %vm94_vm3, %v232_v35  ;;  %288 = vmatmul.mubr.msk.bf16.gmra.mrb[8].mxu1 %vm94_vm3, %v236_v36 }
  0x1e   :  { %275 = vmatprep.mubr.msk.bf16.mxu0 %vm306_vm2, %v304_v0 }
  0x25   :  { %276 = vmatmul.mubr.msk.bf16.gmra.mrb[12].mxu0 %vm94_vm3, %v233_v41 }
  0xe0   :  { %v157_v42 = vpop.f32.mrb[0].mxu0  ;;  %v189_v43 = vpop.f32.mrb[0].mxu1 }
  0xe1   :  { %212 = vst.msk [vmem:[%s451_s2] sm:$0xff] %vm211_vm4, %v157_v42  ;;  %v265_v44 = vpop.f32.mrb[1].mxu0  ;;  %220 = vst.msk [vmem:[%s451_s2 + $0x40] sm:$0xff] %vm211_vm4, %v189_v43  ;;  %v281_v45 = vpop.f32.mrb[1].mxu1 }
  0xe2   :  { %v160_v46 = vpop.f32.mrb[2].mxu0  ;;  %v192_v47 = vpop.f32.mrb[2].mxu1 }
  0xe3   :  { %213 = vst.msk [vmem:[%s451_s2 + $0x8] sm:$0xff] %vm211_vm4, %v160_v46  ;;  %v266_v48 = vpop.f32.mrb[3].mxu0  ;;  %221 = vst.msk [vmem:[%s451_s2 + $0x48] sm:$0xff] %vm211_vm4, %v192_v47  ;;  %v282_v49 = vpop.f32.mrb[3].mxu1 }
  0xe8   :  { %v165_v50 = vpop.f32.mrb[4].mxu0  ;;  %v197_v51 = vpop.f32.mrb[4].mxu1 }
  0xe9   :  { %214 = vst.msk [vmem:[%s451_s2 + $0x10] sm:$0xff] %vm211_vm4, %v165_v50  ;;  %v269_v52 = vpop.f32.mrb[5].mxu0  ;;  %222 = vst.msk [vmem:[%s451_s2 + $0x50] sm:$0xff] %vm211_vm4, %v197_v51  ;;  %v285_v53 = vpop.f32.mrb[5].mxu1 }
  0xea   :  { %v168_v54 = vpop.f32.mrb[6].mxu0  ;;  %v200_v55 = vpop.f32.mrb[6].mxu1 }
  0xeb   :  { %215 = vst.msk [vmem:[%s451_s2 + $0x18] sm:$0xff] %vm211_vm4, %v168_v54  ;;  %v270_v56 = vpop.f32.mrb[7].mxu0  ;;  %223 = vst.msk [vmem:[%s451_s2 + $0x58] sm:$0xff] %vm211_vm4, %v200_v55  ;;  %v286_v57 = vpop.f32.mrb[7].mxu1 }
  0xf0   :  { %v173_v58 = vpop.f32.mrb[8].mxu0  ;;  %v205_v59 = vpop.f32.mrb[8].mxu1 }
  0xf1   :  { %216 = vst.msk [vmem:[%s451_s2 + $0x20] sm:$0xff] %vm211_vm4, %v173_v58  ;;  %v273_v60 = vpop.f32.mrb[9].mxu0  ;;  %v289_v61 = vpop.f32.mrb[9].mxu1 }
  0xf2   :  { %225 = vst.msk [vmem:[%s451_s2 + $0x60] sm:$0x3] %vm224_vm5, %v205_v59  ;;  %v176_v62 = vpop.f32.mrb[10].mxu0  ;;  %v208_v63 = vpop.f32.mrb[10].mxu1 }
  0xf3   :  { %217 = vst.msk [vmem:[%s451_s2 + $0x28] sm:$0xff] %vm211_vm4, %v176_v62  ;;  %v274_v0 = vpop.f32.mrb[11].mxu0  ;;  %v290_v1 = vpop.f32.mrb[11].mxu1 }
  0xf8   :  { %v181_v2 = vpop.f32.mrb[12].mxu0 }
  0xf9   :  { %218 = vst.msk [vmem:[%s451_s2 + $0x30] sm:$0xff] %vm211_vm4, %v181_v2  ;;  %v277_v3 = vpop.f32.mrb[13].mxu0 }
  0xfa   :  { %v184_v4 = vpop.f32.mrb[14].mxu0 }
  0xfb   :  { %219 = vst.msk [vmem:[%s451_s2 + $0x38] sm:$0xff] %vm211_vm4, %v184_v4  ;;  %v278_v5 = vpop.f32.mrb[15].mxu0 }

// kernel: dense_ed_forward.18
= control target key start
LH: loop header
LB: loop body
LE: loop exit
PB: predicated region body
PF: predicated region fallthrough
CT: control target
= control target key end

     0   :  { %vm100_vm0 = vcmask 1043456   ;;  %vm101_vm1 = vcmask 1044480   ;;  %v274_v0 = vmov 0.0   ;;  %v275_v2 = vmov 65535   ;;  %s400_s1 = inlined_call_operand.vmem [shape: bf16[9,4], index: 1, kind: input, shape index: {}]   ;;  %s401_s0 = inlined_call_operand.vmem [shape: bf16[98,9], index: 0, kind: input, shape index: {}]   ;;  %s402_s2 = inlined_call_operand.vmem [shape: f32[98,4], index: 2, kind: output, shape index: {}]  }
   0x1   :  { %237 = vmatprep.subr.bf16.mxu0 %v274_v0  ;;  %v273_v1 = vld [vmem:[%s400_s1] sm:$0x1f]   ;;  %267 = vmatprep.subr.bf16.mxu1 %v274_v0  ;;  %v102_v3 = vsel %vm100_vm0, 4294967295, %v275_v2  ;;  %vm276_vm2 = vmmov 0   ;;  %v277_v9 = vmov 0   ;;  %vm78_vm3 = vcmask 72704  }
   0x2   :  { %v12_v4 = vld [vmem:[%s401_s0] sm:$0xf]  ;;  %v13_v5 = vld [vmem:[%s401_s0 + $0x4] sm:$0xf]  ;;  %v103_v6 = vsel %vm101_vm1, %v102_v3, 0  ;;  %239 = vmatprep.mubr.msk.bf16.mxu0 %vm276_vm2, %v274_v0  ;;  %255 = vmatprep.mubr.msk.bf16.mxu1 %vm276_vm2, %v274_v0  ;;  %vm195_vm4 = vcmask 31744  }
   0x3   :  { %v20_v7 = vld [vmem:[%s401_s0 + $0x20] sm:$0xf]  ;;  %v105_v8 = vand.u32 %v273_v1, %v103_v6  ;;  %v25_v10 = vmax.bf16 %v277_v9, %v12_v4  ;;  %v26_v11 = vmax.bf16 %v277_v9, %v13_v5  ;;  %v21_v12 = vld [vmem:[%s401_s0 + $0x24] sm:$0xf]  ;;  %v14_v15 = vld [vmem:[%s401_s0 + $0x8] sm:$0xf] }
   0x4   :  { %v33_v13 = vmax.bf16 %v277_v9, %v20_v7  ;;  %v34_v14 = vmax.bf16 %v277_v9, %v21_v12  ;;  %v15_v17 = vld [vmem:[%s401_s0 + $0xc] sm:$0xf]  ;;  %v22_v18 = vld [vmem:[%s401_s0 + $0x28] sm:$0xf]  ;;  %v27_v21 = vmax.bf16 %v277_v9, %v14_v15  ;;  %v16_v27 = vld [vmem:[%s401_s0 + $0x10] sm:$0xf] }
   0x5   :  { %238 = vmatpush3.bf16.msra.mxu0 %v105_v8  ;;  %v214_v16 = vcombine.low %v25_v10, %v26_v11  ;;  %268 = vmatpush3.bf16.msra.mxu1 %v105_v8  ;;  %v23_v19 = vld [vmem:[%s401_s0 + $0x2c] sm:$0xf]  ;;  %v28_v22 = vmax.bf16 %v277_v9, %v15_v17  ;;  %v35_v23 = vmax.bf16 %v277_v9, %v22_v18  ;;  %v17_v28 = vld [vmem:[%s401_s0 + $0x14] sm:$0xf]  ;;  %v24_v29 = vld [vmem:[%s401_s0 + $0x30] sm:$0x1] }
   0x6   :  { %v218_v20 = vcombine.low %v33_v13, %v34_v14  ;;  %v36_v24 = vmax.bf16 %v277_v9, %v23_v19  ;;  %v29_v30 = vmax.bf16 %v277_v9, %v16_v27  ;;  %v30_v31 = vmax.bf16 %v277_v9, %v17_v28  ;;  %v18_v35 = vld [vmem:[%s401_s0 + $0x18] sm:$0xf]  ;;  %v19_v36 = vld [vmem:[%s401_s0 + $0x1c] sm:$0xf] }
   0x7   :  { %v215_v25 = vcombine.low %v27_v21, %v28_v22  ;;  %v37_v32 = vmax.bf16 %v277_v9, %v24_v29  ;;  %v31_v37 = vmax.bf16 %v277_v9, %v18_v35  ;;  %v32_v38 = vmax.bf16 %v277_v9, %v19_v36 }
   0x8   :  { %240 = vmatmul.mubr.msk.bf16.vlgmr.msra.gmra.mrb[0].mxu0 %vm78_vm3, %v214_v16  ;;  %256 = vmatmul.mubr.msk.bf16.vlgmr.msra.gmra.mrb[0].mxu1 %vm78_vm3, %v218_v20  ;;  %v219_v26 = vcombine.low %v35_v23, %v36_v24  ;;  %v216_v33 = vcombine.low %v29_v30, %v30_v31  ;;  %vm208_vm5 = vcmask 25600  }
   0x9   :  { %243 = vmatprep.mubr.msk.bf16.mxu0 %vm276_vm2, %v274_v0  ;;  %259 = vmatprep.mubr.msk.bf16.mxu1 %vm276_vm2, %v274_v0  ;;  %v220_v34 = vcombine.low %v37_v32, %v37_v32  ;;  %v217_v39 = vcombine.low %v31_v37, %v32_v38 }
  0x10   :  { %244 = vmatmul.mubr.msk.bf16.gmra.mrb[4].mxu0 %vm78_vm3, %v215_v25  ;;  %260 = vmatmul.mubr.msk.bf16.gmra.mrb[4].mxu1 %vm78_vm3, %v219_v26 }
  0x11   :  { %247 = vmatprep.mubr.msk.bf16.mxu0 %vm276_vm2, %v274_v0  ;;  %263 = vmatprep.mubr.msk.bf16.mxu1 %vm276_vm2, %v274_v0 }
  0x18   :  { %248 = vmatmul.mubr.msk.bf16.gmra.mrb[8].mxu0 %vm78_vm3, %v216_v33  ;;  %264 = vmatmul.mubr.msk.bf16.gmra.mrb[8].mxu1 %vm78_vm3, %v220_v34 }
  0x19   :  { %251 = vmatprep.mubr.msk.bf16.mxu0 %vm276_vm2, %v274_v0 }
  0x20   :  { %252 = vmatmul.mubr.msk.bf16.gmra.mrb[12].mxu0 %vm78_vm3, %v217_v39 }
  0xdb   :  { %v141_v40 = vpop.f32.mrb[0].mxu0  ;;  %v173_v41 = vpop.f32.mrb[0].mxu1 }
  0xdc   :  { %196 = vst.msk [vmem:[%s402_s2] sm:$0xff] %vm195_vm4, %v141_v40  ;;  %v241_v42 = vpop.f32.mrb[1].mxu0  ;;  %204 = vst.msk [vmem:[%s402_s2 + $0x40] sm:$0xff] %vm195_vm4, %v173_v41  ;;  %v257_v43 = vpop.f32.mrb[1].mxu1 }
  0xdd   :  { %v144_v44 = vpop.f32.mrb[2].mxu0  ;;  %v176_v45 = vpop.f32.mrb[2].mxu1 }
  0xde   :  { %197 = vst.msk [vmem:[%s402_s2 + $0x8] sm:$0xff] %vm195_vm4, %v144_v44  ;;  %v242_v46 = vpop.f32.mrb[3].mxu0  ;;  %205 = vst.msk [vmem:[%s402_s2 + $0x48] sm:$0xff] %vm195_vm4, %v176_v45  ;;  %v258_v47 = vpop.f32.mrb[3].mxu1 }
  0xe3   :  { %v149_v48 = vpop.f32.mrb[4].mxu0  ;;  %v181_v49 = vpop.f32.mrb[4].mxu1 }
  0xe4   :  { %198 = vst.msk [vmem:[%s402_s2 + $0x10] sm:$0xff] %vm195_vm4, %v149_v48  ;;  %v245_v50 = vpop.f32.mrb[5].mxu0  ;;  %206 = vst.msk [vmem:[%s402_s2 + $0x50] sm:$0xff] %vm195_vm4, %v181_v49  ;;  %v261_v51 = vpop.f32.mrb[5].mxu1 }
  0xe5   :  { %v152_v52 = vpop.f32.mrb[6].mxu0  ;;  %v184_v53 = vpop.f32.mrb[6].mxu1 }
  0xe6   :  { %199 = vst.msk [vmem:[%s402_s2 + $0x18] sm:$0xff] %vm195_vm4, %v152_v52  ;;  %v246_v54 = vpop.f32.mrb[7].mxu0  ;;  %207 = vst.msk [vmem:[%s402_s2 + $0x58] sm:$0xff] %vm195_vm4, %v184_v53  ;;  %v262_v55 = vpop.f32.mrb[7].mxu1 }
  0xeb   :  { %v157_v56 = vpop.f32.mrb[8].mxu0  ;;  %v189_v57 = vpop.f32.mrb[8].mxu1 }
  0xec   :  { %200 = vst.msk [vmem:[%s402_s2 + $0x20] sm:$0xff] %vm195_vm4, %v157_v56  ;;  %v249_v58 = vpop.f32.mrb[9].mxu0  ;;  %v265_v59 = vpop.f32.mrb[9].mxu1 }
  0xed   :  { %209 = vst.msk [vmem:[%s402_s2 + $0x60] sm:$0x3] %vm208_vm5, %v189_v57  ;;  %v160_v60 = vpop.f32.mrb[10].mxu0  ;;  %v192_v61 = vpop.f32.mrb[10].mxu1 }
  0xee   :  { %201 = vst.msk [vmem:[%s402_s2 + $0x28] sm:$0xff] %vm195_vm4, %v160_v60  ;;  %v250_v62 = vpop.f32.mrb[11].mxu0  ;;  %v266_v63 = vpop.f32.mrb[11].mxu1 }
  0xf3   :  { %v165_v0 = vpop.f32.mrb[12].mxu0 }
  0xf4   :  { %202 = vst.msk [vmem:[%s402_s2 + $0x30] sm:$0xff] %vm195_vm4, %v165_v0  ;;  %v253_v1 = vpop.f32.mrb[13].mxu0 }
  0xf5   :  { %v168_v2 = vpop.f32.mrb[14].mxu0 }
  0xf6   :  { %203 = vst.msk [vmem:[%s402_s2 + $0x38] sm:$0xff] %vm195_vm4, %v168_v2  ;;  %v254_v3 = vpop.f32.mrb[15].mxu0 }

// kernel: dense_ed_forward.19
= control target key start
LH: loop header
LB: loop body
LE: loop exit
PB: predicated region body
PF: predicated region fallthrough
CT: control target
= control target key end

     0   :  { %v2307_v0 = vmov 0   ;;  %vm500_vm0 = vcmask 130048   ;;  %vm1849_vm4 = vcmask 23552   ;;  %s4345_s1 = inlined_call_operand.vmem [shape: bf16[144,3], index: 1, kind: input, shape index: {}]   ;;  %s4346_s0 = inlined_call_operand.vmem [shape: bf16[512,144], index: 0, kind: input, shape index: {}]   ;;  %s4347_s2 = inlined_call_operand.vmem [shape: f32[512,3], index: 2, kind: output, shape index: {}]  }
   0x1   :  { %597 = vmatprep.subr.bf16.mxu0 %v2307_v0  ;;  %2023 = vmatprep.subr.bf16.mxu1 %v2307_v0  ;;  %v2042_v1 = vld [vmem:[%s4345_s1] sm:$0xff]   ;;  %v2043_v2 = vld [vmem:[%s4345_s1 + $0x8] sm:$0xff]   ;;  %v2044_v3 = vld [vmem:[%s4345_s1 + $0x10] sm:$0xff]  }
   0x2   :  { %598 = vmatpush1.bf16.msra.mxu0 %v2042_v1  ;;  %2032 = vmatpush1.bf16.msra.mxu1 %v2042_v1  ;;  %v12_v4 = vld [vmem:[%s4346_s0] sm:$0xff]  ;;  %v13_v5 = vld [vmem:[%s4346_s0 + $0x8] sm:$0xff]  ;;  %v2045_v7 = vld [vmem:[%s4345_s1 + $0x18] sm:$0xff]  }
   0x3   :  { %599 = vmatprep.subr.bf16.mxu0 %v2307_v0  ;;  %2024 = vmatprep.subr.bf16.mxu1 %v2307_v0  ;;  %v44_v6 = vld [vmem:[%s4346_s0 + $0x100] sm:$0xff]  ;;  %v2351_v8 = vmax.bf16 %v2307_v0, %v12_v4  ;;  %v2354_v9 = vmax.bf16 %v2307_v0, %v13_v5  ;;  %v45_v10 = vld [vmem:[%s4346_s0 + $0x108] sm:$0xff]  ;;  %v14_v16 = vld [vmem:[%s4346_s0 + $0x10] sm:$0xff] }
   0x4   :  { %v2360_v11 = vmax.bf16 %v2307_v0, %v44_v6  ;;  %v2365_v12 = vmax.bf16 %v2307_v0, %v45_v10  ;;  %v2046_v15 = vld [vmem:[%s4345_s1 + $0x20] sm:$0xff]   ;;  %v15_v17 = vld [vmem:[%s4346_s0 + $0x18] sm:$0xff]  ;;  %v46_v18 = vld [vmem:[%s4346_s0 + $0x110] sm:$0xff]  ;;  %v2399_v22 = vmax.bf16 %v2307_v0, %v14_v16 }
   0x5   :  { %v1919_v13 = vcombine.high %v2351_v8, %v2354_v9  ;;  %v47_v19 = vld [vmem:[%s4346_s0 + $0x118] sm:$0xff]  ;;  %v2047_v20 = vld [vmem:[%s4345_s1 + $0x28] sm:$0xff]   ;;  %v16_v21 = vld [vmem:[%s4346_s0 + $0x20] sm:$0xff]  ;;  %v2402_v23 = vmax.bf16 %v2307_v0, %v15_v17  ;;  %v2405_v24 = vmax.bf16 %v2307_v0, %v46_v18  ;;  %v1918_v30 = vcombine.low %v2351_v8, %v2354_v9 }
   0x6   :  { %600 = vmatpush1.bf16.msra.mxu0 %v2043_v2  ;;  %2033 = vmatpush1.bf16.msra.mxu1 %v2043_v2  ;;  %v1951_v14 = vcombine.high %v2360_v11, %v2365_v12  ;;  %v2408_v25 = vmax.bf16 %v2307_v0, %v47_v19  ;;  %v17_v26 = vld [vmem:[%s4346_s0 + $0x28] sm:$0xff]  ;;  %v48_v27 = vld [vmem:[%s4346_s0 + $0x120] sm:$0xff]  ;;  %v2048_v29 = vld [vmem:[%s4345_s1 + $0x30] sm:$0xff]   ;;  %v2425_v31 = vmax.bf16 %v2307_v0, %v16_v21 }
   0x7   :  { %601 = vmatprep.subr.bf16.mxu0 %v2307_v0  ;;  %2025 = vmatprep.subr.bf16.mxu1 %v2307_v0  ;;  %v49_v28 = vld [vmem:[%s4346_s0 + $0x128] sm:$0xff]  ;;  %v26_v32 = vld [vmem:[%s4346_s0 + $0x70] sm:$0xff]  ;;  %v27_v33 = vld [vmem:[%s4346_s0 + $0x78] sm:$0xff]  ;;  %v2439_v35 = vmax.bf16 %v2307_v0, %v17_v26  ;;  %v2442_v36 = vmax.bf16 %v2307_v0, %v48_v27  ;;  %v1950_v41 = vcombine.low %v2360_v11, %v2365_v12 }
   0x8   :  { %1991 = vmatprep.mubr.msk.bf16.mxu0 %vm500_vm0, %v1919_v13  ;;  %2007 = vmatprep.mubr.msk.bf16.mxu1 %vm500_vm0, %v1951_v14  ;;  %v58_v34 = vld [vmem:[%s4346_s0 + $0x170] sm:$0xff]  ;;  %v2445_v37 = vmax.bf16 %v2307_v0, %v49_v28  ;;  %v19_v39 = vld [vmem:[%s4346_s0 + $0x38] sm:$0xff]  ;;  %v1921_v42 = vcombine.high %v2399_v22, %v2402_v23  ;;  %v1953_v43 = vcombine.high %v2405_v24, %v2408_v25  ;;  %v28_v50 = vld [vmem:[%s4346_s0 + $0x80] sm:$0xff] }
   0x9   :  { %v18_v38 = vld [vmem:[%s4346_s0 + $0x30] sm:$0xff]  ;;  %v59_v40 = vld [vmem:[%s4346_s0 + $0x178] sm:$0xff]  ;;  %v1920_v44 = vcombine.low %v2399_v22, %v2402_v23  ;;  %v1952_v46 = vcombine.low %v2405_v24, %v2408_v25  ;;  %v2470_v47 = vmax.bf16 %v2307_v0, %v26_v32  ;;  %v2473_v48 = vmax.bf16 %v2307_v0, %v27_v33  ;;  %v29_v51 = vld [vmem:[%s4346_s0 + $0x88] sm:$0xff] }
   0xa   :  { %602 = vmatpush1.bf16.msra.mxu0 %v2044_v3  ;;  %2034 = vmatpush1.bf16.msra.mxu1 %v2044_v3  ;;  %v2049_v45 = vld [vmem:[%s4345_s1 + $0x38] sm:$0xff]   ;;  %v2476_v49 = vmax.bf16 %v2307_v0, %v58_v34  ;;  %v2485_v52 = vmax.bf16 %v2307_v0, %v18_v38  ;;  %v2488_v53 = vmax.bf16 %v2307_v0, %v19_v39  ;;  %v60_v55 = vld [vmem:[%s4346_s0 + $0x180] sm:$0xff]  ;;  %v61_v56 = vld [vmem:[%s4346_s0 + $0x188] sm:$0xff] }
   0xb   :  { %603 = vmatprep.subr.bf16.mxu0 %v2307_v0  ;;  %2026 = vmatprep.subr.bf16.mxu1 %v2307_v0  ;;  %v2491_v54 = vmax.bf16 %v2307_v0, %v59_v40  ;;  %v30_v57 = vld [vmem:[%s4346_s0 + $0x90] sm:$0xff]  ;;  %v1923_v58 = vcombine.high %v2425_v31, %v2439_v35  ;;  %v1955_v59 = vcombine.high %v2442_v36, %v2445_v37  ;;  %v31_v61 = vld [vmem:[%s4346_s0 + $0x98] sm:$0xff]  ;;  %v2050_v5 = vld [vmem:[%s4345_s1 + $0x40] sm:$0xff]  }
   0xc   :  { %v1933_v60 = vcombine.high %v2470_v47, %v2473_v48  ;;  %v62_v62 = vld [vmem:[%s4346_s0 + $0x190] sm:$0xff]  ;;  %v63_v63 = vld [vmem:[%s4346_s0 + $0x198] sm:$0xff]  ;;  %v1932_v2 = vcombine.low %v2470_v47, %v2473_v48  ;;  %v2526_v4 = vmax.bf16 %v2307_v0, %v28_v50  ;;  %v2532_v6 = vmax.bf16 %v2307_v0, %v29_v51  ;;  %v32_v17 = vld [vmem:[%s4346_s0 + $0xa0] sm:$0xff] }
   0xd   :  { %v1965_v1 = vcombine.high %v2476_v49, %v2491_v54  ;;  %v1964_v3 = vcombine.low %v2476_v49, %v2491_v54  ;;  %v2538_v10 = vmax.bf16 %v2307_v0, %v61_v56  ;;  %v2541_v13 = vmax.bf16 %v2307_v0, %v30_v57  ;;  %v33_v18 = vld [vmem:[%s4346_s0 + $0xa8] sm:$0xff]  ;;  %v64_v19 = vld [vmem:[%s4346_s0 + $0x1a0] sm:$0xff]  ;;  %v34_v28 = vld [vmem:[%s4346_s0 + $0xb0] sm:$0xff] }
   0xe   :  { %604 = vmatpush1.bf16.msra.mxu0 %v2045_v7  ;;  %2035 = vmatpush1.bf16.msra.mxu1 %v2045_v7  ;;  %v2535_v7 = vmax.bf16 %v2307_v0, %v60_v55  ;;  %v2544_v14 = vmax.bf16 %v2307_v0, %v31_v61  ;;  %v2550_v16 = vmax.bf16 %v2307_v0, %v63_v63  ;;  %v65_v27 = vld [vmem:[%s4346_s0 + $0x1a8] sm:$0xff]  ;;  %v66_v39 = vld [vmem:[%s4346_s0 + $0x1b0] sm:$0xff]  ;;  %v67_v40 = vld [vmem:[%s4346_s0 + $0x1b8] sm:$0xff] }
   0xf   :  { %605 = vmatprep.subr.bf16.mxu0 %v2307_v0  ;;  %2027 = vmatprep.subr.bf16.mxu1 %v2307_v0  ;;  %v2595_v50 = vmax.bf16 %v2307_v0, %v32_v17  ;;  %v2598_v51 = vmax.bf16 %v2307_v0, %v33_v18  ;;  %v2601_v55 = vmax.bf16 %v2307_v0, %v64_v19  ;;  %v37_v63 = vld [vmem:[%s4346_s0 + $0xc8] sm:$0xff]  ;;  %v70_v38 = vld [vmem:[%s4346_s0 + $0x1d0] sm:$0xff]  ;;  %v71_v17 = vld [vmem:[%s4346_s0 + $0x1d8] sm:$0xff] }
  0x10   :  { %v2604_v56 = vmax.bf16 %v2307_v0, %v65_v27  ;;  %v2607_v57 = vmax.bf16 %v2307_v0, %v34_v28  ;;  %v2623_v18 = vmax.bf16 %v2307_v0, %v66_v39  ;;  %v2626_v19 = vmax.bf16 %v2307_v0, %v67_v40  ;;  %v68_v27 = vld [vmem:[%s4346_s0 + $0x1c0] sm:$0xff]  ;;  %v69_v28 = vld [vmem:[%s4346_s0 + $0x1c8] sm:$0xff]  ;;  %v43_v40 = vld [vmem:[%s4346_s0 + $0xf8] sm:$0xff] }
  0x11   :  { %v2676_v8 = vmax.bf16 %v2307_v0, %v37_v63  ;;  %v2679_v9 = vmax.bf16 %v2307_v0, %v68_v27  ;;  %v2682_v11 = vmax.bf16 %v2307_v0, %v69_v28  ;;  %v40_v12 = vld [vmem:[%s4346_s0 + $0xe0] sm:$0xff]  ;;  %v73_v27 = vld [vmem:[%s4346_s0 + $0x1e8] sm:$0xff]  ;;  %v42_v28 = vld [vmem:[%s4346_s0 + $0xf0] sm:$0xff]  ;;  %v1922_v25 = vcombine.low %v2425_v31, %v2439_v35 }
  0x12   :  { %606 = vmatpush1.bf16.msra.mxu0 %v2046_v15  ;;  %2036 = vmatpush1.bf16.msra.mxu1 %v2046_v15  ;;  %v2547_v15 = vmax.bf16 %v2307_v0, %v62_v62  ;;  %v36_v62 = vld [vmem:[%s4346_s0 + $0xc0] sm:$0xff]  ;;  %v2737_v33 = vmax.bf16 %v2307_v0, %v40_v12  ;;  %v51_v34 = vld [vmem:[%s4346_s0 + $0x138] sm:$0xff]  ;;  %v2755_v12 = vmax.bf16 %v2307_v0, %v42_v28  ;;  %v53_v31 = vld [vmem:[%s4346_s0 + $0x148] sm:$0xff] }
  0x13   :  { %607 = vmatprep.subr.bf16.mxu0 %v2307_v0  ;;  %2028 = vmatprep.subr.bf16.mxu1 %v2307_v0  ;;  %v2665_v39 = vmax.bf16 %v2307_v0, %v36_v62  ;;  %v2700_v62 = vmax.bf16 %v2307_v0, %v71_v17  ;;  %v72_v63 = vld [vmem:[%s4346_s0 + $0x1e0] sm:$0xff]  ;;  %v50_v17 = vld [vmem:[%s4346_s0 + $0x130] sm:$0xff]  ;;  %v115_v23 = vmax.bf16 %v2307_v0, %v51_v34  ;;  %v21_v34 = vld [vmem:[%s4346_s0 + $0x48] sm:$0xff] }
  0x14   :  { %v2743_v26 = vmax.bf16 %v2307_v0, %v72_v63  ;;  %v114_v22 = vmax.bf16 %v2307_v0, %v50_v17  ;;  %v52_v17 = vld [vmem:[%s4346_s0 + $0x140] sm:$0xff]  ;;  %v117_v24 = vmax.bf16 %v2307_v0, %v53_v31  ;;  %v4351_v47 = vcombine.low %v2535_v7, %v2538_v10 }
  0x15   :  { %v4352_v48 = vcombine.high %v2541_v13, %v2544_v14  ;;  %v4353_v49 = vcombine.high %v2547_v15, %v2550_v16  ;;  %v4354_v54 = vcombine.low %v2541_v13, %v2544_v14  ;;  %v4361_v13 = vcombine.high %v2623_v18, %v2626_v19 }
  0x16   :  { %608 = vmatpush1.bf16.msra.mxu0 %v2047_v20  ;;  %2037 = vmatpush1.bf16.msra.mxu1 %v2047_v20 }
  0x17   :  { %609 = vmatprep.subr.bf16.mxu0 %v2307_v0  ;;  %2029 = vmatprep.subr.bf16.mxu1 %v2307_v0 }
  0x1a   :  { %610 = vmatpush1.bf16.msra.mxu0 %v2048_v29  ;;  %2038 = vmatpush1.bf16.msra.mxu1 %v2048_v29  ;;  %v35_v29 = vld [vmem:[%s4346_s0 + $0xb8] sm:$0xff] }
  0x1b   :  { %611 = vmatprep.subr.bf16.mxu0 %v2307_v0  ;;  %2030 = vmatprep.subr.bf16.mxu1 %v2307_v0  ;;  %v2610_v61 = vmax.bf16 %v2307_v0, %v35_v29  ;;  %v38_v29 = vld [vmem:[%s4346_s0 + $0xd0] sm:$0xff] }
  0x1d   :  { %v4362_v14 = vcombine.low %v2607_v57, %v2610_v61 }
  0x1e   :  { %612 = vmatpush1.bf16.msra.mxu0 %v2049_v45  ;;  %2039 = vmatpush1.bf16.msra.mxu1 %v2049_v45  ;;  %v39_v45 = vld [vmem:[%s4346_s0 + $0xd8] sm:$0xff] }
  0x1f   :  { %613 = vmatprep.subr.bf16.mxu0 %v2307_v0  ;;  %2031 = vmatprep.subr.bf16.mxu1 %v2307_v0 }
  0x22   :  { %614 = vmatpush1.bf16.msra.mxu0 %v2050_v5  ;;  %2040 = vmatpush1.bf16.msra.mxu1 %v2050_v5  ;;  %v74_v5 = vld [vmem:[%s4346_s0 + $0x1f0] sm:$0xff] }
  0x23   :  { %v2761_v63 = vmax.bf16 %v2307_v0, %v74_v5 }
  0x25   :  { %630 = vmatmul.mubr.bf16.vlgmr.msra.gmra.mrb[0].mxu0 %v1918_v30  ;;  %758 = vmatmul.mubr.bf16.vlgmr.msra.gmra.mrb[0].mxu1 %v1950_v41  ;;  %v41_v30 = vld [vmem:[%s4346_s0 + $0xe8] sm:$0xff]  ;;  %v2691_v41 = vmax.bf16 %v2307_v0, %v38_v29 }
  0x26   :  { %1992 = vmatprep.mubr.msk.bf16.mxu0 %vm500_vm0, %v1921_v42  ;;  %2008 = vmatprep.mubr.msk.bf16.mxu1 %vm500_vm0, %v1953_v43  ;;  %v2694_v42 = vmax.bf16 %v2307_v0, %v39_v45  ;;  %v2697_v43 = vmax.bf16 %v2307_v0, %v70_v38  ;;  %v75_v45 = vld [vmem:[%s4346_s0 + $0x1f8] sm:$0xff]  ;;  %v2740_v32 = vmax.bf16 %v2307_v0, %v41_v30 }
  0x27   :  { %v2746_v38 = vmax.bf16 %v2307_v0, %v73_v27  ;;  %v2758_v30 = vmax.bf16 %v2307_v0, %v43_v40  ;;  %v2764_v27 = vmax.bf16 %v2307_v0, %v75_v45  ;;  %v1924_v45 = vcombine.low %v2485_v52, %v2488_v53 }
  0x28   :  { %v1947_v29 = vcombine.high %v2737_v33, %v2740_v32  ;;  %v1946_v20 = vcombine.low %v2737_v33, %v2740_v32  ;;  %v1956_v40 = vcombine.low %v114_v22, %v115_v23 }
  0x29   :  { %v1979_v21 = vcombine.high %v2743_v26, %v2746_v38 }
  0x2d   :  { %638 = vmatmul.mubr.bf16.gmra.mrb[4].mxu0 %v1920_v44  ;;  %766 = vmatmul.mubr.bf16.gmra.mrb[4].mxu1 %v1952_v46  ;;  %v1954_v44 = vcombine.low %v2442_v36, %v2445_v37  ;;  %v1925_v46 = vcombine.high %v2485_v52, %v2488_v53  ;;  %v85_v36 = vmax.bf16 %v2307_v0, %v21_v34 }
  0x2e   :  { %1993 = vmatprep.mubr.msk.bf16.mxu0 %vm500_vm0, %v1923_v58  ;;  %2009 = vmatprep.mubr.msk.bf16.mxu1 %vm500_vm0, %v1955_v59  ;;  %v1957_v58 = vcombine.high %v114_v22, %v115_v23  ;;  %v20_v59 = vld [vmem:[%s4346_s0 + $0x40] sm:$0xff]  ;;  %v116_v37 = vmax.bf16 %v2307_v0, %v52_v17 }
  0x2f   :  { %v84_v35 = vmax.bf16 %v2307_v0, %v20_v59 }
  0x30   :  { %v1959_v28 = vcombine.high %v116_v37, %v117_v24  ;;  %v1958_v34 = vcombine.low %v116_v37, %v117_v24 }
  0x31   :  { %v1927_v5 = vcombine.high %v84_v35, %v85_v36  ;;  %v1926_v59 = vcombine.low %v84_v35, %v85_v36 }
  0x35   :  { %646 = vmatmul.mubr.bf16.gmra.mrb[8].mxu0 %v1922_v25  ;;  %774 = vmatmul.mubr.bf16.gmra.mrb[8].mxu1 %v1954_v44  ;;  %v22_v25 = vld [vmem:[%s4346_s0 + $0x50] sm:$0xff]  ;;  %v23_v44 = vld [vmem:[%s4346_s0 + $0x58] sm:$0xff] }
  0x36   :  { %1994 = vmatprep.mubr.msk.bf16.mxu0 %vm500_vm0, %v1925_v46  ;;  %2010 = vmatprep.mubr.msk.bf16.mxu1 %vm500_vm0, %v1957_v58  ;;  %v54_v46 = vld [vmem:[%s4346_s0 + $0x150] sm:$0xff]  ;;  %v55_v58 = vld [vmem:[%s4346_s0 + $0x158] sm:$0xff]  ;;  %v86_v52 = vmax.bf16 %v2307_v0, %v22_v25  ;;  %v87_v53 = vmax.bf16 %v2307_v0, %v23_v44 }
  0x37   :  { %v118_v22 = vmax.bf16 %v2307_v0, %v54_v46  ;;  %v119_v23 = vmax.bf16 %v2307_v0, %v55_v58 }
  0x38   :  { %v1929_v17 = vcombine.high %v86_v52, %v87_v53  ;;  %v1928_v25 = vcombine.low %v86_v52, %v87_v53 }
  0x39   :  { %v1961_v31 = vcombine.high %v118_v22, %v119_v23  ;;  %v1960_v44 = vcombine.low %v118_v22, %v119_v23 }
  0x3d   :  { %654 = vmatmul.mubr.bf16.gmra.mrb[12].mxu0 %v1924_v45  ;;  %782 = vmatmul.mubr.bf16.gmra.mrb[12].mxu1 %v1956_v40  ;;  %v24_v40 = vld [vmem:[%s4346_s0 + $0x60] sm:$0xff]  ;;  %v57_v45 = vld [vmem:[%s4346_s0 + $0x168] sm:$0xff] }
  0x3e   :  { %1995 = vmatprep.mubr.msk.bf16.mxu0 %vm500_vm0, %v1927_v5  ;;  %2011 = vmatprep.mubr.msk.bf16.mxu1 %vm500_vm0, %v1959_v28  ;;  %v25_v5 = vld [vmem:[%s4346_s0 + $0x68] sm:$0xff]  ;;  %v56_v28 = vld [vmem:[%s4346_s0 + $0x160] sm:$0xff]  ;;  %v88_v24 = vmax.bf16 %v2307_v0, %v24_v40  ;;  %v121_v37 = vmax.bf16 %v2307_v0, %v57_v45 }
  0x3f   :  { %v89_v35 = vmax.bf16 %v2307_v0, %v25_v5  ;;  %v120_v36 = vmax.bf16 %v2307_v0, %v56_v28  ;;  %v4348_v0 = vcombine.high %v2526_v4, %v2532_v6 }
  0x41   :  { %v1931_v46 = vcombine.high %v88_v24, %v89_v35  ;;  %v1963_v58 = vcombine.high %v120_v36, %v121_v37 }
  0x45   :  { %662 = vmatmul.mubr.bf16.gmra.mrb[16].mxu0 %v1926_v59  ;;  %790 = vmatmul.mubr.bf16.gmra.mrb[16].mxu1 %v1958_v34  ;;  %v1930_v59 = vcombine.low %v88_v24, %v89_v35  ;;  %v1962_v34 = vcombine.low %v120_v36, %v121_v37 }
  0x46   :  { %1996 = vmatprep.mubr.msk.bf16.mxu0 %vm500_vm0, %v1929_v17  ;;  %2012 = vmatprep.mubr.msk.bf16.mxu1 %vm500_vm0, %v1961_v31 }
  0x4d   :  { %670 = vmatmul.mubr.bf16.gmra.mrb[20].mxu0 %v1928_v25  ;;  %798 = vmatmul.mubr.bf16.gmra.mrb[20].mxu1 %v1960_v44 }
  0x4e   :  { %1997 = vmatprep.mubr.msk.bf16.mxu0 %vm500_vm0, %v1931_v46  ;;  %2013 = vmatprep.mubr.msk.bf16.mxu1 %vm500_vm0, %v1963_v58  ;;  %v886_v46 = vlaneseq }
  0x55   :  { %678 = vmatmul.mubr.bf16.gmra.mrb[24].mxu0 %v1930_v59  ;;  %806 = vmatmul.mubr.bf16.gmra.mrb[24].mxu1 %v1962_v34 }
  0x56   :  { %1998 = vmatprep.mubr.msk.bf16.mxu0 %vm500_vm0, %v1933_v60  ;;  %2014 = vmatprep.mubr.msk.bf16.mxu1 %vm500_vm0, %v1965_v1  ;;  %v4349_v60 = vcombine.high %v2535_v7, %v2538_v10  ;;  %v4350_v1 = vcombine.low %v2526_v4, %v2532_v6  ;;  %v4357_v4 = vcombine.high %v2601_v55, %v2604_v56 }
  0x57   :  { %v4358_v6 = vcombine.low %v2595_v50, %v2598_v51  ;;  %v4359_v7 = vcombine.low %v2601_v55, %v2604_v56  ;;  %v4360_v10 = vcombine.high %v2607_v57, %v2610_v61  ;;  %v4367_v55 = vcombine.low %v2679_v9, %v2682_v11 }
  0x58   :  { %v4368_v56 = vcombine.high %v2691_v41, %v2694_v42  ;;  %v4369_v57 = vcombine.high %v2697_v43, %v2700_v62  ;;  %v4370_v61 = vcombine.low %v2691_v41, %v2694_v42 }
  0x5d   :  { %686 = vmatmul.mubr.bf16.gmra.mrb[28].mxu0 %v1932_v2  ;;  %814 = vmatmul.mubr.bf16.gmra.mrb[28].mxu1 %v1964_v3  ;;  %v4355_v2 = vcombine.low %v2547_v15, %v2550_v16  ;;  %v4356_v3 = vcombine.high %v2595_v50, %v2598_v51  ;;  %v4363_v15 = vcombine.low %v2623_v18, %v2626_v19 }
  0x5e   :  { %1999 = vmatprep.mubr.msk.bf16.mxu0 %vm500_vm0, %v4348_v0  ;;  %2015 = vmatprep.mubr.msk.bf16.mxu1 %vm500_vm0, %v4349_v60  ;;  %v4364_v16 = vcombine.high %v2665_v39, %v2676_v8  ;;  %v4365_v50 = vcombine.high %v2679_v9, %v2682_v11  ;;  %v4366_v51 = vcombine.low %v2665_v39, %v2676_v8 }
  0x5f   :  { %v4371_v18 = vcombine.low %v2697_v43, %v2700_v62  ;;  %v4372_v19 = vcombine.low %v2743_v26, %v2746_v38  ;;  %v4373_v39 = vcombine.high %v2755_v12, %v2758_v30  ;;  %v4374_v8 = vcombine.high %v2761_v63, %v2764_v27 }
  0x65   :  { %694 = vmatmul.mubr.bf16.gmra.mrb[32].mxu0 %v4350_v1  ;;  %822 = vmatmul.mubr.bf16.gmra.mrb[32].mxu1 %v4351_v47 }
  0x66   :  { %2000 = vmatprep.mubr.msk.bf16.mxu0 %vm500_vm0, %v4352_v48  ;;  %2016 = vmatprep.mubr.msk.bf16.mxu1 %vm500_vm0, %v4353_v49 }
  0x6d   :  { %702 = vmatmul.mubr.bf16.gmra.mrb[36].mxu0 %v4354_v54  ;;  %830 = vmatmul.mubr.bf16.gmra.mrb[36].mxu1 %v4355_v2 }
  0x6e   :  { %2001 = vmatprep.mubr.msk.bf16.mxu0 %vm500_vm0, %v4356_v3  ;;  %2017 = vmatprep.mubr.msk.bf16.mxu1 %vm500_vm0, %v4357_v4  ;;  %v3020_v4 = vand.u32 127, %v886_v46 }
  0x70   :  { %vm1784_vm1 = vcmp.eq.s32.totalorder %v3020_v4, 0 }
  0x75   :  { %710 = vmatmul.mubr.bf16.gmra.mrb[40].mxu0 %v4358_v6  ;;  %838 = vmatmul.mubr.bf16.gmra.mrb[40].mxu1 %v4359_v7 }
  0x76   :  { %2002 = vmatprep.mubr.msk.bf16.mxu0 %vm500_vm0, %v4360_v10  ;;  %2018 = vmatprep.mubr.msk.bf16.mxu1 %vm500_vm0, %v4361_v13 }
  0x7d   :  { %718 = vmatmul.mubr.bf16.gmra.mrb[44].mxu0 %v4362_v14  ;;  %846 = vmatmul.mubr.bf16.gmra.mrb[44].mxu1 %v4363_v15 }
  0x7e   :  { %2003 = vmatprep.mubr.msk.bf16.mxu0 %vm500_vm0, %v4364_v16  ;;  %2019 = vmatprep.mubr.msk.bf16.mxu1 %vm500_vm0, %v4365_v50 }
  0x85   :  { %726 = vmatmul.mubr.bf16.gmra.mrb[48].mxu0 %v4366_v51  ;;  %854 = vmatmul.mubr.bf16.gmra.mrb[48].mxu1 %v4367_v55 }
  0x86   :  { %2004 = vmatprep.mubr.msk.bf16.mxu0 %vm500_vm0, %v4368_v56  ;;  %2020 = vmatprep.mubr.msk.bf16.mxu1 %vm500_vm0, %v4369_v57 }
  0x8d   :  { %734 = vmatmul.mubr.bf16.gmra.mrb[52].mxu0 %v4370_v61  ;;  %862 = vmatmul.mubr.bf16.gmra.mrb[52].mxu1 %v4371_v18 }
  0x8e   :  { %2005 = vmatprep.mubr.msk.bf16.mxu0 %vm500_vm0, %v1947_v29  ;;  %2021 = vmatprep.mubr.msk.bf16.mxu1 %vm500_vm0, %v1979_v21  ;;  %v4375_v21 = vcombine.low %v2755_v12, %v2758_v30 }
  0x95   :  { %742 = vmatmul.mubr.bf16.gmra.mrb[56].mxu0 %v1946_v20  ;;  %870 = vmatmul.mubr.bf16.gmra.mrb[56].mxu1 %v4372_v19  ;;  %v4376_v20 = vcombine.low %v2761_v63, %v2764_v27 }
  0x96   :  { %2006 = vmatprep.mubr.msk.bf16.mxu0 %vm500_vm0, %v4373_v39  ;;  %2022 = vmatprep.mubr.msk.bf16.mxu1 %vm500_vm0, %v4374_v8 }
  0x9d   :  { %750 = vmatmul.mubr.bf16.gmra.mrb[60].mxu0 %v4375_v21  ;;  %878 = vmatmul.mubr.bf16.gmra.mrb[60].mxu1 %v4376_v20 }
  0xf8   :  { %v2988_v26 = vpop.f32.mrb[0].mxu0  ;;  %v2990_v32 = vpop.f32.mrb[0].mxu1 }
  0xf9   :  { %v952_v33 = vmin.f32 %v2988_v26, 20.0  ;;  %v984_v9 = vmin.f32 %v2990_v32, 20.0  ;;  %v633_v11 = vpop.f32.mrb[1].mxu0  ;;  %v761_v41 = vpop.f32.mrb[1].mxu1  ;;  %vm888_vm2 = vcmp.gt.f32.partialorder %v2988_v26, 20.0  ;;  %vm920_vm6 = vcmp.gt.f32.partialorder %v2990_v32, 20.0 }
  0xfa   :  { %v2994_v42 = vpop.f32.mrb[2].mxu0  ;;  %v2996_v43 = vpop.f32.mrb[2].mxu1 }
  0xfb   :  { %v1016_v62 = vmul.f32 1.442695, %v952_v33  ;;  %v1080_v38 = vmul.f32 1.442695, %v984_v9  ;;  %v953_v29 = vmin.f32 %v2994_v42, 20.0  ;;  %v985_v12 = vmin.f32 %v2996_v43, 20.0 }
  0xfc   :  { %v636_v30 = vpop.f32.mrb[3].mxu0  ;;  %v764_v63 = vpop.f32.mrb[3].mxu1  ;;  %vm889_vm8 = vcmp.gt.f32.partialorder %v2994_v42, 20.0  ;;  %vm921_vm10 = vcmp.gt.f32.partialorder %v2996_v43, 20.0 }
  0xfd   :  { %2051 = vpow2.f32 %v1016_v62  ;;  %v1018_v27 = vmul.f32 1.442695, %v953_v29  ;;  %v1082_v52 = vmul.f32 1.442695, %v985_v12 }
  0xfe   :  { %2053 = vpow2.f32 %v1080_v38 }
  0xff   :  { %2055 = vpow2.f32 %v1018_v27 }
 0x100   :  { %2057 = vpow2.f32 %v1082_v52  ;;  %v3000_v53 = vpop.f32.mrb[4].mxu0  ;;  %v3002_v22 = vpop.f32.mrb[4].mxu1 }
 0x101   :  { %v954_v23 = vmin.f32 %v3000_v53, 20.0  ;;  %v986_v17 = vmin.f32 %v3002_v22, 20.0  ;;  %v641_v31 = vpop.f32.mrb[5].mxu0  ;;  %v769_v40 = vpop.f32.mrb[5].mxu1  ;;  %vm890_vm12 = vcmp.gt.f32.partialorder %v3000_v53, 20.0  ;;  %vm922_vm14 = vcmp.gt.f32.partialorder %v3002_v22, 20.0 }
 0x102   :  { %v3006_v5 = vpop.f32.mrb[6].mxu0  ;;  %v3008_v28 = vpop.f32.mrb[6].mxu1 }
 0x103   :  { %v1020_v45 = vmul.f32 1.442695, %v954_v23  ;;  %v1084_v24 = vmul.f32 1.442695, %v986_v17  ;;  %v955_v35 = vmin.f32 %v3006_v5, 20.0  ;;  %v987_v36 = vmin.f32 %v3008_v28, 20.0 }
 0x104   :  { %v644_v37 = vpop.f32.mrb[7].mxu0  ;;  %v772_v25 = vpop.f32.mrb[7].mxu1  ;;  %vm891_vm15 = vcmp.gt.f32.partialorder %v3006_v5, 20.0 }
 0x105   :  { %2059 = vpow2.f32 %v1020_v45  ;;  %v1022_v44 = vmul.f32 1.442695, %v955_v35  ;;  %v1086_v58 = vmul.f32 1.442695, %v987_v36 }
 0x106   :  { %2061 = vpow2.f32 %v1084_v24 }
 0x107   :  { %v2052_v59 = vpop.eup %2051  ;;  %2063 = vpow2.f32 %v1022_v44 }
 0x108   :  { %v2054_v34 = vpop.eup %2053  ;;  %v1144_v0 = vadd.f32 1.0, %v2052_v59  ;;  %v1147_v60 = vmul.f32 -0.5, %v2052_v59  ;;  %2065 = vpow2.f32 %v1086_v58  ;;  %v3012_v1 = vpop.f32.mrb[8].mxu0  ;;  %v1150_v6 = vand.u32 2147483647, %v2052_v59 }
 0x109   :  { %v3014_v47 = vpop.f32.mrb[8].mxu1  ;;  %v3016_v48 = vpop.eup %2055  ;;  %v1432_v49 = vadd.f32 1.0, %v2054_v34  ;;  %v1435_v54 = vmul.f32 -0.5, %v2054_v34  ;;  %v1438_v15 = vand.u32 2147483647, %v2054_v34  ;;  %v956_v38 = vmin.f32 %v3012_v1, 20.0 }
 0x10a   :  { %v649_v2 = vpop.f32.mrb[9].mxu0  ;;  %v3018_v3 = vpop.eup %2057  ;;  %2067 = vlog2.f32 %v1144_v0  ;;  %v1153_v7 = vadd.f32 1.0, %v3016_v48  ;;  %v1148_v14 = vadd.f32 1.0, %v1147_v60  ;;  %v1156_v16 = vmul.f32 -0.5, %v3016_v48 }
 0x10b   :  { %v777_v10 = vpop.f32.mrb[9].mxu1  ;;  %v3023_v13 = vpop.f32.mrb[10].mxu0  ;;  %2069 = vlog2.f32 %v1432_v49  ;;  %v1159_v55 = vand.u32 2147483647, %v3016_v48  ;;  %v1441_v56 = vadd.f32 1.0, %v3018_v3  ;;  %v1436_v61 = vadd.f32 1.0, %v1435_v54 }
 0x10c   :  { %v3026_v50 = vpop.f32.mrb[10].mxu1  ;;  %v652_v51 = vpop.f32.mrb[11].mxu0  ;;  %2071 = vlog2.f32 %v1153_v7  ;;  %v1444_v18 = vmul.f32 -0.5, %v3018_v3  ;;  %v1447_v19 = vand.u32 2147483647, %v3018_v3  ;;  %v1149_v8 = vmul.f32 %v2052_v59, %v1148_v14 }
 0x10d   :  { %v780_v57 = vpop.f32.mrb[11].mxu1  ;;  %2073 = vlog2.f32 %v1441_v56  ;;  %vm3034_vm3 = vcmp.lt.f32.partialorder %v1150_v6, 0.0004427343  ;;  %vm3038_vm5 = vcmp.lt.f32.partialorder %v1438_v15, 0.0004427343  ;;  %v1157_v33 = vadd.f32 1.0, %v1156_v16 }
 0x10e   :  { %vm3043_vm7 = vcmp.lt.f32.partialorder %v1159_v55, 0.0004427343  ;;  %v1437_v12 = vmul.f32 %v2054_v34, %v1436_v61  ;;  %v1445_v30 = vadd.f32 1.0, %v1444_v18  ;;  %vm3057_vm9 = vcmp.lt.f32.partialorder %v1447_v19, 0.0004427343 }
 0x10f   :  { %v2060_v39 = vpop.eup %2059  ;;  %v1158_v34 = vmul.f32 %v3016_v48, %v1157_v33  ;;  %v1024_v60 = vmul.f32 1.442695, %v956_v38  ;;  %v988_v14 = vmin.f32 %v3014_v47, 20.0 }
 0x110   :  { %v2062_v9 = vpop.eup %2061  ;;  %v1162_v41 = vadd.f32 1.0, %v2060_v39  ;;  %v1165_v62 = vmul.f32 -0.5, %v2060_v39  ;;  %v3051_v52 = vpop.f32.mrb[12].mxu0  ;;  %v1168_v45 = vand.u32 2147483647, %v2060_v39  ;;  %v1446_v7 = vmul.f32 %v3018_v3, %v1445_v30 }
 0x111   :  { %v3048_v29 = vpop.eup %2063  ;;  %v1450_v63 = vadd.f32 1.0, %v2062_v9  ;;  %v1453_v27 = vmul.f32 -0.5, %v2062_v9  ;;  %v3053_v23 = vpop.f32.mrb[12].mxu1  ;;  %v1456_v25 = vand.u32 2147483647, %v2062_v9 }
 0x112   :  { %v3055_v17 = vpop.eup %2065  ;;  %2075 = vlog2.f32 %v1162_v41  ;;  %v1166_v40 = vadd.f32 1.0, %v1165_v62  ;;  %v1171_v24 = vadd.f32 1.0, %v3048_v29  ;;  %v657_v35 = vpop.f32.mrb[13].mxu0  ;;  %v1174_v44 = vmul.f32 -0.5, %v3048_v29 }
 0x113   :  { %v785_v36 = vpop.f32.mrb[13].mxu1  ;;  %2077 = vlog2.f32 %v1450_v63  ;;  %v1454_v37 = vadd.f32 1.0, %v1453_v27  ;;  %v3064_v46 = vpop.f32.mrb[14].mxu0  ;;  %v1459_v0 = vadd.f32 1.0, %v3055_v17  ;;  %vm3074_vm11 = vcmp.lt.f32.partialorder %v1168_v45, 0.0004427343 }
 0x114   :  { %v3066_v58 = vpop.f32.mrb[14].mxu1  ;;  %v2068_v59 = vpop.eup %2067  ;;  %2079 = vlog2.f32 %v1171_v24  ;;  %v3071_v10 = vmul.f32 %v2060_v39, %v1166_v40  ;;  %v1177_v48 = vand.u32 2147483647, %v3048_v29  ;;  %v1462_v55 = vmul.f32 -0.5, %v3055_v17 }
 0x115   :  { %v660_v49 = vpop.f32.mrb[15].mxu0  ;;  %v788_v54 = vpop.f32.mrb[15].mxu1  ;;  %v1146_v6 = vmul.f32 0.6931472, %v2068_v59  ;;  %2081 = vlog2.f32 %v1459_v0  ;;  %v3083_v3 = vmul.f32 %v2062_v9, %v1454_v37  ;;  %vm3085_vm13 = vcmp.lt.f32.partialorder %v1456_v25, 0.0004427343 }
 0x116   :  { %v2070_v2 = vpop.eup %2069  ;;  %v1175_v18 = vadd.f32 1.0, %v1174_v44  ;;  %2083 = vpow2.f32 %v1024_v60  ;;  %v1463_v11 = vadd.f32 1.0, %v1462_v55  ;;  %v1088_v27 = vmul.f32 1.442695, %v988_v14 }
 0x117   :  { %v2072_v15 = vpop.eup %2071  ;;  %v1434_v16 = vmul.f32 0.6931472, %v2070_v2  ;;  %v1152_v56 = vsel %vm3034_vm3, %v1149_v8, %v1146_v6  ;;  %v1465_v8 = vand.u32 2147483647, %v3055_v17  ;;  %vm3132_vm0 = vcmp.lt.f32.partialorder %v1177_v48, 0.0004427343 }
 0x118   :  { %v1155_v57 = vmul.f32 0.6931472, %v2072_v15  ;;  %v2074_v19 = vpop.eup %2073  ;;  %v1720_v39 = vsel %vm888_vm2, %v2988_v26, %v1152_v56  ;;  %v3096_v21 = vpop.f32.mrb[16].mxu0  ;;  %v957_v36 = vmin.f32 %v3023_v13, 20.0  ;;  %v1176_v31 = vmul.f32 %v3048_v29, %v1175_v18 }
 0x119   :  { %v1440_v33 = vsel %vm3038_vm5, %v1437_v12, %v1434_v16  ;;  %v3098_v9 = vpop.f32.mrb[16].mxu1  ;;  %v1785_v41 = vsel %vm1784_vm1, %v1720_v39, %v2988_v26  ;;  %v1443_v38 = vmul.f32 0.6931472, %v2074_v19  ;;  %v665_v12 = vpop.f32.mrb[17].mxu0  ;;  %2085 = vpow2.f32 %v1088_v27 }
 0x11a   :  { %v1752_v62 = vsel %vm920_vm6, %v2990_v32, %v1440_v33  ;;  %v1161_v20 = vsel %vm3043_vm7, %v1158_v34, %v1155_v57  ;;  %v793_v30 = vpop.f32.mrb[17].mxu1  ;;  %1850 = vst.msk [vmem:[%s4347_s2] sm:$0xff] %vm1849_vm4, %v1785_v41  ;;  %v3119_v40 = vpop.f32.mrb[18].mxu0  ;;  %v989_v59 = vmin.f32 %v3026_v50, 20.0  ;;  %vm3149_vm2 = vcmp.lt.f32.partialorder %v1465_v8, 0.0004427343 }
 0x11b   :  { %v1817_v26 = vsel %vm1784_vm1, %v1752_v62, %v2990_v32  ;;  %v1721_v63 = vsel %vm889_vm8, %v2994_v42, %v1161_v20  ;;  %v3121_v45 = vpop.f32.mrb[18].mxu1  ;;  %v1449_v32 = vsel %vm3057_vm9, %v1446_v7, %v1443_v38  ;;  %v668_v37 = vpop.f32.mrb[19].mxu0  ;;  %v1026_v54 = vmul.f32 1.442695, %v957_v36 }
 0x11c   :  { %1882 = vst.msk [vmem:[%s4347_s2 + $0x100] sm:$0xff] %vm1849_vm4, %v1817_v26  ;;  %v1786_v24 = vsel %vm1784_vm1, %v1721_v63, %v2994_v42  ;;  %v796_v25 = vpop.f32.mrb[19].mxu1  ;;  %v2076_v44 = vpop.eup %2075  ;;  %v1753_v42 = vsel %vm921_vm10, %v2996_v43, %v1449_v32  ;;  %v1464_v6 = vmul.f32 %v3055_v17, %v1463_v11  ;;  %v1090_v7 = vmul.f32 1.442695, %v989_v59 }
 0x11d   :  { %1851 = vst.msk [vmem:[%s4347_s2 + $0x8] sm:$0xff] %vm1849_vm4, %v1786_v24  ;;  %v2078_v34 = vpop.eup %2077  ;;  %v1818_v0 = vsel %vm1784_vm1, %v1753_v42, %v2996_v43  ;;  %v1164_v60 = vmul.f32 0.6931472, %v2076_v44  ;;  %v958_v14 = vmin.f32 %v3051_v52, 20.0  ;;  %2087 = vpow2.f32 %v1026_v54 }
 0x11e   :  { %v2080_v2 = vpop.eup %2079  ;;  %1883 = vst.msk [vmem:[%s4347_s2 + $0x108] sm:$0xff] %vm1849_vm4, %v1818_v0  ;;  %v1452_v29 = vmul.f32 0.6931472, %v2078_v34  ;;  %v990_v16 = vmin.f32 %v3053_v23, 20.0  ;;  %2089 = vpow2.f32 %v1090_v7  ;;  %vm923_vm3 = vcmp.gt.f32.partialorder %v3008_v28, 20.0 }
 0x11f   :  { %v1170_v43 = vsel %vm3074_vm11, %v3071_v10, %v1164_v60  ;;  %v1173_v15 = vmul.f32 0.6931472, %v2080_v2  ;;  %v2082_v48 = vpop.eup %2081  ;;  %v1028_v56 = vmul.f32 1.442695, %v958_v14  ;;  %v959_v27 = vmin.f32 %v3064_v46, 20.0 }
 0x120   :  { %v1722_v55 = vsel %vm890_vm12, %v3000_v53, %v1170_v43  ;;  %v1458_v17 = vsel %vm3085_vm13, %v3083_v3, %v1452_v29  ;;  %v3169_v57 = vpop.f32.mrb[20].mxu0  ;;  %v3171_v18 = vpop.f32.mrb[20].mxu1  ;;  %v1461_v39 = vmul.f32 0.6931472, %v2082_v48  ;;  %v1092_v41 = vmul.f32 1.442695, %v990_v16 }
 0x121   :  { %v1787_v10 = vsel %vm1784_vm1, %v1722_v55, %v3000_v53  ;;  %v1754_v51 = vsel %vm922_vm14, %v3002_v22, %v1458_v17  ;;  %v1179_v19 = vsel %vm3132_vm0, %v1176_v31, %v1173_v15  ;;  %v673_v61 = vpop.f32.mrb[21].mxu0  ;;  %v801_v3 = vpop.f32.mrb[21].mxu1  ;;  %2091 = vpow2.f32 %v1028_v56 }
 0x122   :  { %v2084_v33 = vpop.eup %2083  ;;  %1852 = vst.msk [vmem:[%s4347_s2 + $0x10] sm:$0xff] %vm1849_vm4, %v1787_v10  ;;  %v1819_v53 = vsel %vm1784_vm1, %v1754_v51, %v3002_v22  ;;  %v1723_v8 = vsel %vm891_vm15, %v3006_v5, %v1179_v19  ;;  %v3191_v62 = vpop.f32.mrb[22].mxu0  ;;  %v1467_v22 = vsel %vm3149_vm2, %v1464_v6, %v1461_v39  ;;  %2093 = vpow2.f32 %v1092_v41 }
 0x123   :  { %v3193_v20 = vpop.f32.mrb[22].mxu1  ;;  %1884 = vst.msk [vmem:[%s4347_s2 + $0x110] sm:$0xff] %vm1849_vm4, %v1819_v53  ;;  %v1788_v38 = vsel %vm1784_vm1, %v1723_v8, %v3006_v5  ;;  %v1180_v12 = vadd.f32 1.0, %v2084_v33  ;;  %v676_v30 = vpop.f32.mrb[23].mxu0  ;;  %v1755_v63 = vsel %vm923_vm3, %v3008_v28, %v1467_v22  ;;  %v1183_v11 = vmul.f32 -0.5, %v2084_v33 }
 0x124   :  { %v804_v26 = vpop.f32.mrb[23].mxu1  ;;  %1853 = vst.msk [vmem:[%s4347_s2 + $0x18] sm:$0xff] %vm1849_vm4, %v1788_v38  ;;  %v1820_v5 = vsel %vm1784_vm1, %v1755_v63, %v3008_v28  ;;  %v2086_v24 = vpop.eup %2085  ;;  %v991_v32 = vmin.f32 %v3066_v58, 20.0  ;;  %v1186_v36 = vand.u32 2147483647, %v2084_v33  ;;  %v960_v25 = vmin.f32 %v3096_v21, 20.0 }
 0x125   :  { %2095 = vlog2.f32 %v1180_v12  ;;  %1885 = vst.msk [vmem:[%s4347_s2 + $0x118] sm:$0xff] %vm1849_vm4, %v1820_v5  ;;  %v1468_v35 = vadd.f32 1.0, %v2086_v24  ;;  %v1030_v37 = vmul.f32 1.442695, %v959_v27  ;;  %v1184_v28 = vadd.f32 1.0, %v1183_v11 }
 0x126   :  { %v1471_v34 = vmul.f32 -0.5, %v2086_v24  ;;  %v1094_v60 = vmul.f32 1.442695, %v991_v32  ;;  %v1474_v2 = vand.u32 2147483647, %v2086_v24  ;;  %vm892_vm5 = vcmp.gt.f32.partialorder %v3012_v1, 20.0 }
 0x127   :  { %v3220_v44 = vpop.eup %2087  ;;  %2097 = vlog2.f32 %v1468_v35  ;;  %vm3237_vm6 = vcmp.lt.f32.partialorder %v1186_v36, 0.0004427343  ;;  %v1032_v15 = vmul.f32 1.442695, %v960_v25  ;;  %v992_v17 = vmin.f32 %v3098_v9, 20.0 }
 0x128   :  { %v3222_v42 = vpop.f32.mrb[24].mxu0  ;;  %v3224_v31 = vpop.f32.mrb[24].mxu1  ;;  %v1189_v0 = vadd.f32 1.0, %v3220_v44  ;;  %2099 = vpow2.f32 %v1030_v37  ;;  %v1192_v48 = vmul.f32 -0.5, %v3220_v44  ;;  %v1185_v51 = vmul.f32 %v2084_v33, %v1184_v28 }
 0x129   :  { %v3226_v59 = vpop.eup %2089  ;;  %v681_v49 = vpop.f32.mrb[25].mxu0  ;;  %vm924_vm7 = vcmp.gt.f32.partialorder %v3014_v47, 20.0  ;;  %v1472_v19 = vadd.f32 1.0, %v1471_v34  ;;  %vm3248_vm8 = vcmp.lt.f32.partialorder %v1474_v2, 0.0004427343  ;;  %vm893_vm9 = vcmp.gt.f32.partialorder %v3023_v13, 20.0 }
 0x12a   :  { %v809_v54 = vpop.f32.mrb[25].mxu1  ;;  %v1477_v29 = vadd.f32 1.0, %v3226_v59  ;;  %v3230_v6 = vpop.f32.mrb[26].mxu0  ;;  %2101 = vlog2.f32 %v1189_v0  ;;  %v1480_v39 = vmul.f32 -0.5, %v3226_v59  ;;  %v1195_v38 = vand.u32 2147483647, %v3220_v44 }
 0x12b   :  { %v3232_v7 = vpop.f32.mrb[26].mxu1  ;;  %v3234_v14 = vpop.eup %2091  ;;  %v1193_v12 = vadd.f32 1.0, %v1192_v48  ;;  %v1483_v30 = vand.u32 2147483647, %v3226_v59  ;;  %v1096_v26 = vmul.f32 1.442695, %v992_v17  ;;  %v1473_v11 = vmul.f32 %v2086_v24, %v1472_v19 }
 0x12c   :  { %v684_v16 = vpop.f32.mrb[27].mxu0  ;;  %2103 = vlog2.f32 %v1477_v29  ;;  %v1198_v55 = vadd.f32 1.0, %v3234_v14  ;;  %v812_v56 = vpop.f32.mrb[27].mxu1  ;;  %v1201_v53 = vmul.f32 -0.5, %v3234_v14  ;;  %vm925_vm10 = vcmp.gt.f32.partialorder %v3026_v50, 20.0 }
 0x12d   :  { %v3244_v10 = vpop.eup %2093  ;;  %2105 = vpow2.f32 %v1094_v60  ;;  %v1481_v27 = vadd.f32 1.0, %v1480_v39  ;;  %v961_v32 = vmin.f32 %v3119_v40, 20.0  ;;  %v1204_v34 = vand.u32 2147483647, %v3234_v14 }
 0x12e   :  { %2107 = vlog2.f32 %v1198_v55  ;;  %v1486_v8 = vadd.f32 1.0, %v3244_v10  ;;  %v1489_v33 = vmul.f32 -0.5, %v3244_v10  ;;  %v1202_v28 = vadd.f32 1.0, %v1201_v53 }
 0x12f   :  { %v2096_v61 = vpop.eup %2095  ;;  %2109 = vpow2.f32 %v1032_v15  ;;  %vm894_vm11 = vcmp.gt.f32.partialorder %v3051_v52, 20.0  ;;  %v1034_v29 = vmul.f32 1.442695, %v961_v32  ;;  %v1194_v15 = vmul.f32 %v3220_v44, %v1193_v12 }
 0x130   :  { %v1182_v41 = vmul.f32 0.6931472, %v2096_v61  ;;  %v3256_v22 = vpop.f32.mrb[28].mxu0  ;;  %2111 = vlog2.f32 %v1486_v8  ;;  %v3260_v63 = vpop.f32.mrb[28].mxu1  ;;  %v1490_v2 = vadd.f32 1.0, %v1489_v33  ;;  %vm926_vm14 = vcmp.gt.f32.partialorder %v3053_v23, 20.0 }
 0x131   :  { %v689_v35 = vpop.f32.mrb[29].mxu0  ;;  %v817_v36 = vpop.f32.mrb[29].mxu1  ;;  %2113 = vpow2.f32 %v1096_v26  ;;  %vm3285_vm12 = vcmp.lt.f32.partialorder %v1195_v38, 0.0004427343  ;;  %vm3289_vm13 = vcmp.lt.f32.partialorder %v1483_v30, 0.0004427343 }
 0x132   :  { %v1188_v5 = vsel %vm3237_vm6, %v1185_v51, %v1182_v41  ;;  %v2098_v37 = vpop.eup %2097  ;;  %v3270_v0 = vpop.f32.mrb[30].mxu0  ;;  %v1482_v51 = vmul.f32 %v3226_v59, %v1481_v27  ;;  %v1492_v44 = vand.u32 2147483647, %v3244_v10  ;;  %2115 = vpow2.f32 %v1034_v29 }
 0x133   :  { %v1724_v25 = vsel %vm892_vm5, %v3012_v1, %v1188_v5  ;;  %v3272_v60 = vpop.f32.mrb[30].mxu1  ;;  %v3274_v24 = vpop.eup %2099  ;;  %v1470_v54 = vmul.f32 0.6931472, %v2098_v37  ;;  %vm3302_vm15 = vcmp.lt.f32.partialorder %v1204_v34, 0.0004427343  ;;  %v1203_v41 = vmul.f32 %v3234_v14, %v1202_v28 }
 0x134   :  { %v1789_v49 = vsel %vm1784_vm1, %v1724_v25, %v3012_v1  ;;  %v692_v43 = vpop.f32.mrb[31].mxu0  ;;  %v1207_v1 = vadd.f32 1.0, %v3274_v24  ;;  %v820_v55 = vpop.f32.mrb[31].mxu1  ;;  %v1491_v38 = vmul.f32 %v3244_v10, %v1490_v2  ;;  %v1210_v30 = vmul.f32 -0.5, %v3274_v24 }
 0x135   :  { %1854 = vst.msk [vmem:[%s4347_s2 + $0x20] sm:$0xff] %vm1849_vm4, %v1789_v49  ;;  %v2102_v17 = vpop.eup %2101  ;;  %v1476_v56 = vsel %vm3248_vm8, %v1473_v11, %v1470_v54  ;;  %vm3333_vm0 = vcmp.lt.f32.partialorder %v1492_v44, 0.0004427343  ;;  %v1213_v49 = vand.u32 2147483647, %v3274_v24  ;;  %vm895_vm3 = vcmp.gt.f32.partialorder %v3064_v46, 20.0 }
 0x136   :  { %v2104_v19 = vpop.eup %2103  ;;  %v1756_v39 = vsel %vm924_vm7, %v3014_v47, %v1476_v56  ;;  %v1191_v61 = vmul.f32 0.6931472, %v2102_v17  ;;  %2117 = vlog2.f32 %v1207_v1  ;;  %vm927_vm6 = vcmp.gt.f32.partialorder %v3066_v58, 20.0 }
 0x137   :  { %v3306_v3 = vpop.eup %2105  ;;  %v1821_v59 = vsel %vm1784_vm1, %v1756_v39, %v3014_v47  ;;  %v1479_v8 = vmul.f32 0.6931472, %v2104_v19  ;;  %v993_v47 = vmin.f32 %v3121_v45, 20.0  ;;  %vm3382_vm2 = vcmp.lt.f32.partialorder %v1213_v49, 0.0004427343 }
 0x138   :  { %v2108_v33 = vpop.eup %2107  ;;  %1886 = vst.msk [vmem:[%s4347_s2 + $0x120] sm:$0xff] %vm1849_vm4, %v1821_v59  ;;  %v1197_v12 = vsel %vm3285_vm12, %v1194_v15, %v1191_v61  ;;  %v1495_v26 = vadd.f32 1.0, %v3306_v3  ;;  %v3322_v5 = vpop.f32.mrb[32].mxu0  ;;  %v1498_v15 = vmul.f32 -0.5, %v3306_v3  ;;  %v1501_v19 = vand.u32 2147483647, %v3306_v3 }
 0x139   :  { %v3324_v14 = vpop.f32.mrb[32].mxu1  ;;  %v3326_v10 = vpop.eup %2109  ;;  %v1725_v11 = vsel %vm893_vm9, %v3023_v13, %v1197_v12  ;;  %v1485_v27 = vsel %vm3289_vm13, %v1482_v51, %v1479_v8  ;;  %v1200_v32 = vmul.f32 0.6931472, %v2108_v33  ;;  %v1098_v56 = vmul.f32 1.442695, %v993_v47 }
 0x13a   :  { %v697_v36 = vpop.f32.mrb[33].mxu0  ;;  %v825_v37 = vpop.f32.mrb[33].mxu1  ;;  %v1790_v28 = vsel %vm1784_vm1, %v1725_v11, %v3023_v13  ;;  %v1757_v34 = vsel %vm925_vm10, %v3026_v50, %v1485_v27  ;;  %2119 = vlog2.f32 %v1495_v26  ;;  %v1216_v17 = vadd.f32 1.0, %v3326_v10 }
 0x13b   :  { %v2112_v25 = vpop.eup %2111  ;;  %v3344_v54 = vpop.f32.mrb[34].mxu0  ;;  %1855 = vst.msk [vmem:[%s4347_s2 + $0x28] sm:$0xff] %vm1849_vm4, %v1790_v28  ;;  %v1822_v13 = vsel %vm1784_vm1, %v1757_v34, %v3026_v50  ;;  %v1206_v29 = vsel %vm3302_vm15, %v1203_v41, %v1200_v32  ;;  %v1211_v50 = vadd.f32 1.0, %v1210_v30  ;;  %v1499_v41 = vadd.f32 1.0, %v1498_v15 }
 0x13c   :  { %v3346_v2 = vpop.f32.mrb[34].mxu1  ;;  %v1488_v43 = vmul.f32 0.6931472, %v2112_v25  ;;  %v700_v16 = vpop.f32.mrb[35].mxu0  ;;  %1887 = vst.msk [vmem:[%s4347_s2 + $0x128] sm:$0xff] %vm1849_vm4, %v1822_v13  ;;  %v1726_v55 = vsel %vm894_vm11, %v3051_v52, %v1206_v29  ;;  %2121 = vlog2.f32 %v1216_v17  ;;  %vm896_vm7 = vcmp.gt.f32.partialorder %v3096_v21, 20.0 }
 0x13d   :  { %v828_v48 = vpop.f32.mrb[35].mxu1  ;;  %v3358_v1 = vpop.eup %2113  ;;  %v1791_v51 = vsel %vm1784_vm1, %v1726_v55, %v3051_v52  ;;  %v962_v52 = vmin.f32 %v3169_v57, 20.0  ;;  %v1222_v26 = vand.u32 2147483647, %v3326_v10  ;;  %v1212_v32 = vmul.f32 %v3274_v24, %v1211_v50 }
 0x13e   :  { %v1494_v44 = vsel %vm3333_vm0, %v1491_v38, %v1488_v43  ;;  %v1504_v39 = vadd.f32 1.0, %v3358_v1  ;;  %1856 = vst.msk [vmem:[%s4347_s2 + $0x30] sm:$0xff] %vm1849_vm4, %v1791_v51  ;;  %v3387_v59 = vpop.eup %2115  ;;  %v1219_v38 = vmul.f32 -0.5, %v3326_v10  ;;  %vm3405_vm5 = vcmp.lt.f32.partialorder %v1501_v19, 0.0004427343 }
 0x13f   :  { %v1758_v61 = vsel %vm926_vm14, %v3053_v23, %v1494_v44  ;;  %v1507_v36 = vmul.f32 -0.5, %v3358_v1  ;;  %v1036_v37 = vmul.f32 1.442695, %v962_v52  ;;  %v1500_v24 = vmul.f32 %v3306_v3, %v1499_v41 }
 0x140   :  { %v1823_v8 = vsel %vm1784_vm1, %v1758_v61, %v3053_v23  ;;  %2123 = vlog2.f32 %v1504_v39  ;;  %v3393_v33 = vpop.f32.mrb[36].mxu0  ;;  %v3395_v12 = vpop.f32.mrb[36].mxu1  ;;  %v1225_v23 = vadd.f32 1.0, %v3387_v59  ;;  %v1220_v49 = vadd.f32 1.0, %v1219_v38 }
 0x141   :  { %v2118_v30 = vpop.eup %2117  ;;  %1888 = vst.msk [vmem:[%s4347_s2 + $0x130] sm:$0xff] %vm1849_vm4, %v1823_v8  ;;  %v705_v47 = vpop.f32.mrb[37].mxu0  ;;  %2125 = vpow2.f32 %v1098_v56  ;;  %v994_v13 = vmin.f32 %v3171_v18, 20.0  ;;  %vm3423_vm8 = vcmp.lt.f32.partialorder %v1222_v26, 0.0004427343  ;;  %vm928_vm9 = vcmp.gt.f32.partialorder %v3098_v9, 20.0 }
 0x142   :  { %v833_v11 = vpop.f32.mrb[37].mxu1  ;;  %v1209_v27 = vmul.f32 0.6931472, %v2118_v30  ;;  %2127 = vlog2.f32 %v1225_v23  ;;  %v3411_v25 = vpop.f32.mrb[38].mxu0  ;;  %v1228_v3 = vmul.f32 -0.5, %v3387_v59  ;;  %v963_v56 = vmin.f32 %v3191_v62, 20.0 }
 0x143   :  { %v3413_v28 = vpop.f32.mrb[38].mxu1  ;;  %v708_v29 = vpop.f32.mrb[39].mxu0  ;;  %2129 = vpow2.f32 %v1036_v37  ;;  %v1100_v17 = vmul.f32 1.442695, %v994_v13  ;;  %v1508_v51 = vadd.f32 1.0, %v1507_v36  ;;  %v995_v19 = vmin.f32 %v3193_v20, 20.0 }
 0x144   :  { %v1215_v34 = vsel %vm3382_vm2, %v1212_v32, %v1209_v27  ;;  %v836_v43 = vpop.f32.mrb[39].mxu1  ;;  %v2120_v15 = vpop.eup %2119  ;;  %v1510_v44 = vand.u32 2147483647, %v3358_v1  ;;  %v964_v39 = vmin.f32 %v3222_v42, 20.0  ;;  %v1038_v53 = vmul.f32 1.442695, %v963_v56 }
 0x145   :  { %v1727_v16 = vsel %vm895_vm3, %v3064_v46, %v1215_v34  ;;  %v1497_v50 = vmul.f32 0.6931472, %v2120_v15  ;;  %2131 = vpow2.f32 %v1100_v17  ;;  %v1102_v30 = vmul.f32 1.442695, %v995_v19 }
 0x146   :  { %v1792_v55 = vsel %vm1784_vm1, %v1727_v16, %v3064_v46  ;;  %v1221_v46 = vmul.f32 %v3326_v10, %v1220_v49  ;;  %v2122_v41 = vpop.eup %2121  ;;  %v1040_v26 = vmul.f32 1.442695, %v964_v39  ;;  %v996_v23 = vmin.f32 %v3224_v31, 20.0 }
 0x147   :  { %1857 = vst.msk [vmem:[%s4347_s2 + $0x38] sm:$0xff] %vm1849_vm4, %v1792_v55  ;;  %v1503_v61 = vsel %vm3405_vm5, %v1500_v24, %v1497_v50  ;;  %v1218_v27 = vmul.f32 0.6931472, %v2122_v41  ;;  %v1229_v32 = vadd.f32 1.0, %v1228_v3  ;;  %2133 = vpow2.f32 %v1038_v53 }
 0x148   :  { %v3443_v52 = vpop.f32.mrb[40].mxu0  ;;  %v3445_v8 = vpop.f32.mrb[40].mxu1  ;;  %v1759_v38 = vsel %vm927_vm6, %v3066_v58, %v1503_v61  ;;  %v1509_v34 = vmul.f32 %v3358_v1, %v1508_v51  ;;  %v1231_v24 = vand.u32 2147483647, %v3387_v59  ;;  %2135 = vpow2.f32 %v1102_v30 }
 0x149   :  { %v713_v47 = vpop.f32.mrb[41].mxu0  ;;  %v1824_v10 = vsel %vm1784_vm1, %v1759_v38, %v3066_v58  ;;  %v841_v35 = vpop.f32.mrb[41].mxu1  ;;  %v1224_v13 = vsel %vm3423_vm8, %v1221_v46, %v1218_v27  ;;  %vm1511_vm10 = vcmp.lt.f32.partialorder %v1510_v44, 0.0004427343  ;;  %2137 = vpow2.f32 %v1040_v26 }
 0x14a   :  { %v2124_v11 = vpop.eup %2123  ;;  %v3454_v36 = vpop.f32.mrb[42].mxu0  ;;  %1889 = vst.msk [vmem:[%s4347_s2 + $0x138] sm:$0xff] %vm1849_vm4, %v1824_v10  ;;  %v965_v29 = vmin.f32 %v3230_v6, 20.0  ;;  %v1728_v1 = vsel %vm896_vm7, %v3096_v21, %v1224_v13  ;;  %v1104_v50 = vmul.f32 1.442695, %v996_v23  ;;  %v1230_v51 = vmul.f32 %v3387_v59, %v1229_v32 }
 0x14b   :  { %v1506_v37 = vmul.f32 0.6931472, %v2124_v11  ;;  %v3462_v49 = vpop.f32.mrb[42].mxu1  ;;  %v3464_v58 = vpop.eup %2125  ;;  %v1793_v48 = vsel %vm1784_vm1, %v1728_v1, %v3096_v21  ;;  %vm1232_vm11 = vcmp.lt.f32.partialorder %v1231_v24, 0.0004427343  ;;  %vm897_vm12 = vcmp.gt.f32.partialorder %v3119_v40, 20.0 }
 0x14c   :  { %v716_v43 = vpop.f32.mrb[43].mxu0  ;;  %v844_v15 = vpop.f32.mrb[43].mxu1  ;;  %v1513_v55 = vadd.f32 1.0, %v3464_v58  ;;  %1858 = vst.msk [vmem:[%s4347_s2 + $0x40] sm:$0xff] %vm1849_vm4, %v1793_v48  ;;  %v1042_v39 = vmul.f32 1.442695, %v965_v29 }
 0x14d   :  { %v2128_v16 = vpop.eup %2127  ;;  %v1512_v3 = vsel %vm1511_vm10, %v1509_v34, %v1506_v37  ;;  %v997_v47 = vmin.f32 %v3232_v7, 20.0  ;;  %vm929_vm13 = vcmp.gt.f32.partialorder %v3121_v45, 20.0  ;;  %vm898_vm14 = vcmp.gt.f32.partialorder %v3169_v57, 20.0 }
 0x14e   :  { %v1760_v17 = vsel %vm928_vm9, %v3098_v9, %v1512_v3  ;;  %v1227_v56 = vmul.f32 0.6931472, %v2128_v16  ;;  %v2130_v44 = vpop.eup %2129  ;;  %2139 = vlog2.f32 %v1513_v55  ;;  %vm930_vm2 = vcmp.gt.f32.partialorder %v3171_v18, 20.0 }
 0x14f   :  { %v1825_v19 = vsel %vm1784_vm1, %v1760_v17, %v3098_v9  ;;  %v1234_v59 = vadd.f32 1.0, %v2130_v44  ;;  %v1516_v9 = vmul.f32 -0.5, %v3464_v58  ;;  %2141 = vpow2.f32 %v1104_v50  ;;  %v2132_v30 = vpop.eup %2131 }
 0x150   :  { %1890 = vst.msk [vmem:[%s4347_s2 + $0x140] sm:$0xff] %vm1849_vm4, %v1825_v19  ;;  %v1233_v21 = vsel %vm1232_vm11, %v1230_v51, %v1227_v56  ;;  %v3492_v61 = vpop.f32.mrb[44].mxu0  ;;  %v3494_v46 = vpop.f32.mrb[44].mxu1  ;;  %v1237_v23 = vmul.f32 -0.5, %v2130_v44  ;;  %v1522_v27 = vadd.f32 1.0, %v2132_v30  ;;  %v1525_v32 = vmul.f32 -0.5, %v2132_v30 }
 0x151   :  { %v1729_v53 = vsel %vm897_vm12, %v3119_v40, %v1233_v21  ;;  %v721_v41 = vpop.f32.mrb[45].mxu0  ;;  %v849_v38 = vpop.f32.mrb[45].mxu1  ;;  %2143 = vlog2.f32 %v1234_v59  ;;  %v1517_v13 = vadd.f32 1.0, %v1516_v9  ;;  %v1240_v29 = vand.u32 2147483647, %v2130_v44 }
 0x152   :  { %v1794_v26 = vsel %vm1784_vm1, %v1729_v53, %v3119_v40  ;;  %v3502_v11 = vpop.f32.mrb[46].mxu0  ;;  %v3504_v10 = vpop.f32.mrb[46].mxu1  ;;  %v1519_v40 = vand.u32 2147483647, %v3464_v58  ;;  %2145 = vpow2.f32 %v1042_v39  ;;  %v1238_v16 = vadd.f32 1.0, %v1237_v23 }
 0x153   :  { %1859 = vst.msk [vmem:[%s4347_s2 + $0x48] sm:$0xff] %vm1849_vm4, %v1794_v26  ;;  %v3510_v35 = vpop.eup %2133  ;;  %v724_v37 = vpop.f32.mrb[47].mxu0  ;;  %2147 = vlog2.f32 %v1522_v27  ;;  %v1528_v1 = vand.u32 2147483647, %v2132_v30  ;;  %v1526_v50 = vadd.f32 1.0, %v1525_v32  ;;  %v966_v17 = vmin.f32 %v3256_v22, 20.0 }
 0x154   :  { %v852_v34 = vpop.f32.mrb[47].mxu1  ;;  %v3514_v24 = vpop.eup %2135  ;;  %v1243_v43 = vadd.f32 1.0, %v3510_v35  ;;  %v1106_v55 = vmul.f32 1.442695, %v997_v47  ;;  %vm3523_vm15 = vcmp.lt.f32.partialorder %v1519_v40, 0.0004427343  ;;  %v1518_v53 = vmul.f32 %v3464_v58, %v1517_v13 }
 0x155   :  { %v3517_v15 = vpop.eup %2137  ;;  %v1531_v3 = vadd.f32 1.0, %v3514_v24  ;;  %v1246_v51 = vmul.f32 -0.5, %v3510_v35  ;;  %v1534_v19 = vmul.f32 -0.5, %v3514_v24  ;;  %vm3534_vm0 = vcmp.lt.f32.partialorder %v1240_v29, 0.0004427343 }
 0x156   :  { %2149 = vlog2.f32 %v1243_v43  ;;  %v1252_v48 = vadd.f32 1.0, %v3517_v15  ;;  %v1249_v41 = vand.u32 2147483647, %v3510_v35  ;;  %v1239_v23 = vmul.f32 %v2130_v44, %v1238_v16 }
 0x157   :  { %2151 = vlog2.f32 %v1531_v3  ;;  %v1255_v47 = vmul.f32 -0.5, %v3517_v15  ;;  %v1527_v58 = vmul.f32 %v2132_v30, %v1526_v50  ;;  %vm3545_vm3 = vcmp.lt.f32.partialorder %v1528_v1, 0.0004427343 }
 0x158   :  { %v3529_v21 = vpop.f32.mrb[48].mxu0  ;;  %v3531_v59 = vpop.f32.mrb[48].mxu1  ;;  %2153 = vlog2.f32 %v1252_v48  ;;  %v1537_v34 = vand.u32 2147483647, %v3514_v24  ;;  %v1044_v13 = vmul.f32 1.442695, %v966_v17 }
 0x159   :  { %v2140_v39 = vpop.eup %2139  ;;  %v729_v38 = vpop.f32.mrb[49].mxu0  ;;  %2155 = vpow2.f32 %v1106_v55  ;;  %vm899_vm5 = vcmp.gt.f32.partialorder %v3191_v62, 20.0  ;;  %v1247_v43 = vadd.f32 1.0, %v1246_v51  ;;  %v1535_v16 = vadd.f32 1.0, %v1534_v19 }
 0x15a   :  { %v1515_v26 = vmul.f32 0.6931472, %v2140_v39  ;;  %v857_v27 = vpop.f32.mrb[49].mxu1  ;;  %v3541_v32 = vpop.f32.mrb[50].mxu0  ;;  %vm931_vm6 = vcmp.gt.f32.partialorder %v3193_v20, 20.0  ;;  %2157 = vpow2.f32 %v1044_v13  ;;  %vm900_vm8 = vcmp.gt.f32.partialorder %v3222_v42, 20.0 }
 0x15b   :  { %v3543_v40 = vpop.eup %2141  ;;  %v3554_v55 = vpop.f32.mrb[50].mxu1  ;;  %v1258_v48 = vand.u32 2147483647, %v3517_v15  ;;  %vm3566_vm7 = vcmp.lt.f32.partialorder %v1249_v41, 0.0004427343  ;;  %v1256_v39 = vadd.f32 1.0, %v1255_v47  ;;  %v1248_v13 = vmul.f32 %v3510_v35, %v1247_v43 }
 0x15c   :  { %v2144_v29 = vpop.eup %2143  ;;  %v1521_v44 = vsel %vm3523_vm15, %v1518_v53, %v1515_v26  ;;  %v1540_v3 = vadd.f32 1.0, %v3543_v40  ;;  %v732_v30 = vpop.f32.mrb[51].mxu0  ;;  %vm3577_vm9 = vcmp.lt.f32.partialorder %v1537_v34, 0.0004427343  ;;  %v967_v19 = vmin.f32 %v3270_v0, 20.0 }
 0x15d   :  { %v1761_v1 = vsel %vm929_vm13, %v3121_v45, %v1521_v44  ;;  %v1236_v50 = vmul.f32 0.6931472, %v2144_v29  ;;  %v860_v17 = vpop.f32.mrb[51].mxu1  ;;  %v3561_v56 = vpop.eup %2145  ;;  %v998_v29 = vmin.f32 %v3260_v63, 20.0  ;;  %vm3596_vm10 = vcmp.lt.f32.partialorder %v1258_v48, 0.0004427343 }
 0x15e   :  { %v1826_v51 = vsel %vm1784_vm1, %v1761_v1, %v3121_v45  ;;  %2159 = vlog2.f32 %v1540_v3  ;;  %v2148_v53 = vpop.eup %2147  ;;  %v1543_v45 = vmul.f32 -0.5, %v3543_v40  ;;  %v1261_v41 = vadd.f32 1.0, %v3561_v56 }
 0x15f   :  { %1891 = vst.msk [vmem:[%s4347_s2 + $0x148] sm:$0xff] %vm1849_vm4, %v1826_v51  ;;  %v1242_v38 = vsel %vm3534_vm0, %v1239_v23, %v1236_v50  ;;  %v1524_v27 = vmul.f32 0.6931472, %v2148_v53  ;;  %v1536_v3 = vmul.f32 %v3514_v24, %v1535_v16  ;;  %v1108_v24 = vmul.f32 1.442695, %v998_v29 }
 0x160   :  { %v1730_v47 = vsel %vm898_vm14, %v3169_v57, %v1242_v38  ;;  %v3588_v44 = vpop.f32.mrb[52].mxu0  ;;  %v3590_v9 = vpop.f32.mrb[52].mxu1  ;;  %2161 = vlog2.f32 %v1261_v41  ;;  %v1544_v38 = vadd.f32 1.0, %v1543_v45  ;;  %v1264_v41 = vmul.f32 -0.5, %v3561_v56 }
 0x161   :  { %v2150_v23 = vpop.eup %2149  ;;  %v1795_v34 = vsel %vm1784_vm1, %v1730_v47, %v3169_v57  ;;  %v737_v1 = vpop.f32.mrb[53].mxu0  ;;  %v1530_v50 = vsel %vm3545_vm3, %v1527_v58, %v1524_v27  ;;  %v1257_v57 = vmul.f32 %v3517_v15, %v1256_v39  ;;  %2163 = vpow2.f32 %v1108_v24 }
 0x162   :  { %v865_v35 = vpop.f32.mrb[53].mxu1  ;;  %v2152_v43 = vpop.eup %2151  ;;  %1860 = vst.msk [vmem:[%s4347_s2 + $0x50] sm:$0xff] %vm1849_vm4, %v1795_v34  ;;  %v1245_v17 = vmul.f32 0.6931472, %v2150_v23  ;;  %v1762_v51 = vsel %vm930_vm2, %v3171_v18, %v1530_v50  ;;  %vm932_vm11 = vcmp.gt.f32.partialorder %v3224_v31, 20.0  ;;  %vm901_vm13 = vcmp.gt.f32.partialorder %v3230_v6, 20.0 }
 0x163   :  { %v3607_v16 = vpop.f32.mrb[54].mxu0  ;;  %v2154_v48 = vpop.eup %2153  ;;  %v1533_v53 = vmul.f32 0.6931472, %v2152_v43  ;;  %v1827_v15 = vsel %vm1784_vm1, %v1762_v51, %v3171_v18  ;;  %v1546_v35 = vand.u32 2147483647, %v3543_v40  ;;  %v1545_v51 = vmul.f32 %v3543_v40, %v1544_v38 }
 0x164   :  { %v3613_v47 = vpop.f32.mrb[54].mxu1  ;;  %v740_v34 = vpop.f32.mrb[55].mxu0  ;;  %v1251_v58 = vsel %vm3566_vm7, %v1248_v13, %v1245_v17  ;;  %v1254_v39 = vmul.f32 0.6931472, %v2154_v48  ;;  %1892 = vst.msk [vmem:[%s4347_s2 + $0x150] sm:$0xff] %vm1849_vm4, %v1827_v15  ;;  %v1265_v17 = vadd.f32 1.0, %v1264_v41 }
 0x165   :  { %v3615_v37 = vpop.eup %2155  ;;  %v868_v27 = vpop.f32.mrb[55].mxu1  ;;  %v1731_v45 = vsel %vm899_vm5, %v3191_v62, %v1251_v58  ;;  %v1539_v29 = vsel %vm3577_vm9, %v1536_v3, %v1533_v53  ;;  %v1267_v3 = vand.u32 2147483647, %v3561_v56  ;;  %v1046_v53 = vmul.f32 1.442695, %v967_v19 }
 0x166   :  { %v1549_v18 = vadd.f32 1.0, %v3615_v37  ;;  %v1796_v13 = vsel %vm1784_vm1, %v1731_v45, %v3191_v62  ;;  %v1763_v23 = vsel %vm931_vm6, %v3193_v20, %v1539_v29  ;;  %v1260_v1 = vsel %vm3596_vm10, %v1257_v57, %v1254_v39  ;;  %v3642_v43 = vpop.eup %2157 }
 0x167   :  { %1861 = vst.msk [vmem:[%s4347_s2 + $0x58] sm:$0xff] %vm1849_vm4, %v1796_v13  ;;  %v1828_v62 = vsel %vm1784_vm1, %v1763_v23, %v3193_v20  ;;  %v1732_v26 = vsel %vm900_vm8, %v3222_v42, %v1260_v1  ;;  %v1270_v20 = vadd.f32 1.0, %v3642_v43  ;;  %vm1547_vm12 = vcmp.lt.f32.partialorder %v1546_v35, 0.0004427343 }
 0x168   :  { %2165 = vlog2.f32 %v1549_v18  ;;  %v2160_v30 = vpop.eup %2159  ;;  %1893 = vst.msk [vmem:[%s4347_s2 + $0x158] sm:$0xff] %vm1849_vm4, %v1828_v62  ;;  %v1797_v50 = vsel %vm1784_vm1, %v1732_v26, %v3222_v42  ;;  %v3663_v57 = vpop.f32.mrb[56].mxu0  ;;  %v1552_v42 = vmul.f32 -0.5, %v3615_v37  ;;  %v999_v41 = vmin.f32 %v3272_v60, 20.0 }
 0x169   :  { %v3665_v24 = vpop.f32.mrb[56].mxu1  ;;  %1862 = vst.msk [vmem:[%s4347_s2 + $0x60] sm:$0xff] %vm1849_vm4, %v1797_v50  ;;  %v1542_v48 = vmul.f32 0.6931472, %v2160_v30  ;;  %2167 = vlog2.f32 %v1270_v20  ;;  %v745_v34 = vpop.f32.mrb[57].mxu0  ;;  %v1266_v18 = vmul.f32 %v3561_v56, %v1265_v17  ;;  %v1273_v35 = vmul.f32 -0.5, %v3642_v43 }
 0x16a   :  { %v873_v15 = vpop.f32.mrb[57].mxu1  ;;  %v2162_v58 = vpop.eup %2161  ;;  %vm3676_vm14 = vcmp.lt.f32.partialorder %v1267_v3, 0.0004427343  ;;  %2169 = vpow2.f32 %v1046_v53  ;;  %v1110_v19 = vmul.f32 1.442695, %v999_v41  ;;  %v968_v62 = vmin.f32 %v3322_v5, 20.0 }
 0x16b   :  { %v1548_v39 = vsel %vm1547_vm12, %v1545_v51, %v1542_v48  ;;  %v3680_v45 = vpop.f32.mrb[58].mxu0  ;;  %v3682_v40 = vpop.f32.mrb[58].mxu1  ;;  %v1263_v29 = vmul.f32 0.6931472, %v2162_v58  ;;  %v1000_v26 = vmin.f32 %v3324_v14, 20.0  ;;  %v1553_v30 = vadd.f32 1.0, %v1552_v42 }
 0x16c   :  { %v1764_v38 = vsel %vm932_vm11, %v3224_v31, %v1548_v39  ;;  %v748_v13 = vpop.f32.mrb[59].mxu0  ;;  %v876_v23 = vpop.f32.mrb[59].mxu1  ;;  %2171 = vpow2.f32 %v1110_v19  ;;  %v1555_v17 = vand.u32 2147483647, %v3615_v37  ;;  %v1048_v51 = vmul.f32 1.442695, %v968_v62 }
 0x16d   :  { %v1829_v1 = vsel %vm1784_vm1, %v1764_v38, %v3224_v31  ;;  %v3694_v3 = vpop.eup %2163  ;;  %v1269_v56 = vsel %vm3676_vm14, %v1266_v18, %v1263_v29  ;;  %v969_v31 = vmin.f32 %v3344_v54, 20.0  ;;  %v1112_v53 = vmul.f32 1.442695, %v1000_v26 }
 0x16e   :  { %1894 = vst.msk [vmem:[%s4347_s2 + $0x160] sm:$0xff] %vm1849_vm4, %v1829_v1  ;;  %v1733_v50 = vsel %vm901_vm13, %v3230_v6, %v1269_v56  ;;  %v1558_v20 = vadd.f32 1.0, %v3694_v3  ;;  %vm933_vm15 = vcmp.gt.f32.partialorder %v3232_v7, 20.0  ;;  %v1274_v42 = vadd.f32 1.0, %v1273_v35 }
 0x16f   :  { %v1798_v48 = vsel %vm1784_vm1, %v1733_v50, %v3230_v6  ;;  %v1050_v41 = vmul.f32 1.442695, %v969_v31  ;;  %v1276_v15 = vand.u32 2147483647, %v3642_v43  ;;  %v1554_v27 = vmul.f32 %v3615_v37, %v1553_v30 }
 0x170   :  { %1863 = vst.msk [vmem:[%s4347_s2 + $0x68] sm:$0xff] %vm1849_vm4, %v1798_v48  ;;  %2173 = vlog2.f32 %v1558_v20  ;;  %v3717_v58 = vpop.f32.mrb[60].mxu0  ;;  %v3719_v39 = vpop.f32.mrb[60].mxu1  ;;  %v1001_v38 = vmin.f32 %v3346_v2, 20.0  ;;  %vm1556_vm0 = vcmp.lt.f32.partialorder %v1555_v17, 0.0004427343  ;;  %v1275_v20 = vmul.f32 %v3642_v43, %v1274_v42 }
 0x171   :  { %2175 = vpow2.f32 %v1048_v51  ;;  %v753_v29 = vpop.f32.mrb[61].mxu0  ;;  %v881_v18 = vpop.f32.mrb[61].mxu1  ;;  %v1561_v19 = vmul.f32 -0.5, %v3694_v3  ;;  %v970_v13 = vmin.f32 %v3393_v33, 20.0  ;;  %v1002_v37 = vmin.f32 %v3395_v12, 20.0 }
 0x172   :  { %v2166_v34 = vpop.eup %2165  ;;  %2177 = vpow2.f32 %v1112_v53  ;;  %v3725_v23 = vpop.f32.mrb[62].mxu0  ;;  %v1114_v26 = vmul.f32 1.442695, %v1001_v38  ;;  %vm1277_vm2 = vcmp.lt.f32.partialorder %v1276_v15, 0.0004427343  ;;  %vm902_vm3 = vcmp.gt.f32.partialorder %v3256_v22, 20.0 }
 0x173   :  { %v1551_v6 = vmul.f32 0.6931472, %v2166_v34  ;;  %v3727_v1 = vpop.f32.mrb[62].mxu1  ;;  %v2168_v35 = vpop.eup %2167  ;;  %2179 = vpow2.f32 %v1050_v41  ;;  %v1052_v41 = vmul.f32 1.442695, %v970_v13  ;;  %v1562_v15 = vadd.f32 1.0, %v1561_v19 }
 0x174   :  { %v756_v56 = vpop.f32.mrb[63].mxu0  ;;  %v884_v30 = vpop.f32.mrb[63].mxu1  ;;  %v1272_v17 = vmul.f32 0.6931472, %v2168_v35  ;;  %2181 = vpow2.f32 %v1114_v26  ;;  %vm934_vm5 = vcmp.gt.f32.partialorder %v3260_v63, 20.0  ;;  %vm903_vm7 = vcmp.gt.f32.partialorder %v3270_v0, 20.0 }
 0x175   :  { %v1557_v62 = vsel %vm1556_vm0, %v1554_v27, %v1551_v6  ;;  %v2170_v31 = vpop.eup %2169  ;;  %v1564_v6 = vand.u32 2147483647, %v3694_v3  ;;  %v1563_v26 = vmul.f32 %v3694_v3, %v1562_v15  ;;  %vm935_vm9 = vcmp.gt.f32.partialorder %v3272_v60, 20.0 }
 0x176   :  { %v1765_v50 = vsel %vm933_vm15, %v3232_v7, %v1557_v62  ;;  %v1279_v51 = vadd.f32 1.0, %v2170_v31  ;;  %v1282_v53 = vmul.f32 -0.5, %v2170_v31  ;;  %v1278_v34 = vsel %vm1277_vm2, %v1275_v20, %v1272_v17  ;;  %v2172_v43 = vpop.eup %2171 }
 0x177   :  { %v1830_v48 = vsel %vm1784_vm1, %v1765_v50, %v3232_v7  ;;  %v1734_v42 = vsel %vm902_vm3, %v3256_v22, %v1278_v34  ;;  %v1116_v7 = vmul.f32 1.442695, %v1002_v37  ;;  %v1567_v38 = vadd.f32 1.0, %v2172_v43 }
 0x178   :  { %1895 = vst.msk [vmem:[%s4347_s2 + $0x168] sm:$0xff] %vm1849_vm4, %v1830_v48  ;;  %2183 = vlog2.f32 %v1279_v51  ;;  %v1799_v27 = vsel %vm1784_vm1, %v1734_v42, %v3256_v22  ;;  %v1283_v29 = vadd.f32 1.0, %v1282_v53  ;;  %v1285_v18 = vand.u32 2147483647, %v2170_v31 }
 0x179   :  { %1864 = vst.msk [vmem:[%s4347_s2 + $0x70] sm:$0xff] %vm1849_vm4, %v1799_v27  ;;  %2185 = vpow2.f32 %v1052_v41  ;;  %v1570_v19 = vmul.f32 -0.5, %v2172_v43  ;;  %vm1565_vm6 = vcmp.lt.f32.partialorder %v1564_v6, 0.0004427343  ;;  %v1573_v37 = vand.u32 2147483647, %v2172_v43 }
 0x17a   :  { %v2174_v13 = vpop.eup %2173  ;;  %2187 = vlog2.f32 %v1567_v38  ;;  %v971_v50 = vmin.f32 %v3411_v25, 20.0  ;;  %v1284_v48 = vmul.f32 %v2170_v31, %v1283_v29  ;;  %vm3757_vm8 = vcmp.lt.f32.partialorder %v1285_v18, 0.0004427343 }
 0x17b   :  { %v2176_v35 = vpop.eup %2175  ;;  %v1560_v62 = vmul.f32 0.6931472, %v2174_v13  ;;  %2189 = vpow2.f32 %v1116_v7  ;;  %v1571_v41 = vadd.f32 1.0, %v1570_v19  ;;  %vm3772_vm10 = vcmp.lt.f32.partialorder %v1573_v37, 0.0004427343 }
 0x17c   :  { %v2178_v22 = vpop.eup %2177  ;;  %v1288_v56 = vadd.f32 1.0, %v2176_v35  ;;  %v1291_v30 = vmul.f32 -0.5, %v2176_v35  ;;  %v1294_v34 = vand.u32 2147483647, %v2176_v35  ;;  %v1054_v29 = vmul.f32 1.442695, %v971_v50 }
 0x17d   :  { %v3755_v17 = vpop.eup %2179  ;;  %v1566_v20 = vsel %vm1565_vm6, %v1563_v26, %v1560_v62  ;;  %v1576_v53 = vadd.f32 1.0, %v2178_v22  ;;  %v1579_v31 = vmul.f32 -0.5, %v2178_v22  ;;  %v1582_v42 = vand.u32 2147483647, %v2178_v22 }
 0x17e   :  { %v1766_v3 = vsel %vm934_vm5, %v3260_v63, %v1566_v20  ;;  %2191 = vlog2.f32 %v1288_v56  ;;  %v2182_v15 = vpop.eup %2181  ;;  %v1292_v27 = vadd.f32 1.0, %v1291_v30  ;;  %v1297_v38 = vadd.f32 1.0, %v3755_v17 }
 0x17f   :  { %v1831_v6 = vsel %vm1784_vm1, %v1766_v3, %v3260_v63  ;;  %2193 = vlog2.f32 %v1576_v53  ;;  %v1300_v18 = vmul.f32 -0.5, %v3755_v17  ;;  %v1585_v13 = vadd.f32 1.0, %v2182_v15 }
 0x180   :  { %1896 = vst.msk [vmem:[%s4347_s2 + $0x170] sm:$0xff] %vm1849_vm4, %v1831_v6  ;;  %v1003_v19 = vmin.f32 %v3413_v28, 20.0  ;;  %v972_v62 = vmin.f32 %v3443_v52, 20.0  ;;  %v1572_v56 = vmul.f32 %v2172_v43, %v1571_v41  ;;  %2195 = vlog2.f32 %v1297_v38 }
 0x181   :  { %v1588_v20 = vmul.f32 -0.5, %v2182_v15  ;;  %vm904_vm11 = vcmp.gt.f32.partialorder %v3322_v5, 20.0  ;;  %vm3783_vm12 = vcmp.lt.f32.partialorder %v1294_v34, 0.0004427343  ;;  %v1580_v50 = vadd.f32 1.0, %v1579_v31 }
 0x182   :  { %v2184_v63 = vpop.eup %2183  ;;  %vm3787_vm13 = vcmp.lt.f32.partialorder %v1582_v42, 0.0004427343  ;;  %2197 = vlog2.f32 %v1585_v13  ;;  %v1293_v41 = vmul.f32 %v2176_v35, %v1292_v27  ;;  %vm936_vm14 = vcmp.gt.f32.partialorder %v3324_v14, 20.0 }
 0x183   :  { %v1281_v26 = vmul.f32 0.6931472, %v2184_v63  ;;  %v3780_v37 = vpop.eup %2185  ;;  %v1303_v6 = vand.u32 2147483647, %v3755_v17  ;;  %v1301_v63 = vadd.f32 1.0, %v1300_v18  ;;  %v1589_v35 = vadd.f32 1.0, %v1588_v20 }
 0x184   :  { %v2188_v3 = vpop.eup %2187  ;;  %v1306_v34 = vadd.f32 1.0, %v3780_v37  ;;  %v1591_v13 = vand.u32 2147483647, %v2182_v15  ;;  %vm905_vm15 = vcmp.gt.f32.partialorder %v3344_v54, 20.0  ;;  %v1309_v18 = vmul.f32 -0.5, %v3780_v37 }
 0x185   :  { %v1287_v43 = vsel %vm3757_vm8, %v1284_v48, %v1281_v26  ;;  %v3796_v38 = vpop.eup %2189  ;;  %v1569_v42 = vmul.f32 0.6931472, %v2188_v3  ;;  %v1581_v26 = vmul.f32 %v2178_v22, %v1580_v50  ;;  %v1118_v3 = vmul.f32 1.442695, %v1003_v19 }
 0x186   :  { %v1735_v31 = vsel %vm903_vm7, %v3270_v0, %v1287_v43  ;;  %2199 = vlog2.f32 %v1306_v34  ;;  %v1594_v51 = vadd.f32 1.0, %v3796_v38  ;;  %vm3816_vm0 = vcmp.lt.f32.partialorder %v1303_v6, 0.0004427343 }
 0x187   :  { %v1800_v48 = vsel %vm1784_vm1, %v1735_v31, %v3270_v0  ;;  %v1575_v27 = vsel %vm3772_vm10, %v1572_v56, %v1569_v42  ;;  %vm937_vm2 = vcmp.gt.f32.partialorder %v3346_v2, 20.0  ;;  %v1056_v7 = vmul.f32 1.442695, %v972_v62 }
 0x188   :  { %1865 = vst.msk [vmem:[%s4347_s2 + $0x78] sm:$0xff] %vm1849_vm4, %v1800_v48  ;;  %v2192_v43 = vpop.eup %2191  ;;  %v1767_v0 = vsel %vm935_vm9, %v3272_v60, %v1575_v27  ;;  %2201 = vlog2.f32 %v1594_v51  ;;  %v1302_v19 = vmul.f32 %v3755_v17, %v1301_v63  ;;  %vm3825_vm3 = vcmp.lt.f32.partialorder %v1591_v13, 0.0004427343 }
 0x189   :  { %v2194_v56 = vpop.eup %2193  ;;  %v1832_v22 = vsel %vm1784_vm1, %v1767_v0, %v3272_v60  ;;  %v1290_v50 = vmul.f32 0.6931472, %v2192_v43  ;;  %v1590_v31 = vmul.f32 %v2182_v15, %v1589_v35  ;;  %2203 = vpow2.f32 %v1054_v29 }
 0x18a   :  { %1897 = vst.msk [vmem:[%s4347_s2 + $0x178] sm:$0xff] %vm1849_vm4, %v1832_v22  ;;  %v1578_v6 = vmul.f32 0.6931472, %v2194_v56  ;;  %v1004_v62 = vmin.f32 %v3445_v8, 20.0  ;;  %v1310_v42 = vadd.f32 1.0, %v1309_v18  ;;  %v1597_v17 = vmul.f32 -0.5, %v3796_v38  ;;  %v2196_v63 = vpop.eup %2195 }
 0x18b   :  { %v1296_v60 = vsel %vm3783_vm12, %v1293_v41, %v1290_v50  ;;  %2205 = vpow2.f32 %v1118_v3  ;;  %v1299_v35 = vmul.f32 0.6931472, %v2196_v63  ;;  %v973_v51 = vmin.f32 %v3454_v36, 20.0 }
 0x18c   :  { %v1736_v13 = vsel %vm904_vm11, %v3322_v5, %v1296_v60  ;;  %v1584_v48 = vsel %vm3787_vm13, %v1581_v26, %v1578_v6  ;;  %2207 = vpow2.f32 %v1056_v7  ;;  %v1120_v15 = vmul.f32 1.442695, %v1004_v62  ;;  %v2198_v29 = vpop.eup %2197 }
 0x18d   :  { %v1801_v30 = vsel %vm1784_vm1, %v1736_v13, %v3322_v5  ;;  %v1768_v41 = vsel %vm936_vm14, %v3324_v14, %v1584_v48  ;;  %v1587_v27 = vmul.f32 0.6931472, %v2198_v29  ;;  %v1312_v26 = vand.u32 2147483647, %v3780_v37 }
 0x18e   :  { %1866 = vst.msk [vmem:[%s4347_s2 + $0x80] sm:$0xff] %vm1849_vm4, %v1801_v30  ;;  %v1833_v53 = vsel %vm1784_vm1, %v1768_v41, %v3324_v14  ;;  %2209 = vpow2.f32 %v1120_v15  ;;  %v1305_v5 = vsel %vm3816_vm0, %v1302_v19, %v1299_v35  ;;  %v1598_v18 = vadd.f32 1.0, %v1597_v17 }
 0x18f   :  { %1898 = vst.msk [vmem:[%s4347_s2 + $0x180] sm:$0xff] %vm1849_vm4, %v1833_v53  ;;  %v1058_v3 = vmul.f32 1.442695, %v973_v51  ;;  %v1005_v43 = vmin.f32 %v3462_v49, 20.0  ;;  %v1737_v14 = vsel %vm905_vm15, %v3344_v54, %v1305_v5  ;;  %v1593_v7 = vsel %vm3825_vm3, %v1590_v31, %v1587_v27 }
 0x190   :  { %v2200_v0 = vpop.eup %2199  ;;  %v1311_v56 = vmul.f32 %v3780_v37, %v1310_v42  ;;  %v1600_v22 = vand.u32 2147483647, %v3796_v38  ;;  %v1802_v20 = vsel %vm1784_vm1, %v1737_v14, %v3344_v54  ;;  %v1769_v50 = vsel %vm937_vm2, %v3346_v2, %v1593_v7 }
 0x191   :  { %v1308_v19 = vmul.f32 0.6931472, %v2200_v0  ;;  %2211 = vpow2.f32 %v1058_v3  ;;  %1867 = vst.msk [vmem:[%s4347_s2 + $0x88] sm:$0xff] %vm1849_vm4, %v1802_v20  ;;  %v1834_v37 = vsel %vm1784_vm1, %v1769_v50, %v3346_v2  ;;  %vm906_vm5 = vcmp.gt.f32.partialorder %v3393_v33, 20.0 }
 0x192   :  { %v2202_v6 = vpop.eup %2201  ;;  %vm1313_vm6 = vcmp.lt.f32.partialorder %v1312_v26, 0.0004427343  ;;  %v1122_v54 = vmul.f32 1.442695, %v1005_v43  ;;  %1899 = vst.msk [vmem:[%s4347_s2 + $0x188] sm:$0xff] %vm1849_vm4, %v1834_v37  ;;  %v1599_v62 = vmul.f32 %v3796_v38, %v1598_v18  ;;  %v974_v60 = vmin.f32 %v3492_v61, 20.0 }
 0x193   :  { %v1314_v34 = vsel %vm1313_vm6, %v1311_v56, %v1308_v19  ;;  %v1596_v31 = vmul.f32 0.6931472, %v2202_v6  ;;  %v2204_v42 = vpop.eup %2203  ;;  %vm938_vm7 = vcmp.gt.f32.partialorder %v3395_v12, 20.0  ;;  %vm1601_vm8 = vcmp.lt.f32.partialorder %v1600_v22, 0.0004427343 }
 0x194   :  { %v1738_v17 = vsel %vm906_vm5, %v3393_v33, %v1314_v34  ;;  %2213 = vpow2.f32 %v1122_v54  ;;  %v1315_v48 = vadd.f32 1.0, %v2204_v42  ;;  %v1006_v15 = vmin.f32 %v3494_v46, 20.0 }
 0x195   :  { %v2206_v2 = vpop.eup %2205  ;;  %v1803_v63 = vsel %vm1784_vm1, %v1738_v17, %v3393_v33  ;;  %v1602_v13 = vsel %vm1601_vm8, %v1599_v62, %v1596_v31  ;;  %v1318_v35 = vmul.f32 -0.5, %v2204_v42  ;;  %v1060_v33 = vmul.f32 1.442695, %v974_v60 }
 0x196   :  { %v2208_v29 = vpop.eup %2207  ;;  %1868 = vst.msk [vmem:[%s4347_s2 + $0x90] sm:$0xff] %vm1849_vm4, %v1803_v63  ;;  %v1770_v38 = vsel %vm938_vm7, %v3395_v12, %v1602_v13  ;;  %v1603_v30 = vadd.f32 1.0, %v2206_v2  ;;  %2215 = vlog2.f32 %v1315_v48  ;;  %v1606_v53 = vmul.f32 -0.5, %v2206_v2 }
 0x197   :  { %v1835_v41 = vsel %vm1784_vm1, %v1770_v38, %v3395_v12  ;;  %v1324_v27 = vadd.f32 1.0, %v2208_v29  ;;  %v1321_v26 = vand.u32 2147483647, %v2204_v42  ;;  %v1124_v5 = vmul.f32 1.442695, %v1006_v15 }
 0x198   :  { %v2210_v51 = vpop.eup %2209  ;;  %1900 = vst.msk [vmem:[%s4347_s2 + $0x190] sm:$0xff] %vm1849_vm4, %v1835_v41  ;;  %2217 = vlog2.f32 %v1603_v30  ;;  %v1327_v18 = vmul.f32 -0.5, %v2208_v29  ;;  %v975_v43 = vmin.f32 %v3502_v11, 20.0  ;;  %v1319_v0 = vadd.f32 1.0, %v1318_v35 }
 0x199   :  { %2219 = vlog2.f32 %v1324_v27  ;;  %v1612_v3 = vadd.f32 1.0, %v2210_v51  ;;  %v1615_v14 = vmul.f32 -0.5, %v2210_v51  ;;  %vm907_vm9 = vcmp.gt.f32.partialorder %v3411_v25, 20.0 }
 0x19a   :  { %2221 = vpow2.f32 %v1060_v33  ;;  %v1607_v7 = vadd.f32 1.0, %v1606_v53  ;;  %v1609_v56 = vand.u32 2147483647, %v2206_v2  ;;  %vm3914_vm10 = vcmp.lt.f32.partialorder %v1321_v26, 0.0004427343 }
 0x19b   :  { %v3910_v12 = vpop.eup %2211  ;;  %2223 = vlog2.f32 %v1612_v3  ;;  %vm939_vm11 = vcmp.gt.f32.partialorder %v3413_v28, 20.0  ;;  %v1330_v50 = vand.u32 2147483647, %v2208_v29  ;;  %v1618_v19 = vand.u32 2147483647, %v2210_v51 }
 0x19c   :  { %v1333_v22 = vadd.f32 1.0, %v3910_v12  ;;  %2225 = vpow2.f32 %v1124_v5  ;;  %v1328_v37 = vadd.f32 1.0, %v1327_v18  ;;  %v1336_v54 = vmul.f32 -0.5, %v3910_v12 }
 0x19d   :  { %v1062_v34 = vmul.f32 1.442695, %v975_v43  ;;  %v1320_v31 = vmul.f32 %v2204_v42, %v1319_v0  ;;  %vm908_vm12 = vcmp.gt.f32.partialorder %v3443_v52, 20.0  ;;  %v1616_v62 = vadd.f32 1.0, %v1615_v14 }
 0x19e   :  { %v3919_v6 = vpop.eup %2213  ;;  %2227 = vlog2.f32 %v1333_v22  ;;  %v1339_v60 = vand.u32 2147483647, %v3910_v12  ;;  %v1608_v63 = vmul.f32 %v2206_v2, %v1607_v7  ;;  %vm3925_vm13 = vcmp.lt.f32.partialorder %v1609_v56, 0.0004427343 }
 0x19f   :  { %v1621_v17 = vadd.f32 1.0, %v3919_v6  ;;  %2229 = vpow2.f32 %v1062_v34  ;;  %v1007_v48 = vmin.f32 %v3504_v10, 20.0  ;;  %vm3930_vm14 = vcmp.lt.f32.partialorder %v1330_v50, 0.0004427343 }
 0x1a0   :  { %v2216_v15 = vpop.eup %2215  ;;  %vm940_vm15 = vcmp.gt.f32.partialorder %v3445_v8, 20.0  ;;  %vm3935_vm0 = vcmp.lt.f32.partialorder %v1618_v19, 0.0004427343  ;;  %v976_v2 = vmin.f32 %v3529_v21, 20.0  ;;  %v1329_v35 = vmul.f32 %v2208_v29, %v1328_v37 }
 0x1a1   :  { %2231 = vlog2.f32 %v1621_v17  ;;  %v1317_v41 = vmul.f32 0.6931472, %v2216_v15  ;;  %v1337_v33 = vadd.f32 1.0, %v1336_v54  ;;  %v1126_v53 = vmul.f32 1.442695, %v1007_v48 }
 0x1a2   :  { %v2218_v30 = vpop.eup %2217  ;;  %v1617_v26 = vmul.f32 %v2210_v51, %v1616_v62  ;;  %vm909_vm2 = vcmp.gt.f32.partialorder %v3454_v36, 20.0  ;;  %vm3941_vm3 = vcmp.lt.f32.partialorder %v1339_v60, 0.0004427343  ;;  %v1064_v18 = vmul.f32 1.442695, %v976_v2 }
 0x1a3   :  { %v1605_v27 = vmul.f32 0.6931472, %v2218_v30  ;;  %v2220_v3 = vpop.eup %2219  ;;  %v1323_v43 = vsel %vm3914_vm10, %v1320_v31, %v1317_v41  ;;  %v1624_v0 = vmul.f32 -0.5, %v3919_v6  ;;  %v1627_v14 = vand.u32 2147483647, %v3919_v6 }
 0x1a4   :  { %2233 = vpow2.f32 %v1126_v53  ;;  %v3949_v29 = vpop.eup %2221  ;;  %v1739_v51 = vsel %vm907_vm9, %v3411_v25, %v1323_v43  ;;  %v1326_v56 = vmul.f32 0.6931472, %v2220_v3  ;;  %vm941_vm5 = vcmp.gt.f32.partialorder %v3462_v49, 20.0 }
 0x1a5   :  { %v1611_v7 = vsel %vm3925_vm13, %v1608_v63, %v1605_v27  ;;  %2235 = vpow2.f32 %v1064_v18  ;;  %v2224_v22 = vpop.eup %2223  ;;  %v1804_v20 = vsel %vm1784_vm1, %v1739_v51, %v3411_v25  ;;  %v1342_v19 = vadd.f32 1.0, %v3949_v29 }
 0x1a6   :  { %v1771_v50 = vsel %vm939_vm11, %v3413_v28, %v1611_v7  ;;  %v1008_v37 = vmin.f32 %v3531_v59, 20.0  ;;  %v2226_v54 = vpop.eup %2225  ;;  %1869 = vst.msk [vmem:[%s4347_s2 + $0x98] sm:$0xff] %vm1849_vm4, %v1804_v20  ;;  %v1332_v34 = vsel %vm3930_vm14, %v1329_v35, %v1326_v56  ;;  %v1614_v31 = vmul.f32 0.6931472, %v2224_v22 }
 0x1a7   :  { %v1836_v25 = vsel %vm1784_vm1, %v1771_v50, %v3413_v28  ;;  %v1338_v62 = vmul.f32 %v3910_v12, %v1337_v33  ;;  %v1740_v17 = vsel %vm908_vm12, %v3443_v52, %v1332_v34  ;;  %v1625_v63 = vadd.f32 1.0, %v1624_v0 }
 0x1a8   :  { %v2228_v60 = vpop.eup %2227  ;;  %1901 = vst.msk [vmem:[%s4347_s2 + $0x198] sm:$0xff] %vm1849_vm4, %v1836_v25  ;;  %2237 = vlog2.f32 %v1342_v19  ;;  %v1630_v13 = vadd.f32 1.0, %v2226_v54  ;;  %v1805_v28 = vsel %vm1784_vm1, %v1740_v17, %v3443_v52  ;;  %v1620_v12 = vsel %vm3935_vm0, %v1617_v26, %v1614_v31 }
 0x1a9   :  { %v1335_v48 = vmul.f32 0.6931472, %v2228_v60  ;;  %vm3987_vm6 = vcmp.lt.f32.partialorder %v1627_v14, 0.0004427343  ;;  %v3991_v38 = vpop.eup %2229  ;;  %1870 = vst.msk [vmem:[%s4347_s2 + $0xa0] sm:$0xff] %vm1849_vm4, %v1805_v28  ;;  %v1772_v2 = vsel %vm940_vm15, %v3445_v8, %v1620_v12  ;;  %v1345_v52 = vmul.f32 -0.5, %v3949_v29 }
 0x1aa   :  { %2239 = vlog2.f32 %v1630_v13  ;;  %v1128_v42 = vmul.f32 1.442695, %v1008_v37  ;;  %v1837_v41 = vsel %vm1784_vm1, %v1772_v2, %v3445_v8  ;;  %v1633_v33 = vmul.f32 -0.5, %v2226_v54 }
 0x1ab   :  { %v2232_v30 = vpop.eup %2231  ;;  %v1341_v35 = vsel %vm3941_vm3, %v1338_v62, %v1335_v48  ;;  %v1351_v53 = vadd.f32 1.0, %v3991_v38  ;;  %1902 = vst.msk [vmem:[%s4347_s2 + $0x1a0] sm:$0xff] %vm1849_vm4, %v1837_v41  ;;  %v1626_v18 = vmul.f32 %v3919_v6, %v1625_v63  ;;  %v1354_v8 = vmul.f32 -0.5, %v3991_v38 }
 0x1ac   :  { %v1741_v27 = vsel %vm909_vm2, %v3454_v36, %v1341_v35  ;;  %v1623_v26 = vmul.f32 0.6931472, %v2232_v30  ;;  %v1348_v3 = vand.u32 2147483647, %v3949_v29  ;;  %v977_v43 = vmin.f32 %v3541_v32, 20.0 }
 0x1ad   :  { %v1806_v5 = vsel %vm1784_vm1, %v1741_v27, %v3454_v36  ;;  %2241 = vlog2.f32 %v1351_v53  ;;  %v1346_v14 = vadd.f32 1.0, %v1345_v52  ;;  %v1636_v51 = vand.u32 2147483647, %v2226_v54 }
 0x1ae   :  { %v4021_v0 = vpop.eup %2233  ;;  %1871 = vst.msk [vmem:[%s4347_s2 + $0xa8] sm:$0xff] %vm1849_vm4, %v1806_v5  ;;  %v1629_v6 = vsel %vm3987_vm6, %v1626_v18, %v1623_v26  ;;  %2243 = vpow2.f32 %v1128_v42  ;;  %v1634_v56 = vadd.f32 1.0, %v1633_v33  ;;  %v1355_v50 = vadd.f32 1.0, %v1354_v8 }
 0x1af   :  { %v4029_v7 = vpop.eup %2235  ;;  %v1773_v36 = vsel %vm941_vm5, %v3462_v49, %v1629_v6  ;;  %v1639_v22 = vadd.f32 1.0, %v4021_v0  ;;  %vm910_vm7 = vcmp.gt.f32.partialorder %v3492_v61, 20.0  ;;  %vm4044_vm8 = vcmp.lt.f32.partialorder %v1348_v3, 0.0004427343 }
 0x1b0   :  { %v1838_v20 = vsel %vm1784_vm1, %v1773_v36, %v3462_v49  ;;  %v1360_v19 = vadd.f32 1.0, %v4029_v7  ;;  %vm942_vm9 = vcmp.gt.f32.partialorder %v3494_v46, 20.0  ;;  %v1347_v49 = vmul.f32 %v3949_v29, %v1346_v14 }
 0x1b1   :  { %1903 = vst.msk [vmem:[%s4347_s2 + $0x1a8] sm:$0xff] %vm1849_vm4, %v1838_v20  ;;  %2245 = vlog2.f32 %v1639_v22  ;;  %vm4050_vm10 = vcmp.lt.f32.partialorder %v1636_v51, 0.0004427343  ;;  %vm911_vm11 = vcmp.gt.f32.partialorder %v3502_v11, 20.0  ;;  %v1066_v31 = vmul.f32 1.442695, %v977_v43 }
 0x1b2   :  { %v2238_v25 = vpop.eup %2237  ;;  %2247 = vlog2.f32 %v1360_v19  ;;  %v1635_v60 = vmul.f32 %v2226_v54, %v1634_v56  ;;  %v1357_v17 = vand.u32 2147483647, %v3991_v38  ;;  %v1642_v63 = vmul.f32 -0.5, %v4021_v0 }
 0x1b3   :  { %v1344_v62 = vmul.f32 0.6931472, %v2238_v25  ;;  %v1356_v28 = vmul.f32 %v3991_v38, %v1355_v50  ;;  %2249 = vpow2.f32 %v1066_v31  ;;  %v1009_v29 = vmin.f32 %v3554_v55, 20.0 }
 0x1b4   :  { %v2240_v13 = vpop.eup %2239  ;;  %v978_v12 = vmin.f32 %v3588_v44, 20.0  ;;  %v1645_v2 = vand.u32 2147483647, %v4021_v0  ;;  %v1363_v54 = vmul.f32 -0.5, %v4029_v7  ;;  %vm943_vm12 = vcmp.gt.f32.partialorder %v3504_v10, 20.0 }
 0x1b5   :  { %v1350_v48 = vsel %vm4044_vm8, %v1347_v49, %v1344_v62  ;;  %v1632_v15 = vmul.f32 0.6931472, %v2240_v13  ;;  %v1130_v38 = vmul.f32 1.442695, %v1009_v29  ;;  %v1010_v30 = vmin.f32 %v3590_v9, 20.0 }
 0x1b6   :  { %v1742_v52 = vsel %vm910_vm7, %v3492_v61, %v1350_v48  ;;  %v1068_v42 = vmul.f32 1.442695, %v978_v12  ;;  %v1643_v53 = vadd.f32 1.0, %v1642_v63  ;;  %v979_v27 = vmin.f32 %v3607_v16, 20.0 }
 0x1b7   :  { %v2242_v41 = vpop.eup %2241  ;;  %v1807_v35 = vsel %vm1784_vm1, %v1742_v52, %v3492_v61  ;;  %v1638_v33 = vsel %vm4050_vm10, %v1635_v60, %v1632_v15  ;;  %2251 = vpow2.f32 %v1130_v38  ;;  %v1132_v5 = vmul.f32 1.442695, %v1010_v30 }
 0x1b8   :  { %v2244_v26 = vpop.eup %2243  ;;  %1872 = vst.msk [vmem:[%s4347_s2 + $0xb0] sm:$0xff] %vm1849_vm4, %v1807_v35  ;;  %v1774_v18 = vsel %vm942_vm9, %v3494_v46, %v1638_v33  ;;  %v1353_v8 = vmul.f32 0.6931472, %v2242_v41  ;;  %vm1358_vm13 = vcmp.lt.f32.partialorder %v1357_v17, 0.0004427343  ;;  %v1364_v3 = vadd.f32 1.0, %v1363_v54 }
 0x1b9   :  { %v1839_v61 = vsel %vm1784_vm1, %v1774_v18, %v3494_v46  ;;  %v1648_v43 = vadd.f32 1.0, %v2244_v26  ;;  %v1366_v14 = vand.u32 2147483647, %v4029_v7  ;;  %2253 = vpow2.f32 %v1068_v42 }
 0x1ba   :  { %1904 = vst.msk [vmem:[%s4347_s2 + $0x1b0] sm:$0xff] %vm1849_vm4, %v1839_v61  ;;  %v1359_v6 = vsel %vm1358_vm13, %v1356_v28, %v1353_v8  ;;  %v1070_v51 = vmul.f32 1.442695, %v979_v27  ;;  %v1644_v46 = vmul.f32 %v4021_v0, %v1643_v53  ;;  %vm4094_vm14 = vcmp.lt.f32.partialorder %v1645_v2, 0.0004427343 }
 0x1bb   :  { %v2246_v36 = vpop.eup %2245  ;;  %v1743_v56 = vsel %vm911_vm11, %v3502_v11, %v1359_v6  ;;  %2255 = vlog2.f32 %v1648_v43  ;;  %v1011_v37 = vmin.f32 %v3613_v47, 20.0  ;;  %v1365_v25 = vmul.f32 %v4029_v7, %v1364_v3 }
 0x1bc   :  { %v2248_v20 = vpop.eup %2247  ;;  %v1808_v50 = vsel %vm1784_vm1, %v1743_v56, %v3502_v11  ;;  %v1641_v19 = vmul.f32 0.6931472, %v2246_v36  ;;  %2257 = vpow2.f32 %v1132_v5  ;;  %v1651_v49 = vmul.f32 -0.5, %v2244_v26 }
 0x1bd   :  { %1873 = vst.msk [vmem:[%s4347_s2 + $0xb8] sm:$0xff] %vm1849_vm4, %v1808_v50  ;;  %v1362_v0 = vmul.f32 0.6931472, %v2248_v20  ;;  %2259 = vpow2.f32 %v1070_v51  ;;  %v2250_v34 = vpop.eup %2249  ;;  %vm1367_vm15 = vcmp.lt.f32.partialorder %v1366_v14, 0.0004427343  ;;  %v980_v62 = vmin.f32 %v3663_v57, 20.0 }
 0x1be   :  { %v1647_v31 = vsel %vm4094_vm14, %v1644_v46, %v1641_v19  ;;  %v1134_v11 = vmul.f32 1.442695, %v1011_v37  ;;  %vm912_vm0 = vcmp.gt.f32.partialorder %v3529_v21, 20.0  ;;  %v1369_v63 = vadd.f32 1.0, %v2250_v34 }
 0x1bf   :  { %v1775_v60 = vsel %vm943_vm12, %v3504_v10, %v1647_v31  ;;  %v1368_v17 = vsel %vm1367_vm15, %v1365_v25, %v1362_v0  ;;  %v1654_v28 = vand.u32 2147483647, %v2244_v26  ;;  %v1652_v12 = vadd.f32 1.0, %v1651_v49 }
 0x1c0   :  { %v1840_v7 = vsel %vm1784_vm1, %v1775_v60, %v3504_v10  ;;  %v1744_v13 = vsel %vm912_vm0, %v3529_v21, %v1368_v17  ;;  %2261 = vpow2.f32 %v1134_v11  ;;  %v1072_v48 = vmul.f32 1.442695, %v980_v62 }
 0x1c1   :  { %1905 = vst.msk [vmem:[%s4347_s2 + $0x1b8] sm:$0xff] %vm1849_vm4, %v1840_v7  ;;  %v1809_v29 = vsel %vm1784_vm1, %v1744_v13, %v3529_v21  ;;  %2263 = vlog2.f32 %v1369_v63  ;;  %v2252_v15 = vpop.eup %2251  ;;  %v1012_v10 = vmin.f32 %v3665_v24, 20.0  ;;  %v1372_v2 = vmul.f32 -0.5, %v2250_v34 }
 0x1c2   :  { %1874 = vst.msk [vmem:[%s4347_s2 + $0xc0] sm:$0xff] %vm1849_vm4, %v1809_v29  ;;  %v1657_v54 = vadd.f32 1.0, %v2252_v15  ;;  %vm944_vm2 = vcmp.gt.f32.partialorder %v3531_v59, 20.0  ;;  %v1660_v38 = vmul.f32 -0.5, %v2252_v15  ;;  %2265 = vpow2.f32 %v1072_v48 }
 0x1c3   :  { %v2254_v52 = vpop.eup %2253  ;;  %v1136_v42 = vmul.f32 1.442695, %v1012_v10  ;;  %v1653_v30 = vmul.f32 %v2244_v26, %v1652_v12  ;;  %vm4131_vm3 = vcmp.lt.f32.partialorder %v1654_v28, 0.0004427343  ;;  %vm913_vm5 = vcmp.gt.f32.partialorder %v3541_v32, 20.0 }
 0x1c4   :  { %2267 = vlog2.f32 %v1657_v54  ;;  %v1378_v35 = vadd.f32 1.0, %v2254_v52  ;;  %v1375_v27 = vand.u32 2147483647, %v2250_v34  ;;  %v1381_v18 = vmul.f32 -0.5, %v2254_v52 }
 0x1c5   :  { %v2256_v21 = vpop.eup %2255  ;;  %2269 = vpow2.f32 %v1136_v42  ;;  %v1373_v5 = vadd.f32 1.0, %v1372_v2  ;;  %v981_v3 = vmin.f32 %v3680_v45, 20.0  ;;  %v1661_v43 = vadd.f32 1.0, %v1660_v38 }
 0x1c6   :  { %v2258_v33 = vpop.eup %2257  ;;  %v1650_v53 = vmul.f32 0.6931472, %v2256_v21  ;;  %2271 = vlog2.f32 %v1378_v35  ;;  %v1663_v6 = vand.u32 2147483647, %v2252_v15  ;;  %v1384_v14 = vand.u32 2147483647, %v2254_v52 }
 0x1c7   :  { %v2260_v8 = vpop.eup %2259  ;;  %v1666_v61 = vadd.f32 1.0, %v2258_v33  ;;  %v1669_v36 = vmul.f32 -0.5, %v2258_v33  ;;  %vm4147_vm6 = vcmp.lt.f32.partialorder %v1375_v27, 0.0004427343  ;;  %vm945_vm7 = vcmp.gt.f32.partialorder %v3554_v55, 20.0 }
 0x1c8   :  { %v1656_v26 = vsel %vm4131_vm3, %v1653_v30, %v1650_v53  ;;  %v1387_v56 = vadd.f32 1.0, %v2260_v8  ;;  %v1382_v50 = vadd.f32 1.0, %v1381_v18  ;;  %v1390_v19 = vmul.f32 -0.5, %v2260_v8 }
 0x1c9   :  { %v1776_v51 = vsel %vm944_vm2, %v3531_v59, %v1656_v26  ;;  %2273 = vlog2.f32 %v1666_v61  ;;  %v1374_v0 = vmul.f32 %v2250_v34, %v1373_v5  ;;  %v1672_v25 = vand.u32 2147483647, %v2258_v33 }
 0x1ca   :  { %v4142_v46 = vpop.eup %2261  ;;  %v1841_v22 = vsel %vm1784_vm1, %v1776_v51, %v3531_v59  ;;  %2275 = vlog2.f32 %v1387_v56  ;;  %v1662_v31 = vmul.f32 %v2252_v15, %v1661_v43  ;;  %vm4157_vm8 = vcmp.lt.f32.partialorder %v1663_v6, 0.0004427343 }
 0x1cb   :  { %v2264_v37 = vpop.eup %2263  ;;  %1906 = vst.msk [vmem:[%s4347_s2 + $0x1c0] sm:$0xff] %vm1849_vm4, %v1841_v22  ;;  %v1675_v49 = vadd.f32 1.0, %v4142_v46  ;;  %vm914_vm9 = vcmp.gt.f32.partialorder %v3588_v44, 20.0  ;;  %v1074_v62 = vmul.f32 1.442695, %v981_v3  ;;  %v1670_v17 = vadd.f32 1.0, %v1669_v36 }
 0x1cc   :  { %v1371_v59 = vmul.f32 0.6931472, %v2264_v37  ;;  %vm4162_vm10 = vcmp.lt.f32.partialorder %v1384_v14, 0.0004427343  ;;  %v1393_v63 = vand.u32 2147483647, %v2260_v8  ;;  %v4166_v34 = vpop.eup %2265  ;;  %v1383_v13 = vmul.f32 %v2254_v52, %v1382_v50 }
 0x1cd   :  { %2277 = vlog2.f32 %v1675_v49  ;;  %vm946_vm11 = vcmp.gt.f32.partialorder %v3590_v9, 20.0  ;;  %v1391_v28 = vadd.f32 1.0, %v1390_v19  ;;  %v1678_v29 = vmul.f32 -0.5, %v4142_v46 }
 0x1ce   :  { %v1377_v7 = vsel %vm4147_vm6, %v1374_v0, %v1371_v59  ;;  %v2268_v12 = vpop.eup %2267  ;;  %vm4175_vm12 = vcmp.lt.f32.partialorder %v1672_v25, 0.0004427343  ;;  %v1396_v10 = vadd.f32 1.0, %v4166_v34  ;;  %v1013_v2 = vmin.f32 %v3682_v40, 20.0 }
 0x1cf   :  { %v1745_v48 = vsel %vm913_vm5, %v3541_v32, %v1377_v7  ;;  %v4181_v54 = vpop.eup %2269  ;;  %v1659_v38 = vmul.f32 0.6931472, %v2268_v12  ;;  %vm915_vm13 = vcmp.gt.f32.partialorder %v3607_v16, 20.0  ;;  %v1681_v42 = vand.u32 2147483647, %v4142_v46 }
 0x1d0   :  { %v1810_v52 = vsel %vm1784_vm1, %v1745_v48, %v3541_v32  ;;  %2279 = vpow2.f32 %v1074_v62  ;;  %v2272_v21 = vpop.eup %2271  ;;  %v1671_v30 = vmul.f32 %v2258_v33, %v1670_v17  ;;  %vm4192_vm14 = vcmp.lt.f32.partialorder %v1393_v63, 0.0004427343 }
 0x1d1   :  { %1875 = vst.msk [vmem:[%s4347_s2 + $0xc8] sm:$0xff] %vm1849_vm4, %v1810_v52  ;;  %2281 = vlog2.f32 %v1396_v10  ;;  %v1684_v32 = vadd.f32 1.0, %v4181_v54  ;;  %v1665_v35 = vsel %vm4157_vm8, %v1662_v31, %v1659_v38  ;;  %v1380_v53 = vmul.f32 0.6931472, %v2272_v21 }
 0x1d2   :  { %v1392_v27 = vmul.f32 %v2260_v8, %v1391_v28  ;;  %vm947_vm15 = vcmp.gt.f32.partialorder %v3613_v47, 20.0  ;;  %v1679_v18 = vadd.f32 1.0, %v1678_v29  ;;  %v1777_v33 = vsel %vm945_vm7, %v3554_v55, %v1665_v35 }
 0x1d3   :  { %v2274_v5 = vpop.eup %2273  ;;  %v1399_v61 = vmul.f32 -0.5, %v4166_v34  ;;  %2283 = vlog2.f32 %v1684_v32  ;;  %v1138_v3 = vmul.f32 1.442695, %v1013_v2  ;;  %v1842_v26 = vsel %vm1784_vm1, %v1777_v33, %v3554_v55 }
 0x1d4   :  { %v1386_v43 = vsel %vm4162_vm10, %v1383_v13, %v1380_v53  ;;  %v1668_v8 = vmul.f32 0.6931472, %v2274_v5  ;;  %vm4209_vm0 = vcmp.lt.f32.partialorder %v1681_v42, 0.0004427343  ;;  %v2276_v14 = vpop.eup %2275  ;;  %1907 = vst.msk [vmem:[%s4347_s2 + $0x1c8] sm:$0xff] %vm1849_vm4, %v1842_v26  ;;  %v982_v36 = vmin.f32 %v3717_v58, 20.0 }
 0x1d5   :  { %v1746_v51 = vsel %vm914_vm9, %v3588_v44, %v1386_v43  ;;  %v1402_v55 = vand.u32 2147483647, %v4166_v34  ;;  %2285 = vpow2.f32 %v1138_v3  ;;  %v1389_v20 = vmul.f32 0.6931472, %v2276_v14 }
 0x1d6   :  { %v1811_v56 = vsel %vm1784_vm1, %v1746_v51, %v3588_v44  ;;  %v1674_v22 = vsel %vm4175_vm12, %v1671_v30, %v1668_v8  ;;  %v1687_v50 = vmul.f32 -0.5, %v4181_v54  ;;  %v1400_v0 = vadd.f32 1.0, %v1399_v61 }
 0x1d7   :  { %v2278_v19 = vpop.eup %2277  ;;  %1876 = vst.msk [vmem:[%s4347_s2 + $0xd0] sm:$0xff] %vm1849_vm4, %v1811_v56  ;;  %v1778_v37 = vsel %vm946_vm11, %v3590_v9, %v1674_v22  ;;  %v1076_v25 = vmul.f32 1.442695, %v982_v36  ;;  %v1014_v44 = vmin.f32 %v3719_v39, 20.0  ;;  %v1395_v59 = vsel %vm4192_vm14, %v1392_v27, %v1389_v20 }
 0x1d8   :  { %v1843_v49 = vsel %vm1784_vm1, %v1778_v37, %v3590_v9  ;;  %v1677_v31 = vmul.f32 0.6931472, %v2278_v19  ;;  %v1680_v11 = vmul.f32 %v4142_v46, %v1679_v18  ;;  %v1747_v62 = vsel %vm915_vm13, %v3607_v16, %v1395_v59 }
 0x1d9   :  { %1908 = vst.msk [vmem:[%s4347_s2 + $0x1d0] sm:$0xff] %vm1849_vm4, %v1843_v49  ;;  %2287 = vpow2.f32 %v1076_v25  ;;  %v1140_v60 = vmul.f32 1.442695, %v1014_v44  ;;  %v983_v17 = vmin.f32 %v3725_v23, 20.0  ;;  %v1812_v63 = vsel %vm1784_vm1, %v1747_v62, %v3607_v16 }
 0x1da   :  { %v2280_v9 = vpop.eup %2279  ;;  %v1683_v46 = vsel %vm4209_vm0, %v1680_v11, %v1677_v31  ;;  %v1688_v7 = vadd.f32 1.0, %v1687_v50  ;;  %v1015_v13 = vmin.f32 %v3727_v1, 20.0  ;;  %1877 = vst.msk [vmem:[%s4347_s2 + $0xd8] sm:$0xff] %vm1849_vm4, %v1812_v63  ;;  %v1401_v12 = vmul.f32 %v4166_v34, %v1400_v0 }
 0x1db   :  { %v2282_v28 = vpop.eup %2281  ;;  %v1779_v29 = vsel %vm947_vm15, %v3613_v47, %v1683_v46  ;;  %v1690_v16 = vand.u32 2147483647, %v4181_v54  ;;  %v1405_v48 = vadd.f32 1.0, %v2280_v9  ;;  %2289 = vpow2.f32 %v1140_v60 }
 0x1dc   :  { %v1844_v15 = vsel %vm1784_vm1, %v1779_v29, %v3613_v47  ;;  %v1398_v10 = vmul.f32 0.6931472, %v2282_v28  ;;  %v1078_v2 = vmul.f32 1.442695, %v983_v17  ;;  %vm916_vm2 = vcmp.gt.f32.partialorder %v3663_v57, 20.0 }
 0x1dd   :  { %v2284_v52 = vpop.eup %2283  ;;  %1909 = vst.msk [vmem:[%s4347_s2 + $0x1d8] sm:$0xff] %vm1849_vm4, %v1844_v15  ;;  %vm1403_vm3 = vcmp.lt.f32.partialorder %v1402_v55, 0.0004427343  ;;  %2291 = vlog2.f32 %v1405_v48  ;;  %v1142_v34 = vmul.f32 1.442695, %v1015_v13  ;;  %v1689_v21 = vmul.f32 %v4181_v54, %v1688_v7 }
 0x1de   :  { %v1404_v38 = vsel %vm1403_vm3, %v1401_v12, %v1398_v10  ;;  %v1686_v42 = vmul.f32 0.6931472, %v2284_v52  ;;  %2293 = vpow2.f32 %v1078_v2  ;;  %vm948_vm5 = vcmp.gt.f32.partialorder %v3665_v24, 20.0 }
 0x1df   :  { %v2286_v47 = vpop.eup %2285  ;;  %v1748_v30 = vsel %vm916_vm2, %v3663_v57, %v1404_v38  ;;  %vm1691_vm6 = vcmp.lt.f32.partialorder %v1690_v16, 0.0004427343  ;;  %2295 = vpow2.f32 %v1142_v34  ;;  %v1408_v35 = vmul.f32 -0.5, %v2280_v9 }
 0x1e0   :  { %v1813_v41 = vsel %vm1784_vm1, %v1748_v30, %v3663_v57  ;;  %v1692_v32 = vsel %vm1691_vm6, %v1689_v21, %v1686_v42  ;;  %v1693_v53 = vadd.f32 1.0, %v2286_v47  ;;  %v1411_v5 = vand.u32 2147483647, %v2280_v9 }
 0x1e1   :  { %1878 = vst.msk [vmem:[%s4347_s2 + $0xe0] sm:$0xff] %vm1849_vm4, %v1813_v41  ;;  %v1780_v54 = vsel %vm948_vm5, %v3665_v24, %v1692_v32  ;;  %v1409_v57 = vadd.f32 1.0, %v1408_v35  ;;  %v1696_v61 = vmul.f32 -0.5, %v2286_v47  ;;  %vm917_vm8 = vcmp.gt.f32.partialorder %v3680_v45, 20.0 }
 0x1e2   :  { %v1845_v27 = vsel %vm1784_vm1, %v1780_v54, %v3665_v24  ;;  %2297 = vlog2.f32 %v1693_v53  ;;  %vm1412_vm7 = vcmp.lt.f32.partialorder %v1411_v5, 0.0004427343  ;;  %v1699_v22 = vand.u32 2147483647, %v2286_v47 }
 0x1e3   :  { %v2288_v18 = vpop.eup %2287  ;;  %1910 = vst.msk [vmem:[%s4347_s2 + $0x1e0] sm:$0xff] %vm1849_vm4, %v1845_v27  ;;  %v1410_v14 = vmul.f32 %v2280_v9, %v1409_v57  ;;  %v1697_v51 = vadd.f32 1.0, %v1696_v61  ;;  %vm949_vm10 = vcmp.gt.f32.partialorder %v3682_v40, 20.0  ;;  %vm918_vm12 = vcmp.gt.f32.partialorder %v3717_v58, 20.0 }
 0x1e4   :  { %v1414_v33 = vadd.f32 1.0, %v2288_v18  ;;  %v1417_v55 = vmul.f32 -0.5, %v2288_v18  ;;  %vm1700_vm9 = vcmp.lt.f32.partialorder %v1699_v22, 0.0004427343  ;;  %v1420_v59 = vand.u32 2147483647, %v2288_v18 }
 0x1e5   :  { %v2290_v3 = vpop.eup %2289  ;;  %v1698_v44 = vmul.f32 %v2286_v47, %v1697_v51  ;;  %vm950_vm14 = vcmp.gt.f32.partialorder %v3719_v39, 20.0  ;;  %vm919_vm0 = vcmp.gt.f32.partialorder %v3725_v23, 20.0  ;;  %vm951_vm3 = vcmp.gt.f32.partialorder %v3727_v1, 20.0 }
 0x1e6   :  { %2299 = vlog2.f32 %v1414_v33  ;;  %v1702_v43 = vadd.f32 1.0, %v2290_v3  ;;  %v1705_v0 = vmul.f32 -0.5, %v2290_v3  ;;  %v1418_v49 = vadd.f32 1.0, %v1417_v55 }
 0x1e7   :  { %v2292_v26 = vpop.eup %2291  ;;  %v1708_v7 = vand.u32 2147483647, %v2290_v3  ;;  %vm1421_vm11 = vcmp.lt.f32.partialorder %v1420_v59, 0.0004427343 }
 0x1e8   :  { %v2294_v8 = vpop.eup %2293  ;;  %v1407_v6 = vmul.f32 0.6931472, %v2292_v26  ;;  %2301 = vlog2.f32 %v1702_v43  ;;  %v1706_v17 = vadd.f32 1.0, %v1705_v0  ;;  %v1419_v46 = vmul.f32 %v2288_v18, %v1418_v49 }
 0x1e9   :  { %v2296_v24 = vpop.eup %2295  ;;  %v1423_v36 = vadd.f32 1.0, %v2294_v8  ;;  %v1426_v31 = vmul.f32 -0.5, %v2294_v8  ;;  %v1429_v12 = vand.u32 2147483647, %v2294_v8  ;;  %vm1709_vm13 = vcmp.lt.f32.partialorder %v1708_v7, 0.0004427343 }
 0x1ea   :  { %v1413_v56 = vsel %vm1412_vm7, %v1410_v14, %v1407_v6  ;;  %v1711_v20 = vadd.f32 1.0, %v2296_v24  ;;  %v1714_v62 = vmul.f32 -0.5, %v2296_v24  ;;  %v1717_v10 = vand.u32 2147483647, %v2296_v24 }
 0x1eb   :  { %v1749_v50 = vsel %vm917_vm8, %v3680_v45, %v1413_v56  ;;  %2303 = vlog2.f32 %v1423_v36  ;;  %v1427_v13 = vadd.f32 1.0, %v1426_v31  ;;  %vm1430_vm15 = vcmp.lt.f32.partialorder %v1429_v12, 0.0004427343 }
 0x1ec   :  { %v2298_v19 = vpop.eup %2297  ;;  %v1814_v37 = vsel %vm1784_vm1, %v1749_v50, %v3680_v45  ;;  %2305 = vlog2.f32 %v1711_v20  ;;  %v1715_v16 = vadd.f32 1.0, %v1714_v62  ;;  %vm1718_vm2 = vcmp.lt.f32.partialorder %v1717_v10, 0.0004427343 }
 0x1ed   :  { %1879 = vst.msk [vmem:[%s4347_s2 + $0xe8] sm:$0xff] %vm1849_vm4, %v1814_v37  ;;  %v1695_v25 = vmul.f32 0.6931472, %v2298_v19  ;;  %v1428_v21 = vmul.f32 %v2294_v8, %v1427_v13 }
 0x1ee   :  { %v1716_v41 = vmul.f32 %v2296_v24, %v1715_v16 }
 0x1ef   :  { %v1701_v11 = vsel %vm1700_vm9, %v1698_v44, %v1695_v25 }
 0x1f0   :  { %v2300_v60 = vpop.eup %2299  ;;  %v1781_v45 = vsel %vm949_vm10, %v3682_v40, %v1701_v11 }
 0x1f1   :  { %v1846_v9 = vsel %vm1784_vm1, %v1781_v45, %v3682_v40  ;;  %v1416_v63 = vmul.f32 0.6931472, %v2300_v60  ;;  %v1707_v40 = vmul.f32 %v2290_v3, %v1706_v17 }
 0x1f2   :  { %1911 = vst.msk [vmem:[%s4347_s2 + $0x1e8] sm:$0xff] %vm1849_vm4, %v1846_v9  ;;  %v2302_v28 = vpop.eup %2301 }
 0x1f3   :  { %v1422_v29 = vsel %vm1421_vm11, %v1419_v46, %v1416_v63  ;;  %v1704_v15 = vmul.f32 0.6931472, %v2302_v28 }
 0x1f4   :  { %v1750_v48 = vsel %vm918_vm12, %v3717_v58, %v1422_v29 }
 0x1f5   :  { %v2304_v2 = vpop.eup %2303  ;;  %v1815_v52 = vsel %vm1784_vm1, %v1750_v48, %v3717_v58  ;;  %v1710_v38 = vsel %vm1709_vm13, %v1707_v40, %v1704_v15 }
 0x1f6   :  { %v2306_v34 = vpop.eup %2305  ;;  %1880 = vst.msk [vmem:[%s4347_s2 + $0xf0] sm:$0xff] %vm1849_vm4, %v1815_v52  ;;  %v1425_v42 = vmul.f32 0.6931472, %v2304_v2  ;;  %v1782_v47 = vsel %vm950_vm14, %v3719_v39, %v1710_v38 }
 0x1f7   :  { %v1713_v30 = vmul.f32 0.6931472, %v2306_v34  ;;  %v1847_v58 = vsel %vm1784_vm1, %v1782_v47, %v3719_v39 }
 0x1f8   :  { %v1431_v32 = vsel %vm1430_vm15, %v1428_v21, %v1425_v42  ;;  %1912 = vst.msk [vmem:[%s4347_s2 + $0x1f0] sm:$0xff] %vm1849_vm4, %v1847_v58 }
 0x1f9   :  { %v1751_v35 = vsel %vm919_vm0, %v3725_v23, %v1431_v32  ;;  %v1719_v53 = vsel %vm1718_vm2, %v1716_v41, %v1713_v30 }
 0x1fa   :  { %v1816_v54 = vsel %vm1784_vm1, %v1751_v35, %v3725_v23  ;;  %v1783_v39 = vsel %vm951_vm3, %v3727_v1, %v1719_v53 }
 0x1fb   :  { %1881 = vst.msk [vmem:[%s4347_s2 + $0xf8] sm:$0xff] %vm1849_vm4, %v1816_v54  ;;  %v1848_v27 = vsel %vm1784_vm1, %v1783_v39, %v3727_v1 }
 0x1fc   :  { %1913 = vst.msk [vmem:[%s4347_s2 + $0x1f8] sm:$0xff] %vm1849_vm4, %v1848_v27 }

</bundles_post_ra>
